<compile_context>
chip_gen: v6e
topology: v6e:2x2x1
jax: 0.10.0
libtpu: 0.0.40
codegen_flags: <defaults>
</compile_context>

<pallas_src>
import jax
import jax.numpy as jnp
import numpy as np
from jax import lax
from jax.experimental import pallas as pl
from jax.experimental.pallas import tpu as pltpu

emb_dim = 5
hidden_size = 15
num_layers = 2


# ----------------------------------------------------------------------------
# Fused encoder kernel (single invocation, everything VMEM resident).
# Row layout for all "slab" buffers is flat (T*B, ...) with row r = t*B + b.
# ----------------------------------------------------------------------------
def encoder_kernel(ids_ref, emb_ref,
                   wih0f_ref, whh0f_ref, b0f_ref,
                   wih0b_ref, whh0b_ref, b0b_ref,
                   w1ff_ref, w1fb_ref, whh1f_ref, b1f_ref,
                   w1bf_ref, w1bb_ref, whh1b_ref, b1b_ref,
                   out_ref, hn_ref, cn_ref,
                   xgf_scr, xgb_scr, y0f_scr, y0b_scr):
    """ids_ref (T*B, 1) i32; emb_ref (V, E); Wih (Din, 4H), Whh (H, 4H),
    b (1, 4H) with gate column order [i|f|o|g] (pre-packed); out_ref (B, T, 2H)
    batch-first with [fwd | bwd] on the last axis; hn_ref / cn_ref (4, B, H) in
    PyTorch order.  xg*_scr (T*B, 4H) hold the precomputed input-gate slabs
    (reused by both layers); y0*_scr (T*B, H) hold layer-0 outputs."""
    f32 = jnp.float32
    TB = ids_ref.shape[0]
    V = emb_ref.shape[0]
    H = whh0f_ref.shape[0]
    B, T, _ = out_ref.shape

    # ---- Embedding: one (T*B, V) one-hot @ (V, E) matmul, stays in VMEM. ----
    one_hot = (lax.broadcasted_iota(jnp.int32, (TB, V), 1)
               == ids_ref[...]).astype(f32)
    x_emb = jnp.dot(one_hot, emb_ref[...], preferred_element_type=f32)  # (TB,E)

    # ---- Layer-0 input projections hoisted out of the recurrence; bias
    #      folded into the slab once. ----
    xgf_scr[...] = (jnp.dot(x_emb, wih0f_ref[...], preferred_element_type=f32)
                    + b0f_ref[...])
    xgb_scr[...] = (jnp.dot(x_emb, wih0b_ref[...], preferred_element_type=f32)
                    + b0b_ref[...])

    # ---- LSTM cell, gate columns [i|f|o|g]: one sigmoid (3H) + one tanh (H).
    def cell(z, c_prev):
        ifo = jax.nn.sigmoid(z[:, 0:3 * H])
        g = jnp.tanh(z[:, 3 * H:4 * H])
        i = ifo[:, 0:H]
        f = ifo[:, H:2 * H]
        o = ifo[:, 2 * H:3 * H]
        c = f * c_prev + i * g
        h = o * jnp.tanh(c)
        return h, c

    # ---- One layer = ONE T-step recurrence carrying both directions.
    #      fwd consumes time s, bwd consumes time T-1-s; the two matmuls /
    #      cells per step are independent and pipeline on MXU / EUP. ----
    def run_layer(xgf_ref, xgb_ref, whh_f_ref, whh_b_ref, write_fwd, write_bwd):
        whh_f = whh_f_ref[...]          # hoisted: loaded once per layer
        whh_b = whh_b_ref[...]
        zeros = jnp.zeros((B, H), f32)

        def body(s, carry):
            hf, cf, hb, cb = carry
            tb = T - 1 - s
            rf = pl.multiple_of(s * B, B)
            rb = pl.multiple_of(tb * B, B)
            zf = (xgf_ref[pl.ds(rf, B), :]
                  + jnp.dot(hf, whh_f, preferred_element_type=f32))
            zb = (xgb_ref[pl.ds(rb, B), :]
                  + jnp.dot(hb, whh_b, preferred_element_type=f32))
            hf, cf = cell(zf, cf)
            hb, cb = cell(zb, cb)
            write_fwd(s, hf)
            write_bwd(tb, hb)
            return (hf, cf, hb, cb)

        return lax.fori_loop(0, T, body, (zeros, zeros, zeros, zeros),
                             unroll=True)

    # ---- Layer 0: outputs go to VMEM scratch in natural time order. ----
    def wy0f(t, h):
        y0f_scr[pl.ds(pl.multiple_of(t * B, B), B), :] = h

    def wy0b(t, h):
        y0b_scr[pl.ds(pl.multiple_of(t * B, B), B), :] = h

    hf, cf, hb, cb = run_layer(xgf_scr, xgb_scr, whh0f_ref, whh0b_ref,
                               wy0f, wy0b)
    hn_ref[0] = hf
    cn_ref[0] = cf
    hn_ref[1] = hb
    cn_ref[1] = cb

    # ---- Layer-1 input projections: whole-sequence slab matmuls on the
    #      layer-0 outputs (Wih pre-split into fwd/bwd halves), reusing the
    #      gate scratches. ----
    y0f = y0f_scr[...]
    y0b = y0b_scr[...]
    xgf_scr[...] = (jnp.dot(y0f, w1ff_ref[...], preferred_element_type=f32)
                    + jnp.dot(y0b, w1fb_ref[...], preferred_element_type=f32)
                    + b1f_ref[...])
    xgb_scr[...] = (jnp.dot(y0f, w1bf_ref[...], preferred_element_type=f32)
                    + jnp.dot(y0b, w1bb_ref[...], preferred_element_type=f32)
                    + b1b_ref[...])

    # ---- Layer 1: write directly in (B, T, 2H) batch-first layout. ----
    def woutf(t, h):
        out_ref[:, pl.ds(t, 1), 0:H] = h[:, None, :]

    def woutb(t, h):
        out_ref[:, pl.ds(t, 1), H:2 * H] = h[:, None, :]

    hf, cf, hb, cb = run_layer(xgf_scr, xgb_scr, whh1f_ref, whh1b_ref,
                               woutf, woutb)
    hn_ref[2] = hf
    cn_ref[2] = cf
    hn_ref[3] = hb
    cn_ref[3] = cb


# ----------------------------------------------------------------------------
# Wrapper: one pallas_call for the whole encoder (2-layer, bidirectional).
# ----------------------------------------------------------------------------
def encoder_forward(packed, inputs):
    """packed: kernel-ready params from pack_params.  inputs: (B, T) int32 ids.
    Returns (outputs (B, T, 2H), (h_n, c_n))."""
    B, T = inputs.shape
    H = hidden_size

    # Token ids flattened to (T*B, 1) with row r = t*B + b (tiny int transpose).
    ids = jnp.transpose(inputs).reshape(T * B, 1).astype(jnp.int32)

    vmem = pl.BlockSpec(memory_space=pltpu.MemorySpace.VMEM)

    outputs, h_n, c_n = pl.pallas_call(
        encoder_kernel,
        out_shape=(
            jax.ShapeDtypeStruct((B, T, 2 * H), jnp.float32),            # out
            jax.ShapeDtypeStruct((2 * num_layers, B, H), jnp.float32),   # h_n
            jax.ShapeDtypeStruct((2 * num_layers, B, H), jnp.float32),   # c_n
        ),
        in_specs=[vmem] * 16,
        out_specs=(vmem, vmem, vmem),
        scratch_shapes=[
            pltpu.VMEM((T * B, 4 * H), jnp.float32),   # fwd input-gate slab
            pltpu.VMEM((T * B, 4 * H), jnp.float32),   # bwd input-gate slab
            pltpu.VMEM((T * B, H), jnp.float32),       # layer-0 fwd outputs
            pltpu.VMEM((T * B, H), jnp.float32),       # layer-0 bwd outputs
        ],
    )(ids, packed["embedding"],
      *packed["l0_d0"], *packed["l0_d1"],
      *packed["l1_d0"], *packed["l1_d1"])

    return outputs, (h_n, c_n)


# ----------------------------------------------------------------------------
# Parameter init (PyTorch layout) and one-time packing into kernel layout.
# ----------------------------------------------------------------------------
def init_params(key, input_dim, emb, hidden, layers):
    """PyTorch-style params: w_ih (4H, in), w_hh (4H, H), b_ih (4H,), b_hh (4H,)
    per (layer, direction); gate row order [i|f|g|o] like nn.LSTM."""
    num_dirs = 2
    keys = jax.random.split(key, 1 + layers * num_dirs * 4)
    params = {"embedding": jax.random.normal(keys[0], (input_dim, emb),
                                             jnp.float32)}
    bound = 1.0 / float(hidden) ** 0.5
    k = 1
    for l in range(layers):
        in_size = emb if l == 0 else hidden * num_dirs
        for d in range(num_dirs):
            w_ih = jax.random.uniform(keys[k], (4 * hidden, in_size),
                                      jnp.float32, -bound, bound); k += 1
            w_hh = jax.random.uniform(keys[k], (4 * hidden, hidden),
                                      jnp.float32, -bound, bound); k += 1
            b_ih = jax.random.uniform(keys[k], (4 * hidden,),
                                      jnp.float32, -bound, bound); k += 1
            b_hh = jax.random.uniform(keys[k], (4 * hidden,),
                                      jnp.float32, -bound, bound); k += 1
            params[f"l{l}_d{d}"] = (w_ih, w_hh, b_ih, b_hh)
    return params


def pack_params(params):
    """One-time repack into the kernel layout: transpose to (in, 4H)/(H, 4H),
    permute gate columns [i|f|g|o] -> [i|f|o|g], fuse b_ih + b_hh, and pre-split
    layer-1 Wih into forward/backward-input halves (no per-call slicing)."""
    H = hidden_size
    perm = np.concatenate([np.arange(0, H),            # i
                           np.arange(H, 2 * H),        # f
                           np.arange(3 * H, 4 * H),    # o
                           np.arange(2 * H, 3 * H)])   # g

    def pack(w_ih, w_hh, b_ih, b_hh):
        wih = jnp.transpose(w_ih)[:, perm]                 # (in, 4H)
        whh = jnp.transpose(w_hh)[:, perm]                 # (H, 4H)
        b = (b_ih + b_hh)[perm].reshape(1, 4 * H)
        return wih, whh, b

    packed = {"embedding": params["embedding"]}
    for d in range(2):
        wih, whh, b = pack(*params[f"l0_d{d}"])
        packed[f"l0_d{d}"] = (wih, whh, b)
    for d in range(2):
        wih, whh, b = pack(*params[f"l1_d{d}"])
        packed[f"l1_d{d}"] = (wih[:H], wih[H:], whh, b)    # fwd / bwd halves
    return packed


# ----------------------------------------------------------------------------
# Pure-JAX reference (PyTorch-layout params, HIGHEST-precision dots).
# ----------------------------------------------------------------------------
def encoder_forward_ref(params, inputs):
    B, T = inputs.shape
    H = hidden_size

    def dot(a, w):
        return jnp.dot(a, w, precision=lax.Precision.HIGHEST,
                       preferred_element_type=jnp.float32)

    def run(x_seq, w_ih, w_hh, b_ih, b_hh, reverse):
        wih = jnp.transpose(w_ih)
        whh = jnp.transpose(w_hh)
        b = (b_ih + b_hh)[None, :]
        xs = x_seq[::-1] if reverse else x_seq
        h = jnp.zeros((B, H), jnp.float32)
        c = jnp.zeros((B, H), jnp.float32)
        outs = []
        for t in range(T):
            z = dot(xs[t], wih) + dot(h, whh) + b
            i = jax.nn.sigmoid(z[:, :H])
            f = jax.nn.sigmoid(z[:, H:2 * H])
            g = jnp.tanh(z[:, 2 * H:3 * H])
            o = jax.nn.sigmoid(z[:, 3 * H:])
            c = f * c + i * g
            h = o * jnp.tanh(c)
            outs.append(h)
        out = jnp.stack(outs, 0)
        if reverse:
            out = out[::-1]
        return out, h, c

    layer_in = jnp.transpose(jnp.take(params["embedding"], inputs, axis=0),
                             (1, 0, 2))                     # (T, B, E)
    h_list, c_list = [], []
    for l in range(num_layers):
        dir_outs = []
        for d in range(2):
            out, hn, cn = run(layer_in, *params[f"l{l}_d{d}"],
                              reverse=(d == 1))
            dir_outs.append(out)
            h_list.append(hn)
            c_list.append(cn)
        layer_in = jnp.concatenate(dir_outs, axis=-1)        # (T, B, 2H)
    outputs = jnp.transpose(layer_in, (1, 0, 2))             # (B, T, 2H)
    return outputs, (jnp.stack(h_list, 0), jnp.stack(c_list, 0))


if __name__ == "__main__":
    B, T = 2, 8
    input_dim = 11   # vocabulary size

    key = jax.random.PRNGKey(0)
    pkey, ikey = jax.random.split(key)
    params = init_params(pkey, input_dim, emb_dim, hidden_size, num_layers)
    packed = pack_params(params)     # one-time repack, outside the hot path
    inputs = jax.random.randint(ikey, (B, T), 0, input_dim, dtype=jnp.int32)

    fwd = jax.jit(encoder_forward)
    outputs, (h_n, c_n) = fwd(packed, inputs)
    jax.block_until_ready((outputs, h_n, c_n))

    assert outputs.shape == (B, T, 2 * hidden_size)
    assert h_n.shape == (2 * num_layers, B, hidden_size)
    assert c_n.shape == (2 * num_layers, B, hidden_size)

    # Verify against the pure-JAX reference (gate reorder + direction fusion
    # change weight packing, so re-verification matters).
    ro, (rh, rc) = encoder_forward_ref(params, inputs)
    np.testing.assert_allclose(np.asarray(outputs), np.asarray(ro),
                               rtol=1e-4, atol=1e-4)
    np.testing.assert_allclose(np.asarray(h_n), np.asarray(rh),
                               rtol=1e-4, atol=1e-4)
    np.testing.assert_allclose(np.asarray(c_n), np.asarray(rc),
                               rtol=1e-4, atol=1e-4)

    print("KERNEL_OK")
</pallas_src>

<mosaic_0001>
module attributes {stable_mosaic.version = 11 : i64} {
  func.func @encoder_kernel(%arg0: memref<16x1xi32, #tpu.memory_space<vmem>>, %arg1: memref<11x5xf32, #tpu.memory_space<vmem>>, %arg2: memref<5x60xf32, #tpu.memory_space<vmem>>, %arg3: memref<15x60xf32, #tpu.memory_space<vmem>>, %arg4: memref<1x60xf32, #tpu.memory_space<vmem>>, %arg5: memref<5x60xf32, #tpu.memory_space<vmem>>, %arg6: memref<15x60xf32, #tpu.memory_space<vmem>>, %arg7: memref<1x60xf32, #tpu.memory_space<vmem>>, %arg8: memref<15x60xf32, #tpu.memory_space<vmem>>, %arg9: memref<15x60xf32, #tpu.memory_space<vmem>>, %arg10: memref<15x60xf32, #tpu.memory_space<vmem>>, %arg11: memref<1x60xf32, #tpu.memory_space<vmem>>, %arg12: memref<15x60xf32, #tpu.memory_space<vmem>>, %arg13: memref<15x60xf32, #tpu.memory_space<vmem>>, %arg14: memref<15x60xf32, #tpu.memory_space<vmem>>, %arg15: memref<1x60xf32, #tpu.memory_space<vmem>>, %arg16: memref<2x8x30xf32, #tpu.memory_space<vmem>>, %arg17: memref<4x2x15xf32, #tpu.memory_space<vmem>>, %arg18: memref<4x2x15xf32, #tpu.memory_space<vmem>>, %arg19: memref<16x60xf32, #tpu.memory_space<vmem>>, %arg20: memref<16x60xf32, #tpu.memory_space<vmem>>, %arg21: memref<16x15xf32, #tpu.memory_space<vmem>>, %arg22: memref<16x15xf32, #tpu.memory_space<vmem>>) attributes {dimension_semantics = [], scalar_prefetch = 0 : i64, scratch_operands = 4 : i64, tpu.core_type = #tpu.core_type<tc>} {
    %0 = tpu.iota {dimensions = array<i32: 1>} : vector<16x11xi32>
    %c0 = arith.constant 0 : index
    %c0_0 = arith.constant 0 : index
    %1 = vector.load %arg0[%c0, %c0_0] : memref<16x1xi32, #tpu.memory_space<vmem>>, vector<16x1xi32>
    %2 = vector.broadcast %1 : vector<16x1xi32> to vector<16x11xi32>
    %3 = arith.cmpi eq, %0, %2 : vector<16x11xi32>
    %4 = arith.extui %3 : vector<16x11xi1> to vector<16x11xi32>
    %5 = arith.sitofp %4 : vector<16x11xi32> to vector<16x11xf32>
    %c0_1 = arith.constant 0 : index
    %c0_2 = arith.constant 0 : index
    %6 = vector.load %arg1[%c0_1, %c0_2] : memref<11x5xf32, #tpu.memory_space<vmem>>, vector<11x5xf32>
    %cst = arith.constant dense<0.000000e+00> : vector<16x5xf32>
    %7 = tpu.matmul %5, %6, %cst {dimension_numbers = #tpu.dot_dimension_numbers<[1], [0], [0], [1], [0, 0, 1, 1], [], []>} : vector<16x11xf32>, vector<11x5xf32>, vector<16x5xf32> -> vector<16x5xf32>
    %c0_3 = arith.constant 0 : index
    %c0_4 = arith.constant 0 : index
    %8 = vector.load %arg2[%c0_3, %c0_4] : memref<5x60xf32, #tpu.memory_space<vmem>>, vector<5x60xf32>
    %cst_5 = arith.constant dense<0.000000e+00> : vector<16x60xf32>
    %9 = tpu.matmul %7, %8, %cst_5 {dimension_numbers = #tpu.dot_dimension_numbers<[1], [0], [0], [1], [0, 0, 1, 1], [], []>} : vector<16x5xf32>, vector<5x60xf32>, vector<16x60xf32> -> vector<16x60xf32>
    %c0_6 = arith.constant 0 : index
    %c0_7 = arith.constant 0 : index
    %10 = vector.load %arg4[%c0_6, %c0_7] : memref<1x60xf32, #tpu.memory_space<vmem>>, vector<1x60xf32>
    %11 = vector.broadcast %10 : vector<1x60xf32> to vector<16x60xf32>
    %12 = arith.addf %9, %11 : vector<16x60xf32>
    %c0_8 = arith.constant 0 : index
    %c0_9 = arith.constant 0 : index
    %13 = vector.load %arg19[%c0_8, %c0_9] : memref<16x60xf32, #tpu.memory_space<vmem>>, vector<16x60xf32>
    tpu.vector_store %arg19[%c0_8, %c0_9], %12 {strides = array<i32>} : memref<16x60xf32, #tpu.memory_space<vmem>>, vector<16x60xf32>,
    %c0_10 = arith.constant 0 : index
    %c0_11 = arith.constant 0 : index
    %14 = vector.load %arg5[%c0_10, %c0_11] : memref<5x60xf32, #tpu.memory_space<vmem>>, vector<5x60xf32>
    %cst_12 = arith.constant dense<0.000000e+00> : vector<16x60xf32>
    %15 = tpu.matmul %7, %14, %cst_12 {dimension_numbers = #tpu.dot_dimension_numbers<[1], [0], [0], [1], [0, 0, 1, 1], [], []>} : vector<16x5xf32>, vector<5x60xf32>, vector<16x60xf32> -> vector<16x60xf32>
    %c0_13 = arith.constant 0 : index
    %c0_14 = arith.constant 0 : index
    %16 = vector.load %arg7[%c0_13, %c0_14] : memref<1x60xf32, #tpu.memory_space<vmem>>, vector<1x60xf32>
    %17 = vector.broadcast %16 : vector<1x60xf32> to vector<16x60xf32>
    %18 = arith.addf %15, %17 : vector<16x60xf32>
    %c0_15 = arith.constant 0 : index
    %c0_16 = arith.constant 0 : index
    %19 = vector.load %arg20[%c0_15, %c0_16] : memref<16x60xf32, #tpu.memory_space<vmem>>, vector<16x60xf32>
    tpu.vector_store %arg20[%c0_15, %c0_16], %18 {strides = array<i32>} : memref<16x60xf32, #tpu.memory_space<vmem>>, vector<16x60xf32>,
    %c0_17 = arith.constant 0 : index
    %c0_18 = arith.constant 0 : index
    %20 = vector.load %arg3[%c0_17, %c0_18] : memref<15x60xf32, #tpu.memory_space<vmem>>, vector<15x60xf32>
    %c0_19 = arith.constant 0 : index
    %c0_20 = arith.constant 0 : index
    %21 = vector.load %arg6[%c0_19, %c0_20] : memref<15x60xf32, #tpu.memory_space<vmem>>, vector<15x60xf32>
    %cst_21 = arith.constant 0.000000e+00 : f32
    %22 = vector.broadcast %cst_21 : f32 to vector<2x15xf32>
    %c0_i32 = arith.constant 0 : i32
    %c7_i32 = arith.constant 7 : i32
    %23 = arith.subi %c7_i32, %c0_i32 : i32
    %c2_i32 = arith.constant 2 : i32
    %24 = arith.muli %c0_i32, %c2_i32 : i32
    %25 = tpu.assume_multiple %24, 2 : i32
    %c2_i32_22 = arith.constant 2 : i32
    %26 = arith.muli %23, %c2_i32_22 : i32
    %27 = tpu.assume_multiple %26, 2 : i32
    %28 = arith.index_cast %25 : i32 to index
    %c0_23 = arith.constant 0 : index
    %29 = vector.load %arg19[%28, %c0_23] : memref<16x60xf32, #tpu.memory_space<vmem>>, vector<2x60xf32>
    %cst_24 = arith.constant dense<0.000000e+00> : vector<2x60xf32>
    %30 = tpu.matmul %22, %20, %cst_24 {dimension_numbers = #tpu.dot_dimension_numbers<[1], [0], [0], [1], [0, 0, 1, 1], [], []>} : vector<2x15xf32>, vector<15x60xf32>, vector<2x60xf32> -> vector<2x60xf32>
    %31 = arith.addf %29, %30 : vector<2x60xf32>
    %32 = arith.index_cast %27 : i32 to index
    %c0_25 = arith.constant 0 : index
    %33 = vector.load %arg20[%32, %c0_25] : memref<16x60xf32, #tpu.memory_space<vmem>>, vector<2x60xf32>
    %cst_26 = arith.constant dense<0.000000e+00> : vector<2x60xf32>
    %34 = tpu.matmul %22, %21, %cst_26 {dimension_numbers = #tpu.dot_dimension_numbers<[1], [0], [0], [1], [0, 0, 1, 1], [], []>} : vector<2x15xf32>, vector<15x60xf32>, vector<2x60xf32> -> vector<2x60xf32>
    %35 = arith.addf %33, %34 : vector<2x60xf32>
    %36 = vector.extract_strided_slice %31 {offsets = [0, 0], sizes = [2, 45], strides = [1, 1]} : vector<2x60xf32> to vector<2x45xf32>
    %37 = arith.negf %36 : vector<2x45xf32>
    %38 = math.exp %37 : vector<2x45xf32>
    %cst_27 = arith.constant 1.000000e+00 : f32
    %39 = vector.broadcast %cst_27 : f32 to vector<2x45xf32>
    %40 = arith.addf %39, %38 : vector<2x45xf32>
    %41 = arith.divf %39, %40 : vector<2x45xf32>
    %42 = vector.extract_strided_slice %31 {offsets = [0, 45], sizes = [2, 15], strides = [1, 1]} : vector<2x60xf32> to vector<2x15xf32>
    %43 = math.tanh %42 : vector<2x15xf32>
    %44 = vector.extract_strided_slice %41 {offsets = [0, 0], sizes = [2, 15], strides = [1, 1]} : vector<2x45xf32> to vector<2x15xf32>
    %45 = vector.extract_strided_slice %41 {offsets = [0, 15], sizes = [2, 15], strides = [1, 1]} : vector<2x45xf32> to vector<2x15xf32>
    %46 = vector.extract_strided_slice %41 {offsets = [0, 30], sizes = [2, 15], strides = [1, 1]} : vector<2x45xf32> to vector<2x15xf32>
    %47 = arith.mulf %45, %22 : vector<2x15xf32>
    %48 = arith.mulf %44, %43 : vector<2x15xf32>
    %49 = arith.addf %47, %48 : vector<2x15xf32>
    %50 = math.tanh %49 : vector<2x15xf32>
    %51 = arith.mulf %46, %50 : vector<2x15xf32>
    %52 = vector.extract_strided_slice %35 {offsets = [0, 0], sizes = [2, 45], strides = [1, 1]} : vector<2x60xf32> to vector<2x45xf32>
    %53 = arith.negf %52 : vector<2x45xf32>
    %54 = math.exp %53 : vector<2x45xf32>
    %cst_28 = arith.constant 1.000000e+00 : f32
    %55 = vector.broadcast %cst_28 : f32 to vector<2x45xf32>
    %56 = arith.addf %55, %54 : vector<2x45xf32>
    %57 = arith.divf %55, %56 : vector<2x45xf32>
    %58 = vector.extract_strided_slice %35 {offsets = [0, 45], sizes = [2, 15], strides = [1, 1]} : vector<2x60xf32> to vector<2x15xf32>
    %59 = math.tanh %58 : vector<2x15xf32>
    %60 = vector.extract_strided_slice %57 {offsets = [0, 0], sizes = [2, 15], strides = [1, 1]} : vector<2x45xf32> to vector<2x15xf32>
    %61 = vector.extract_strided_slice %57 {offsets = [0, 15], sizes = [2, 15], strides = [1, 1]} : vector<2x45xf32> to vector<2x15xf32>
    %62 = vector.extract_strided_slice %57 {offsets = [0, 30], sizes = [2, 15], strides = [1, 1]} : vector<2x45xf32> to vector<2x15xf32>
    %63 = arith.mulf %61, %22 : vector<2x15xf32>
    %64 = arith.mulf %60, %59 : vector<2x15xf32>
    %65 = arith.addf %63, %64 : vector<2x15xf32>
    %66 = math.tanh %65 : vector<2x15xf32>
    %67 = arith.mulf %62, %66 : vector<2x15xf32>
    %c2_i32_29 = arith.constant 2 : i32
    %68 = arith.muli %c0_i32, %c2_i32_29 : i32
    %69 = tpu.assume_multiple %68, 2 : i32
    %70 = arith.index_cast %69 : i32 to index
    %c0_30 = arith.constant 0 : index
    %71 = vector.load %arg21[%70, %c0_30] : memref<16x15xf32, #tpu.memory_space<vmem>>, vector<2x15xf32>
    tpu.vector_store %arg21[%70, %c0_30], %51 {strides = array<i32>} : memref<16x15xf32, #tpu.memory_space<vmem>>, vector<2x15xf32>,
    %c2_i32_31 = arith.constant 2 : i32
    %72 = arith.muli %23, %c2_i32_31 : i32
    %73 = tpu.assume_multiple %72, 2 : i32
    %74 = arith.index_cast %73 : i32 to index
    %c0_32 = arith.constant 0 : index
    %75 = vector.load %arg22[%74, %c0_32] : memref<16x15xf32, #tpu.memory_space<vmem>>, vector<2x15xf32>
    tpu.vector_store %arg22[%74, %c0_32], %67 {strides = array<i32>} : memref<16x15xf32, #tpu.memory_space<vmem>>, vector<2x15xf32>,
    %c1_i32 = arith.constant 1 : i32
    %c7_i32_33 = arith.constant 7 : i32
    %76 = arith.subi %c7_i32_33, %c1_i32 : i32
    %c2_i32_34 = arith.constant 2 : i32
    %77 = arith.muli %c1_i32, %c2_i32_34 : i32
    %78 = tpu.assume_multiple %77, 2 : i32
    %c2_i32_35 = arith.constant 2 : i32
    %79 = arith.muli %76, %c2_i32_35 : i32
    %80 = tpu.assume_multiple %79, 2 : i32
    %81 = arith.index_cast %78 : i32 to index
    %c0_36 = arith.constant 0 : index
    %82 = vector.load %arg19[%81, %c0_36] : memref<16x60xf32, #tpu.memory_space<vmem>>, vector<2x60xf32>
    %cst_37 = arith.constant dense<0.000000e+00> : vector<2x60xf32>
    %83 = tpu.matmul %51, %20, %cst_37 {dimension_numbers = #tpu.dot_dimension_numbers<[1], [0], [0], [1], [0, 0, 1, 1], [], []>} : vector<2x15xf32>, vector<15x60xf32>, vector<2x60xf32> -> vector<2x60xf32>
    %84 = arith.addf %82, %83 : vector<2x60xf32>
    %85 = arith.index_cast %80 : i32 to index
    %c0_38 = arith.constant 0 : index
    %86 = vector.load %arg20[%85, %c0_38] : memref<16x60xf32, #tpu.memory_space<vmem>>, vector<2x60xf32>
    %cst_39 = arith.constant dense<0.000000e+00> : vector<2x60xf32>
    %87 = tpu.matmul %67, %21, %cst_39 {dimension_numbers = #tpu.dot_dimension_numbers<[1], [0], [0], [1], [0, 0, 1, 1], [], []>} : vector<2x15xf32>, vector<15x60xf32>, vector<2x60xf32> -> vector<2x60xf32>
    %88 = arith.addf %86, %87 : vector<2x60xf32>
    %89 = vector.extract_strided_slice %84 {offsets = [0, 0], sizes = [2, 45], strides = [1, 1]} : vector<2x60xf32> to vector<2x45xf32>
    %90 = arith.negf %89 : vector<2x45xf32>
    %91 = math.exp %90 : vector<2x45xf32>
    %cst_40 = arith.constant 1.000000e+00 : f32
    %92 = vector.broadcast %cst_40 : f32 to vector<2x45xf32>
    %93 = arith.addf %92, %91 : vector<2x45xf32>
    %94 = arith.divf %92, %93 : vector<2x45xf32>
    %95 = vector.extract_strided_slice %84 {offsets = [0, 45], sizes = [2, 15], strides = [1, 1]} : vector<2x60xf32> to vector<2x15xf32>
    %96 = math.tanh %95 : vector<2x15xf32>
    %97 = vector.extract_strided_slice %94 {offsets = [0, 0], sizes = [2, 15], strides = [1, 1]} : vector<2x45xf32> to vector<2x15xf32>
    %98 = vector.extract_strided_slice %94 {offsets = [0, 15], sizes = [2, 15], strides = [1, 1]} : vector<2x45xf32> to vector<2x15xf32>
    %99 = vector.extract_strided_slice %94 {offsets = [0, 30], sizes = [2, 15], strides = [1, 1]} : vector<2x45xf32> to vector<2x15xf32>
    %100 = arith.mulf %98, %49 : vector<2x15xf32>
    %101 = arith.mulf %97, %96 : vector<2x15xf32>
    %102 = arith.addf %100, %101 : vector<2x15xf32>
    %103 = math.tanh %102 : vector<2x15xf32>
    %104 = arith.mulf %99, %103 : vector<2x15xf32>
    %105 = vector.extract_strided_slice %88 {offsets = [0, 0], sizes = [2, 45], strides = [1, 1]} : vector<2x60xf32> to vector<2x45xf32>
    %106 = arith.negf %105 : vector<2x45xf32>
    %107 = math.exp %106 : vector<2x45xf32>
    %cst_41 = arith.constant 1.000000e+00 : f32
    %108 = vector.broadcast %cst_41 : f32 to vector<2x45xf32>
    %109 = arith.addf %108, %107 : vector<2x45xf32>
    %110 = arith.divf %108, %109 : vector<2x45xf32>
    %111 = vector.extract_strided_slice %88 {offsets = [0, 45], sizes = [2, 15], strides = [1, 1]} : vector<2x60xf32> to vector<2x15xf32>
    %112 = math.tanh %111 : vector<2x15xf32>
    %113 = vector.extract_strided_slice %110 {offsets = [0, 0], sizes = [2, 15], strides = [1, 1]} : vector<2x45xf32> to vector<2x15xf32>
    %114 = vector.extract_strided_slice %110 {offsets = [0, 15], sizes = [2, 15], strides = [1, 1]} : vector<2x45xf32> to vector<2x15xf32>
    %115 = vector.extract_strided_slice %110 {offsets = [0, 30], sizes = [2, 15], strides = [1, 1]} : vector<2x45xf32> to vector<2x15xf32>
    %116 = arith.mulf %114, %65 : vector<2x15xf32>
    %117 = arith.mulf %113, %112 : vector<2x15xf32>
    %118 = arith.addf %116, %117 : vector<2x15xf32>
    %119 = math.tanh %118 : vector<2x15xf32>
    %120 = arith.mulf %115, %119 : vector<2x15xf32>
    %c2_i32_42 = arith.constant 2 : i32
    %121 = arith.muli %c1_i32, %c2_i32_42 : i32
    %122 = tpu.assume_multiple %121, 2 : i32
    %123 = arith.index_cast %122 : i32 to index
    %c0_43 = arith.constant 0 : index
    %124 = vector.load %arg21[%123, %c0_43] : memref<16x15xf32, #tpu.memory_space<vmem>>, vector<2x15xf32>
    tpu.vector_store %arg21[%123, %c0_43], %104 {strides = array<i32>} : memref<16x15xf32, #tpu.memory_space<vmem>>, vector<2x15xf32>,
    %c2_i32_44 = arith.constant 2 : i32
    %125 = arith.muli %76, %c2_i32_44 : i32
    %126 = tpu.assume_multiple %125, 2 : i32
    %127 = arith.index_cast %126 : i32 to index
    %c0_45 = arith.constant 0 : index
    %128 = vector.load %arg22[%127, %c0_45] : memref<16x15xf32, #tpu.memory_space<vmem>>, vector<2x15xf32>
    tpu.vector_store %arg22[%127, %c0_45], %120 {strides = array<i32>} : memref<16x15xf32, #tpu.memory_space<vmem>>, vector<2x15xf32>,
    %c2_i32_46 = arith.constant 2 : i32
    %c7_i32_47 = arith.constant 7 : i32
    %129 = arith.subi %c7_i32_47, %c2_i32_46 : i32
    %c2_i32_48 = arith.constant 2 : i32
    %130 = arith.muli %c2_i32_46, %c2_i32_48 : i32
    %131 = tpu.assume_multiple %130, 2 : i32
    %c2_i32_49 = arith.constant 2 : i32
    %132 = arith.muli %129, %c2_i32_49 : i32
    %133 = tpu.assume_multiple %132, 2 : i32
    %134 = arith.index_cast %131 : i32 to index
    %c0_50 = arith.constant 0 : index
    %135 = vector.load %arg19[%134, %c0_50] : memref<16x60xf32, #tpu.memory_space<vmem>>, vector<2x60xf32>
    %cst_51 = arith.constant dense<0.000000e+00> : vector<2x60xf32>
    %136 = tpu.matmul %104, %20, %cst_51 {dimension_numbers = #tpu.dot_dimension_numbers<[1], [0], [0], [1], [0, 0, 1, 1], [], []>} : vector<2x15xf32>, vector<15x60xf32>, vector<2x60xf32> -> vector<2x60xf32>
    %137 = arith.addf %135, %136 : vector<2x60xf32>
    %138 = arith.index_cast %133 : i32 to index
    %c0_52 = arith.constant 0 : index
    %139 = vector.load %arg20[%138, %c0_52] : memref<16x60xf32, #tpu.memory_space<vmem>>, vector<2x60xf32>
    %cst_53 = arith.constant dense<0.000000e+00> : vector<2x60xf32>
    %140 = tpu.matmul %120, %21, %cst_53 {dimension_numbers = #tpu.dot_dimension_numbers<[1], [0], [0], [1], [0, 0, 1, 1], [], []>} : vector<2x15xf32>, vector<15x60xf32>, vector<2x60xf32> -> vector<2x60xf32>
    %141 = arith.addf %139, %140 : vector<2x60xf32>
    %142 = vector.extract_strided_slice %137 {offsets = [0, 0], sizes = [2, 45], strides = [1, 1]} : vector<2x60xf32> to vector<2x45xf32>
    %143 = arith.negf %142 : vector<2x45xf32>
    %144 = math.exp %143 : vector<2x45xf32>
    %cst_54 = arith.constant 1.000000e+00 : f32
    %145 = vector.broadcast %cst_54 : f32 to vector<2x45xf32>
    %146 = arith.addf %145, %144 : vector<2x45xf32>
    %147 = arith.divf %145, %146 : vector<2x45xf32>
    %148 = vector.extract_strided_slice %137 {offsets = [0, 45], sizes = [2, 15], strides = [1, 1]} : vector<2x60xf32> to vector<2x15xf32>
    %149 = math.tanh %148 : vector<2x15xf32>
    %150 = vector.extract_strided_slice %147 {offsets = [0, 0], sizes = [2, 15], strides = [1, 1]} : vector<2x45xf32> to vector<2x15xf32>
    %151 = vector.extract_strided_slice %147 {offsets = [0, 15], sizes = [2, 15], strides = [1, 1]} : vector<2x45xf32> to vector<2x15xf32>
    %152 = vector.extract_strided_slice %147 {offsets = [0, 30], sizes = [2, 15], strides = [1, 1]} : vector<2x45xf32> to vector<2x15xf32>
    %153 = arith.mulf %151, %102 : vector<2x15xf32>
    %154 = arith.mulf %150, %149 : vector<2x15xf32>
    %155 = arith.addf %153, %154 : vector<2x15xf32>
    %156 = math.tanh %155 : vector<2x15xf32>
    %157 = arith.mulf %152, %156 : vector<2x15xf32>
    %158 = vector.extract_strided_slice %141 {offsets = [0, 0], sizes = [2, 45], strides = [1, 1]} : vector<2x60xf32> to vector<2x45xf32>
    %159 = arith.negf %158 : vector<2x45xf32>
    %160 = math.exp %159 : vector<2x45xf32>
    %cst_55 = arith.constant 1.000000e+00 : f32
    %161 = vector.broadcast %cst_55 : f32 to vector<2x45xf32>
    %162 = arith.addf %161, %160 : vector<2x45xf32>
    %163 = arith.divf %161, %162 : vector<2x45xf32>
    %164 = vector.extract_strided_slice %141 {offsets = [0, 45], sizes = [2, 15], strides = [1, 1]} : vector<2x60xf32> to vector<2x15xf32>
    %165 = math.tanh %164 : vector<2x15xf32>
    %166 = vector.extract_strided_slice %163 {offsets = [0, 0], sizes = [2, 15], strides = [1, 1]} : vector<2x45xf32> to vector<2x15xf32>
    %167 = vector.extract_strided_slice %163 {offsets = [0, 15], sizes = [2, 15], strides = [1, 1]} : vector<2x45xf32> to vector<2x15xf32>
    %168 = vector.extract_strided_slice %163 {offsets = [0, 30], sizes = [2, 15], strides = [1, 1]} : vector<2x45xf32> to vector<2x15xf32>
    %169 = arith.mulf %167, %118 : vector<2x15xf32>
    %170 = arith.mulf %166, %165 : vector<2x15xf32>
    %171 = arith.addf %169, %170 : vector<2x15xf32>
    %172 = math.tanh %171 : vector<2x15xf32>
    %173 = arith.mulf %168, %172 : vector<2x15xf32>
    %c2_i32_56 = arith.constant 2 : i32
    %174 = arith.muli %c2_i32_46, %c2_i32_56 : i32
    %175 = tpu.assume_multiple %174, 2 : i32
    %176 = arith.index_cast %175 : i32 to index
    %c0_57 = arith.constant 0 : index
    %177 = vector.load %arg21[%176, %c0_57] : memref<16x15xf32, #tpu.memory_space<vmem>>, vector<2x15xf32>
    tpu.vector_store %arg21[%176, %c0_57], %157 {strides = array<i32>} : memref<16x15xf32, #tpu.memory_space<vmem>>, vector<2x15xf32>,
    %c2_i32_58 = arith.constant 2 : i32
    %178 = arith.muli %129, %c2_i32_58 : i32
    %179 = tpu.assume_multiple %178, 2 : i32
    %180 = arith.index_cast %179 : i32 to index
    %c0_59 = arith.constant 0 : index
    %181 = vector.load %arg22[%180, %c0_59] : memref<16x15xf32, #tpu.memory_space<vmem>>, vector<2x15xf32>
    tpu.vector_store %arg22[%180, %c0_59], %173 {strides = array<i32>} : memref<16x15xf32, #tpu.memory_space<vmem>>, vector<2x15xf32>,
    %c3_i32 = arith.constant 3 : i32
    %c7_i32_60 = arith.constant 7 : i32
    %182 = arith.subi %c7_i32_60, %c3_i32 : i32
    %c2_i32_61 = arith.constant 2 : i32
    %183 = arith.muli %c3_i32, %c2_i32_61 : i32
    %184 = tpu.assume_multiple %183, 2 : i32
    %c2_i32_62 = arith.constant 2 : i32
    %185 = arith.muli %182, %c2_i32_62 : i32
    %186 = tpu.assume_multiple %185, 2 : i32
    %187 = arith.index_cast %184 : i32 to index
    %c0_63 = arith.constant 0 : index
    %188 = vector.load %arg19[%187, %c0_63] : memref<16x60xf32, #tpu.memory_space<vmem>>, vector<2x60xf32>
    %cst_64 = arith.constant dense<0.000000e+00> : vector<2x60xf32>
    %189 = tpu.matmul %157, %20, %cst_64 {dimension_numbers = #tpu.dot_dimension_numbers<[1], [0], [0], [1], [0, 0, 1, 1], [], []>} : vector<2x15xf32>, vector<15x60xf32>, vector<2x60xf32> -> vector<2x60xf32>
    %190 = arith.addf %188, %189 : vector<2x60xf32>
    %191 = arith.index_cast %186 : i32 to index
    %c0_65 = arith.constant 0 : index
    %192 = vector.load %arg20[%191, %c0_65] : memref<16x60xf32, #tpu.memory_space<vmem>>, vector<2x60xf32>
    %cst_66 = arith.constant dense<0.000000e+00> : vector<2x60xf32>
    %193 = tpu.matmul %173, %21, %cst_66 {dimension_numbers = #tpu.dot_dimension_numbers<[1], [0], [0], [1], [0, 0, 1, 1], [], []>} : vector<2x15xf32>, vector<15x60xf32>, vector<2x60xf32> -> vector<2x60xf32>
    %194 = arith.addf %192, %193 : vector<2x60xf32>
    %195 = vector.extract_strided_slice %190 {offsets = [0, 0], sizes = [2, 45], strides = [1, 1]} : vector<2x60xf32> to vector<2x45xf32>
    %196 = arith.negf %195 : vector<2x45xf32>
    %197 = math.exp %196 : vector<2x45xf32>
    %cst_67 = arith.constant 1.000000e+00 : f32
    %198 = vector.broadcast %cst_67 : f32 to vector<2x45xf32>
    %199 = arith.addf %198, %197 : vector<2x45xf32>
    %200 = arith.divf %198, %199 : vector<2x45xf32>
    %201 = vector.extract_strided_slice %190 {offsets = [0, 45], sizes = [2, 15], strides = [1, 1]} : vector<2x60xf32> to vector<2x15xf32>
    %202 = math.tanh %201 : vector<2x15xf32>
    %203 = vector.extract_strided_slice %200 {offsets = [0, 0], sizes = [2, 15], strides = [1, 1]} : vector<2x45xf32> to vector<2x15xf32>
    %204 = vector.extract_strided_slice %200 {offsets = [0, 15], sizes = [2, 15], strides = [1, 1]} : vector<2x45xf32> to vector<2x15xf32>
    %205 = vector.extract_strided_slice %200 {offsets = [0, 30], sizes = [2, 15], strides = [1, 1]} : vector<2x45xf32> to vector<2x15xf32>
    %206 = arith.mulf %204, %155 : vector<2x15xf32>
    %207 = arith.mulf %203, %202 : vector<2x15xf32>
    %208 = arith.addf %206, %207 : vector<2x15xf32>
    %209 = math.tanh %208 : vector<2x15xf32>
    %210 = arith.mulf %205, %209 : vector<2x15xf32>
    %211 = vector.extract_strided_slice %194 {offsets = [0, 0], sizes = [2, 45], strides = [1, 1]} : vector<2x60xf32> to vector<2x45xf32>
    %212 = arith.negf %211 : vector<2x45xf32>
    %213 = math.exp %212 : vector<2x45xf32>
    %cst_68 = arith.constant 1.000000e+00 : f32
    %214 = vector.broadcast %cst_68 : f32 to vector<2x45xf32>
    %215 = arith.addf %214, %213 : vector<2x45xf32>
    %216 = arith.divf %214, %215 : vector<2x45xf32>
    %217 = vector.extract_strided_slice %194 {offsets = [0, 45], sizes = [2, 15], strides = [1, 1]} : vector<2x60xf32> to vector<2x15xf32>
    %218 = math.tanh %217 : vector<2x15xf32>
    %219 = vector.extract_strided_slice %216 {offsets = [0, 0], sizes = [2, 15], strides = [1, 1]} : vector<2x45xf32> to vector<2x15xf32>
    %220 = vector.extract_strided_slice %216 {offsets = [0, 15], sizes = [2, 15], strides = [1, 1]} : vector<2x45xf32> to vector<2x15xf32>
    %221 = vector.extract_strided_slice %216 {offsets = [0, 30], sizes = [2, 15], strides = [1, 1]} : vector<2x45xf32> to vector<2x15xf32>
    %222 = arith.mulf %220, %171 : vector<2x15xf32>
    %223 = arith.mulf %219, %218 : vector<2x15xf32>
    %224 = arith.addf %222, %223 : vector<2x15xf32>
    %225 = math.tanh %224 : vector<2x15xf32>
    %226 = arith.mulf %221, %225 : vector<2x15xf32>
    %c2_i32_69 = arith.constant 2 : i32
    %227 = arith.muli %c3_i32, %c2_i32_69 : i32
    %228 = tpu.assume_multiple %227, 2 : i32
    %229 = arith.index_cast %228 : i32 to index
    %c0_70 = arith.constant 0 : index
    %230 = vector.load %arg21[%229, %c0_70] : memref<16x15xf32, #tpu.memory_space<vmem>>, vector<2x15xf32>
    tpu.vector_store %arg21[%229, %c0_70], %210 {strides = array<i32>} : memref<16x15xf32, #tpu.memory_space<vmem>>, vector<2x15xf32>,
    %c2_i32_71 = arith.constant 2 : i32
    %231 = arith.muli %182, %c2_i32_71 : i32
    %232 = tpu.assume_multiple %231, 2 : i32
    %233 = arith.index_cast %232 : i32 to index
    %c0_72 = arith.constant 0 : index
    %234 = vector.load %arg22[%233, %c0_72] : memref<16x15xf32, #tpu.memory_space<vmem>>, vector<2x15xf32>
    tpu.vector_store %arg22[%233, %c0_72], %226 {strides = array<i32>} : memref<16x15xf32, #tpu.memory_space<vmem>>, vector<2x15xf32>,
    %c4_i32 = arith.constant 4 : i32
    %c7_i32_73 = arith.constant 7 : i32
    %235 = arith.subi %c7_i32_73, %c4_i32 : i32
    %c2_i32_74 = arith.constant 2 : i32
    %236 = arith.muli %c4_i32, %c2_i32_74 : i32
    %237 = tpu.assume_multiple %236, 2 : i32
    %c2_i32_75 = arith.constant 2 : i32
    %238 = arith.muli %235, %c2_i32_75 : i32
    %239 = tpu.assume_multiple %238, 2 : i32
    %240 = arith.index_cast %237 : i32 to index
    %c0_76 = arith.constant 0 : index
    %241 = vector.load %arg19[%240, %c0_76] : memref<16x60xf32, #tpu.memory_space<vmem>>, vector<2x60xf32>
    %cst_77 = arith.constant dense<0.000000e+00> : vector<2x60xf32>
    %242 = tpu.matmul %210, %20, %cst_77 {dimension_numbers = #tpu.dot_dimension_numbers<[1], [0], [0], [1], [0, 0, 1, 1], [], []>} : vector<2x15xf32>, vector<15x60xf32>, vector<2x60xf32> -> vector<2x60xf32>
    %243 = arith.addf %241, %242 : vector<2x60xf32>
    %244 = arith.index_cast %239 : i32 to index
    %c0_78 = arith.constant 0 : index
    %245 = vector.load %arg20[%244, %c0_78] : memref<16x60xf32, #tpu.memory_space<vmem>>, vector<2x60xf32>
    %cst_79 = arith.constant dense<0.000000e+00> : vector<2x60xf32>
    %246 = tpu.matmul %226, %21, %cst_79 {dimension_numbers = #tpu.dot_dimension_numbers<[1], [0], [0], [1], [0, 0, 1, 1], [], []>} : vector<2x15xf32>, vector<15x60xf32>, vector<2x60xf32> -> vector<2x60xf32>
    %247 = arith.addf %245, %246 : vector<2x60xf32>
    %248 = vector.extract_strided_slice %243 {offsets = [0, 0], sizes = [2, 45], strides = [1, 1]} : vector<2x60xf32> to vector<2x45xf32>
    %249 = arith.negf %248 : vector<2x45xf32>
    %250 = math.exp %249 : vector<2x45xf32>
    %cst_80 = arith.constant 1.000000e+00 : f32
    %251 = vector.broadcast %cst_80 : f32 to vector<2x45xf32>
    %252 = arith.addf %251, %250 : vector<2x45xf32>
    %253 = arith.divf %251, %252 : vector<2x45xf32>
    %254 = vector.extract_strided_slice %243 {offsets = [0, 45], sizes = [2, 15], strides = [1, 1]} : vector<2x60xf32> to vector<2x15xf32>
    %255 = math.tanh %254 : vector<2x15xf32>
    %256 = vector.extract_strided_slice %253 {offsets = [0, 0], sizes = [2, 15], strides = [1, 1]} : vector<2x45xf32> to vector<2x15xf32>
    %257 = vector.extract_strided_slice %253 {offsets = [0, 15], sizes = [2, 15], strides = [1, 1]} : vector<2x45xf32> to vector<2x15xf32>
    %258 = vector.extract_strided_slice %253 {offsets = [0, 30], sizes = [2, 15], strides = [1, 1]} : vector<2x45xf32> to vector<2x15xf32>
    %259 = arith.mulf %257, %208 : vector<2x15xf32>
    %260 = arith.mulf %256, %255 : vector<2x15xf32>
    %261 = arith.addf %259, %260 : vector<2x15xf32>
    %262 = math.tanh %261 : vector<2x15xf32>
    %263 = arith.mulf %258, %262 : vector<2x15xf32>
    %264 = vector.extract_strided_slice %247 {offsets = [0, 0], sizes = [2, 45], strides = [1, 1]} : vector<2x60xf32> to vector<2x45xf32>
    %265 = arith.negf %264 : vector<2x45xf32>
    %266 = math.exp %265 : vector<2x45xf32>
    %cst_81 = arith.constant 1.000000e+00 : f32
    %267 = vector.broadcast %cst_81 : f32 to vector<2x45xf32>
    %268 = arith.addf %267, %266 : vector<2x45xf32>
    %269 = arith.divf %267, %268 : vector<2x45xf32>
    %270 = vector.extract_strided_slice %247 {offsets = [0, 45], sizes = [2, 15], strides = [1, 1]} : vector<2x60xf32> to vector<2x15xf32>
    %271 = math.tanh %270 : vector<2x15xf32>
    %272 = vector.extract_strided_slice %269 {offsets = [0, 0], sizes = [2, 15], strides = [1, 1]} : vector<2x45xf32> to vector<2x15xf32>
    %273 = vector.extract_strided_slice %269 {offsets = [0, 15], sizes = [2, 15], strides = [1, 1]} : vector<2x45xf32> to vector<2x15xf32>
    %274 = vector.extract_strided_slice %269 {offsets = [0, 30], sizes = [2, 15], strides = [1, 1]} : vector<2x45xf32> to vector<2x15xf32>
    %275 = arith.mulf %273, %224 : vector<2x15xf32>
    %276 = arith.mulf %272, %271 : vector<2x15xf32>
    %277 = arith.addf %275, %276 : vector<2x15xf32>
    %278 = math.tanh %277 : vector<2x15xf32>
    %279 = arith.mulf %274, %278 : vector<2x15xf32>
    %c2_i32_82 = arith.constant 2 : i32
    %280 = arith.muli %c4_i32, %c2_i32_82 : i32
    %281 = tpu.assume_multiple %280, 2 : i32
    %282 = arith.index_cast %281 : i32 to index
    %c0_83 = arith.constant 0 : index
    %283 = vector.load %arg21[%282, %c0_83] : memref<16x15xf32, #tpu.memory_space<vmem>>, vector<2x15xf32>
    tpu.vector_store %arg21[%282, %c0_83], %263 {strides = array<i32>} : memref<16x15xf32, #tpu.memory_space<vmem>>, vector<2x15xf32>,
    %c2_i32_84 = arith.constant 2 : i32
    %284 = arith.muli %235, %c2_i32_84 : i32
    %285 = tpu.assume_multiple %284, 2 : i32
    %286 = arith.index_cast %285 : i32 to index
    %c0_85 = arith.constant 0 : index
    %287 = vector.load %arg22[%286, %c0_85] : memref<16x15xf32, #tpu.memory_space<vmem>>, vector<2x15xf32>
    tpu.vector_store %arg22[%286, %c0_85], %279 {strides = array<i32>} : memref<16x15xf32, #tpu.memory_space<vmem>>, vector<2x15xf32>,
    %c5_i32 = arith.constant 5 : i32
    %c7_i32_86 = arith.constant 7 : i32
    %288 = arith.subi %c7_i32_86, %c5_i32 : i32
    %c2_i32_87 = arith.constant 2 : i32
    %289 = arith.muli %c5_i32, %c2_i32_87 : i32
    %290 = tpu.assume_multiple %289, 2 : i32
    %c2_i32_88 = arith.constant 2 : i32
    %291 = arith.muli %288, %c2_i32_88 : i32
    %292 = tpu.assume_multiple %291, 2 : i32
    %293 = arith.index_cast %290 : i32 to index
    %c0_89 = arith.constant 0 : index
    %294 = vector.load %arg19[%293, %c0_89] : memref<16x60xf32, #tpu.memory_space<vmem>>, vector<2x60xf32>
    %cst_90 = arith.constant dense<0.000000e+00> : vector<2x60xf32>
    %295 = tpu.matmul %263, %20, %cst_90 {dimension_numbers = #tpu.dot_dimension_numbers<[1], [0], [0], [1], [0, 0, 1, 1], [], []>} : vector<2x15xf32>, vector<15x60xf32>, vector<2x60xf32> -> vector<2x60xf32>
    %296 = arith.addf %294, %295 : vector<2x60xf32>
    %297 = arith.index_cast %292 : i32 to index
    %c0_91 = arith.constant 0 : index
    %298 = vector.load %arg20[%297, %c0_91] : memref<16x60xf32, #tpu.memory_space<vmem>>, vector<2x60xf32>
    %cst_92 = arith.constant dense<0.000000e+00> : vector<2x60xf32>
    %299 = tpu.matmul %279, %21, %cst_92 {dimension_numbers = #tpu.dot_dimension_numbers<[1], [0], [0], [1], [0, 0, 1, 1], [], []>} : vector<2x15xf32>, vector<15x60xf32>, vector<2x60xf32> -> vector<2x60xf32>
    %300 = arith.addf %298, %299 : vector<2x60xf32>
    %301 = vector.extract_strided_slice %296 {offsets = [0, 0], sizes = [2, 45], strides = [1, 1]} : vector<2x60xf32> to vector<2x45xf32>
    %302 = arith.negf %301 : vector<2x45xf32>
    %303 = math.exp %302 : vector<2x45xf32>
    %cst_93 = arith.constant 1.000000e+00 : f32
    %304 = vector.broadcast %cst_93 : f32 to vector<2x45xf32>
    %305 = arith.addf %304, %303 : vector<2x45xf32>
    %306 = arith.divf %304, %305 : vector<2x45xf32>
    %307 = vector.extract_strided_slice %296 {offsets = [0, 45], sizes = [2, 15], strides = [1, 1]} : vector<2x60xf32> to vector<2x15xf32>
    %308 = math.tanh %307 : vector<2x15xf32>
    %309 = vector.extract_strided_slice %306 {offsets = [0, 0], sizes = [2, 15], strides = [1, 1]} : vector<2x45xf32> to vector<2x15xf32>
    %310 = vector.extract_strided_slice %306 {offsets = [0, 15], sizes = [2, 15], strides = [1, 1]} : vector<2x45xf32> to vector<2x15xf32>
    %311 = vector.extract_strided_slice %306 {offsets = [0, 30], sizes = [2, 15], strides = [1, 1]} : vector<2x45xf32> to vector<2x15xf32>
    %312 = arith.mulf %310, %261 : vector<2x15xf32>
    %313 = arith.mulf %309, %308 : vector<2x15xf32>
    %314 = arith.addf %312, %313 : vector<2x15xf32>
    %315 = math.tanh %314 : vector<2x15xf32>
    %316 = arith.mulf %311, %315 : vector<2x15xf32>
    %317 = vector.extract_strided_slice %300 {offsets = [0, 0], sizes = [2, 45], strides = [1, 1]} : vector<2x60xf32> to vector<2x45xf32>
    %318 = arith.negf %317 : vector<2x45xf32>
    %319 = math.exp %318 : vector<2x45xf32>
    %cst_94 = arith.constant 1.000000e+00 : f32
    %320 = vector.broadcast %cst_94 : f32 to vector<2x45xf32>
    %321 = arith.addf %320, %319 : vector<2x45xf32>
    %322 = arith.divf %320, %321 : vector<2x45xf32>
    %323 = vector.extract_strided_slice %300 {offsets = [0, 45], sizes = [2, 15], strides = [1, 1]} : vector<2x60xf32> to vector<2x15xf32>
    %324 = math.tanh %323 : vector<2x15xf32>
    %325 = vector.extract_strided_slice %322 {offsets = [0, 0], sizes = [2, 15], strides = [1, 1]} : vector<2x45xf32> to vector<2x15xf32>
    %326 = vector.extract_strided_slice %322 {offsets = [0, 15], sizes = [2, 15], strides = [1, 1]} : vector<2x45xf32> to vector<2x15xf32>
    %327 = vector.extract_strided_slice %322 {offsets = [0, 30], sizes = [2, 15], strides = [1, 1]} : vector<2x45xf32> to vector<2x15xf32>
    %328 = arith.mulf %326, %277 : vector<2x15xf32>
    %329 = arith.mulf %325, %324 : vector<2x15xf32>
    %330 = arith.addf %328, %329 : vector<2x15xf32>
    %331 = math.tanh %330 : vector<2x15xf32>
    %332 = arith.mulf %327, %331 : vector<2x15xf32>
    %c2_i32_95 = arith.constant 2 : i32
    %333 = arith.muli %c5_i32, %c2_i32_95 : i32
    %334 = tpu.assume_multiple %333, 2 : i32
    %335 = arith.index_cast %334 : i32 to index
    %c0_96 = arith.constant 0 : index
    %336 = vector.load %arg21[%335, %c0_96] : memref<16x15xf32, #tpu.memory_space<vmem>>, vector<2x15xf32>
    tpu.vector_store %arg21[%335, %c0_96], %316 {strides = array<i32>} : memref<16x15xf32, #tpu.memory_space<vmem>>, vector<2x15xf32>,
    %c2_i32_97 = arith.constant 2 : i32
    %337 = arith.muli %288, %c2_i32_97 : i32
    %338 = tpu.assume_multiple %337, 2 : i32
    %339 = arith.index_cast %338 : i32 to index
    %c0_98 = arith.constant 0 : index
    %340 = vector.load %arg22[%339, %c0_98] : memref<16x15xf32, #tpu.memory_space<vmem>>, vector<2x15xf32>
    tpu.vector_store %arg22[%339, %c0_98], %332 {strides = array<i32>} : memref<16x15xf32, #tpu.memory_space<vmem>>, vector<2x15xf32>,
    %c6_i32 = arith.constant 6 : i32
    %c7_i32_99 = arith.constant 7 : i32
    %341 = arith.subi %c7_i32_99, %c6_i32 : i32
    %c2_i32_100 = arith.constant 2 : i32
    %342 = arith.muli %c6_i32, %c2_i32_100 : i32
    %343 = tpu.assume_multiple %342, 2 : i32
    %c2_i32_101 = arith.constant 2 : i32
    %344 = arith.muli %341, %c2_i32_101 : i32
    %345 = tpu.assume_multiple %344, 2 : i32
    %346 = arith.index_cast %343 : i32 to index
    %c0_102 = arith.constant 0 : index
    %347 = vector.load %arg19[%346, %c0_102] : memref<16x60xf32, #tpu.memory_space<vmem>>, vector<2x60xf32>
    %cst_103 = arith.constant dense<0.000000e+00> : vector<2x60xf32>
    %348 = tpu.matmul %316, %20, %cst_103 {dimension_numbers = #tpu.dot_dimension_numbers<[1], [0], [0], [1], [0, 0, 1, 1], [], []>} : vector<2x15xf32>, vector<15x60xf32>, vector<2x60xf32> -> vector<2x60xf32>
    %349 = arith.addf %347, %348 : vector<2x60xf32>
    %350 = arith.index_cast %345 : i32 to index
    %c0_104 = arith.constant 0 : index
    %351 = vector.load %arg20[%350, %c0_104] : memref<16x60xf32, #tpu.memory_space<vmem>>, vector<2x60xf32>
    %cst_105 = arith.constant dense<0.000000e+00> : vector<2x60xf32>
    %352 = tpu.matmul %332, %21, %cst_105 {dimension_numbers = #tpu.dot_dimension_numbers<[1], [0], [0], [1], [0, 0, 1, 1], [], []>} : vector<2x15xf32>, vector<15x60xf32>, vector<2x60xf32> -> vector<2x60xf32>
    %353 = arith.addf %351, %352 : vector<2x60xf32>
    %354 = vector.extract_strided_slice %349 {offsets = [0, 0], sizes = [2, 45], strides = [1, 1]} : vector<2x60xf32> to vector<2x45xf32>
    %355 = arith.negf %354 : vector<2x45xf32>
    %356 = math.exp %355 : vector<2x45xf32>
    %cst_106 = arith.constant 1.000000e+00 : f32
    %357 = vector.broadcast %cst_106 : f32 to vector<2x45xf32>
    %358 = arith.addf %357, %356 : vector<2x45xf32>
    %359 = arith.divf %357, %358 : vector<2x45xf32>
    %360 = vector.extract_strided_slice %349 {offsets = [0, 45], sizes = [2, 15], strides = [1, 1]} : vector<2x60xf32> to vector<2x15xf32>
    %361 = math.tanh %360 : vector<2x15xf32>
    %362 = vector.extract_strided_slice %359 {offsets = [0, 0], sizes = [2, 15], strides = [1, 1]} : vector<2x45xf32> to vector<2x15xf32>
    %363 = vector.extract_strided_slice %359 {offsets = [0, 15], sizes = [2, 15], strides = [1, 1]} : vector<2x45xf32> to vector<2x15xf32>
    %364 = vector.extract_strided_slice %359 {offsets = [0, 30], sizes = [2, 15], strides = [1, 1]} : vector<2x45xf32> to vector<2x15xf32>
    %365 = arith.mulf %363, %314 : vector<2x15xf32>
    %366 = arith.mulf %362, %361 : vector<2x15xf32>
    %367 = arith.addf %365, %366 : vector<2x15xf32>
    %368 = math.tanh %367 : vector<2x15xf32>
    %369 = arith.mulf %364, %368 : vector<2x15xf32>
    %370 = vector.extract_strided_slice %353 {offsets = [0, 0], sizes = [2, 45], strides = [1, 1]} : vector<2x60xf32> to vector<2x45xf32>
    %371 = arith.negf %370 : vector<2x45xf32>
    %372 = math.exp %371 : vector<2x45xf32>
    %cst_107 = arith.constant 1.000000e+00 : f32
    %373 = vector.broadcast %cst_107 : f32 to vector<2x45xf32>
    %374 = arith.addf %373, %372 : vector<2x45xf32>
    %375 = arith.divf %373, %374 : vector<2x45xf32>
    %376 = vector.extract_strided_slice %353 {offsets = [0, 45], sizes = [2, 15], strides = [1, 1]} : vector<2x60xf32> to vector<2x15xf32>
    %377 = math.tanh %376 : vector<2x15xf32>
    %378 = vector.extract_strided_slice %375 {offsets = [0, 0], sizes = [2, 15], strides = [1, 1]} : vector<2x45xf32> to vector<2x15xf32>
    %379 = vector.extract_strided_slice %375 {offsets = [0, 15], sizes = [2, 15], strides = [1, 1]} : vector<2x45xf32> to vector<2x15xf32>
    %380 = vector.extract_strided_slice %375 {offsets = [0, 30], sizes = [2, 15], strides = [1, 1]} : vector<2x45xf32> to vector<2x15xf32>
    %381 = arith.mulf %379, %330 : vector<2x15xf32>
    %382 = arith.mulf %378, %377 : vector<2x15xf32>
    %383 = arith.addf %381, %382 : vector<2x15xf32>
    %384 = math.tanh %383 : vector<2x15xf32>
    %385 = arith.mulf %380, %384 : vector<2x15xf32>
    %c2_i32_108 = arith.constant 2 : i32
    %386 = arith.muli %c6_i32, %c2_i32_108 : i32
    %387 = tpu.assume_multiple %386, 2 : i32
    %388 = arith.index_cast %387 : i32 to index
    %c0_109 = arith.constant 0 : index
    %389 = vector.load %arg21[%388, %c0_109] : memref<16x15xf32, #tpu.memory_space<vmem>>, vector<2x15xf32>
    tpu.vector_store %arg21[%388, %c0_109], %369 {strides = array<i32>} : memref<16x15xf32, #tpu.memory_space<vmem>>, vector<2x15xf32>,
    %c2_i32_110 = arith.constant 2 : i32
    %390 = arith.muli %341, %c2_i32_110 : i32
    %391 = tpu.assume_multiple %390, 2 : i32
    %392 = arith.index_cast %391 : i32 to index
    %c0_111 = arith.constant 0 : index
    %393 = vector.load %arg22[%392, %c0_111] : memref<16x15xf32, #tpu.memory_space<vmem>>, vector<2x15xf32>
    tpu.vector_store %arg22[%392, %c0_111], %385 {strides = array<i32>} : memref<16x15xf32, #tpu.memory_space<vmem>>, vector<2x15xf32>,
    %c7_i32_112 = arith.constant 7 : i32
    %c7_i32_113 = arith.constant 7 : i32
    %394 = arith.subi %c7_i32_113, %c7_i32_112 : i32
    %c2_i32_114 = arith.constant 2 : i32
    %395 = arith.muli %c7_i32_112, %c2_i32_114 : i32
    %396 = tpu.assume_multiple %395, 2 : i32
    %c2_i32_115 = arith.constant 2 : i32
    %397 = arith.muli %394, %c2_i32_115 : i32
    %398 = tpu.assume_multiple %397, 2 : i32
    %399 = arith.index_cast %396 : i32 to index
    %c0_116 = arith.constant 0 : index
    %400 = vector.load %arg19[%399, %c0_116] : memref<16x60xf32, #tpu.memory_space<vmem>>, vector<2x60xf32>
    %cst_117 = arith.constant dense<0.000000e+00> : vector<2x60xf32>
    %401 = tpu.matmul %369, %20, %cst_117 {dimension_numbers = #tpu.dot_dimension_numbers<[1], [0], [0], [1], [0, 0, 1, 1], [], []>} : vector<2x15xf32>, vector<15x60xf32>, vector<2x60xf32> -> vector<2x60xf32>
    %402 = arith.addf %400, %401 : vector<2x60xf32>
    %403 = arith.index_cast %398 : i32 to index
    %c0_118 = arith.constant 0 : index
    %404 = vector.load %arg20[%403, %c0_118] : memref<16x60xf32, #tpu.memory_space<vmem>>, vector<2x60xf32>
    %cst_119 = arith.constant dense<0.000000e+00> : vector<2x60xf32>
    %405 = tpu.matmul %385, %21, %cst_119 {dimension_numbers = #tpu.dot_dimension_numbers<[1], [0], [0], [1], [0, 0, 1, 1], [], []>} : vector<2x15xf32>, vector<15x60xf32>, vector<2x60xf32> -> vector<2x60xf32>
    %406 = arith.addf %404, %405 : vector<2x60xf32>
    %407 = vector.extract_strided_slice %402 {offsets = [0, 0], sizes = [2, 45], strides = [1, 1]} : vector<2x60xf32> to vector<2x45xf32>
    %408 = arith.negf %407 : vector<2x45xf32>
    %409 = math.exp %408 : vector<2x45xf32>
    %cst_120 = arith.constant 1.000000e+00 : f32
    %410 = vector.broadcast %cst_120 : f32 to vector<2x45xf32>
    %411 = arith.addf %410, %409 : vector<2x45xf32>
    %412 = arith.divf %410, %411 : vector<2x45xf32>
    %413 = vector.extract_strided_slice %402 {offsets = [0, 45], sizes = [2, 15], strides = [1, 1]} : vector<2x60xf32> to vector<2x15xf32>
    %414 = math.tanh %413 : vector<2x15xf32>
    %415 = vector.extract_strided_slice %412 {offsets = [0, 0], sizes = [2, 15], strides = [1, 1]} : vector<2x45xf32> to vector<2x15xf32>
    %416 = vector.extract_strided_slice %412 {offsets = [0, 15], sizes = [2, 15], strides = [1, 1]} : vector<2x45xf32> to vector<2x15xf32>
    %417 = vector.extract_strided_slice %412 {offsets = [0, 30], sizes = [2, 15], strides = [1, 1]} : vector<2x45xf32> to vector<2x15xf32>
    %418 = arith.mulf %416, %367 : vector<2x15xf32>
    %419 = arith.mulf %415, %414 : vector<2x15xf32>
    %420 = arith.addf %418, %419 : vector<2x15xf32>
    %421 = math.tanh %420 : vector<2x15xf32>
    %422 = arith.mulf %417, %421 : vector<2x15xf32>
    %423 = vector.extract_strided_slice %406 {offsets = [0, 0], sizes = [2, 45], strides = [1, 1]} : vector<2x60xf32> to vector<2x45xf32>
    %424 = arith.negf %423 : vector<2x45xf32>
    %425 = math.exp %424 : vector<2x45xf32>
    %cst_121 = arith.constant 1.000000e+00 : f32
    %426 = vector.broadcast %cst_121 : f32 to vector<2x45xf32>
    %427 = arith.addf %426, %425 : vector<2x45xf32>
    %428 = arith.divf %426, %427 : vector<2x45xf32>
    %429 = vector.extract_strided_slice %406 {offsets = [0, 45], sizes = [2, 15], strides = [1, 1]} : vector<2x60xf32> to vector<2x15xf32>
    %430 = math.tanh %429 : vector<2x15xf32>
    %431 = vector.extract_strided_slice %428 {offsets = [0, 0], sizes = [2, 15], strides = [1, 1]} : vector<2x45xf32> to vector<2x15xf32>
    %432 = vector.extract_strided_slice %428 {offsets = [0, 15], sizes = [2, 15], strides = [1, 1]} : vector<2x45xf32> to vector<2x15xf32>
    %433 = vector.extract_strided_slice %428 {offsets = [0, 30], sizes = [2, 15], strides = [1, 1]} : vector<2x45xf32> to vector<2x15xf32>
    %434 = arith.mulf %432, %383 : vector<2x15xf32>
    %435 = arith.mulf %431, %430 : vector<2x15xf32>
    %436 = arith.addf %434, %435 : vector<2x15xf32>
    %437 = math.tanh %436 : vector<2x15xf32>
    %438 = arith.mulf %433, %437 : vector<2x15xf32>
    %c2_i32_122 = arith.constant 2 : i32
    %439 = arith.muli %c7_i32_112, %c2_i32_122 : i32
    %440 = tpu.assume_multiple %439, 2 : i32
    %441 = arith.index_cast %440 : i32 to index
    %c0_123 = arith.constant 0 : index
    %442 = vector.load %arg21[%441, %c0_123] : memref<16x15xf32, #tpu.memory_space<vmem>>, vector<2x15xf32>
    tpu.vector_store %arg21[%441, %c0_123], %422 {strides = array<i32>} : memref<16x15xf32, #tpu.memory_space<vmem>>, vector<2x15xf32>,
    %c2_i32_124 = arith.constant 2 : i32
    %443 = arith.muli %394, %c2_i32_124 : i32
    %444 = tpu.assume_multiple %443, 2 : i32
    %445 = arith.index_cast %444 : i32 to index
    %c0_125 = arith.constant 0 : index
    %446 = vector.load %arg22[%445, %c0_125] : memref<16x15xf32, #tpu.memory_space<vmem>>, vector<2x15xf32>
    tpu.vector_store %arg22[%445, %c0_125], %438 {strides = array<i32>} : memref<16x15xf32, #tpu.memory_space<vmem>>, vector<2x15xf32>,
    %c8_i32 = arith.constant 8 : i32
    %c0_126 = arith.constant 0 : index
    %c0_127 = arith.constant 0 : index
    %c0_128 = arith.constant 0 : index
    %447 = vector.load %arg17[%c0_126, %c0_127, %c0_128] : memref<4x2x15xf32, #tpu.memory_space<vmem>>, vector<1x2x15xf32>
    %448 = vector.shape_cast %447 : vector<1x2x15xf32> to vector<2x15xf32>
    %449 = vector.shape_cast %422 : vector<2x15xf32> to vector<1x2x15xf32>
    tpu.vector_store %arg17[%c0_126, %c0_127, %c0_128], %449 {strides = array<i32>} : memref<4x2x15xf32, #tpu.memory_space<vmem>>, vector<1x2x15xf32>,
    %c0_129 = arith.constant 0 : index
    %c0_130 = arith.constant 0 : index
    %c0_131 = arith.constant 0 : index
    %450 = vector.load %arg18[%c0_129, %c0_130, %c0_131] : memref<4x2x15xf32, #tpu.memory_space<vmem>>, vector<1x2x15xf32>
    %451 = vector.shape_cast %450 : vector<1x2x15xf32> to vector<2x15xf32>
    %452 = vector.shape_cast %420 : vector<2x15xf32> to vector<1x2x15xf32>
    tpu.vector_store %arg18[%c0_129, %c0_130, %c0_131], %452 {strides = array<i32>} : memref<4x2x15xf32, #tpu.memory_space<vmem>>, vector<1x2x15xf32>,
    %c1 = arith.constant 1 : index
    %c0_132 = arith.constant 0 : index
    %c0_133 = arith.constant 0 : index
    %453 = vector.load %arg17[%c1, %c0_132, %c0_133] : memref<4x2x15xf32, #tpu.memory_space<vmem>>, vector<1x2x15xf32>
    %454 = vector.shape_cast %453 : vector<1x2x15xf32> to vector<2x15xf32>
    %455 = vector.shape_cast %438 : vector<2x15xf32> to vector<1x2x15xf32>
    tpu.vector_store %arg17[%c1, %c0_132, %c0_133], %455 {strides = array<i32>} : memref<4x2x15xf32, #tpu.memory_space<vmem>>, vector<1x2x15xf32>,
    %c1_134 = arith.constant 1 : index
    %c0_135 = arith.constant 0 : index
    %c0_136 = arith.constant 0 : index
    %456 = vector.load %arg18[%c1_134, %c0_135, %c0_136] : memref<4x2x15xf32, #tpu.memory_space<vmem>>, vector<1x2x15xf32>
    %457 = vector.shape_cast %456 : vector<1x2x15xf32> to vector<2x15xf32>
    %458 = vector.shape_cast %436 : vector<2x15xf32> to vector<1x2x15xf32>
    tpu.vector_store %arg18[%c1_134, %c0_135, %c0_136], %458 {strides = array<i32>} : memref<4x2x15xf32, #tpu.memory_space<vmem>>, vector<1x2x15xf32>,
    %c0_137 = arith.constant 0 : index
    %c0_138 = arith.constant 0 : index
    %459 = vector.load %arg21[%c0_137, %c0_138] : memref<16x15xf32, #tpu.memory_space<vmem>>, vector<16x15xf32>
    %c0_139 = arith.constant 0 : index
    %c0_140 = arith.constant 0 : index
    %460 = vector.load %arg22[%c0_139, %c0_140] : memref<16x15xf32, #tpu.memory_space<vmem>>, vector<16x15xf32>
    %c0_141 = arith.constant 0 : index
    %c0_142 = arith.constant 0 : index
    %461 = vector.load %arg8[%c0_141, %c0_142] : memref<15x60xf32, #tpu.memory_space<vmem>>, vector<15x60xf32>
    %cst_143 = arith.constant dense<0.000000e+00> : vector<16x60xf32>
    %462 = tpu.matmul %459, %461, %cst_143 {dimension_numbers = #tpu.dot_dimension_numbers<[1], [0], [0], [1], [0, 0, 1, 1], [], []>} : vector<16x15xf32>, vector<15x60xf32>, vector<16x60xf32> -> vector<16x60xf32>
    %c0_144 = arith.constant 0 : index
    %c0_145 = arith.constant 0 : index
    %463 = vector.load %arg9[%c0_144, %c0_145] : memref<15x60xf32, #tpu.memory_space<vmem>>, vector<15x60xf32>
    %cst_146 = arith.constant dense<0.000000e+00> : vector<16x60xf32>
    %464 = tpu.matmul %460, %463, %cst_146 {dimension_numbers = #tpu.dot_dimension_numbers<[1], [0], [0], [1], [0, 0, 1, 1], [], []>} : vector<16x15xf32>, vector<15x60xf32>, vector<16x60xf32> -> vector<16x60xf32>
    %465 = arith.addf %462, %464 : vector<16x60xf32>
    %c0_147 = arith.constant 0 : index
    %c0_148 = arith.constant 0 : index
    %466 = vector.load %arg11[%c0_147, %c0_148] : memref<1x60xf32, #tpu.memory_space<vmem>>, vector<1x60xf32>
    %467 = vector.broadcast %466 : vector<1x60xf32> to vector<16x60xf32>
    %468 = arith.addf %465, %467 : vector<16x60xf32>
    %c0_149 = arith.constant 0 : index
    %c0_150 = arith.constant 0 : index
    %469 = vector.load %arg19[%c0_149, %c0_150] : memref<16x60xf32, #tpu.memory_space<vmem>>, vector<16x60xf32>
    tpu.vector_store %arg19[%c0_149, %c0_150], %468 {strides = array<i32>} : memref<16x60xf32, #tpu.memory_space<vmem>>, vector<16x60xf32>,
    %c0_151 = arith.constant 0 : index
    %c0_152 = arith.constant 0 : index
    %470 = vector.load %arg12[%c0_151, %c0_152] : memref<15x60xf32, #tpu.memory_space<vmem>>, vector<15x60xf32>
    %cst_153 = arith.constant dense<0.000000e+00> : vector<16x60xf32>
    %471 = tpu.matmul %459, %470, %cst_153 {dimension_numbers = #tpu.dot_dimension_numbers<[1], [0], [0], [1], [0, 0, 1, 1], [], []>} : vector<16x15xf32>, vector<15x60xf32>, vector<16x60xf32> -> vector<16x60xf32>
    %c0_154 = arith.constant 0 : index
    %c0_155 = arith.constant 0 : index
    %472 = vector.load %arg13[%c0_154, %c0_155] : memref<15x60xf32, #tpu.memory_space<vmem>>, vector<15x60xf32>
    %cst_156 = arith.constant dense<0.000000e+00> : vector<16x60xf32>
    %473 = tpu.matmul %460, %472, %cst_156 {dimension_numbers = #tpu.dot_dimension_numbers<[1], [0], [0], [1], [0, 0, 1, 1], [], []>} : vector<16x15xf32>, vector<15x60xf32>, vector<16x60xf32> -> vector<16x60xf32>
    %474 = arith.addf %471, %473 : vector<16x60xf32>
    %c0_157 = arith.constant 0 : index
    %c0_158 = arith.constant 0 : index
    %475 = vector.load %arg15[%c0_157, %c0_158] : memref<1x60xf32, #tpu.memory_space<vmem>>, vector<1x60xf32>
    %476 = vector.broadcast %475 : vector<1x60xf32> to vector<16x60xf32>
    %477 = arith.addf %474, %476 : vector<16x60xf32>
    %c0_159 = arith.constant 0 : index
    %c0_160 = arith.constant 0 : index
    %478 = vector.load %arg20[%c0_159, %c0_160] : memref<16x60xf32, #tpu.memory_space<vmem>>, vector<16x60xf32>
    tpu.vector_store %arg20[%c0_159, %c0_160], %477 {strides = array<i32>} : memref<16x60xf32, #tpu.memory_space<vmem>>, vector<16x60xf32>,
    %c0_161 = arith.constant 0 : index
    %c0_162 = arith.constant 0 : index
    %479 = vector.load %arg10[%c0_161, %c0_162] : memref<15x60xf32, #tpu.memory_space<vmem>>, vector<15x60xf32>
    %c0_163 = arith.constant 0 : index
    %c0_164 = arith.constant 0 : index
    %480 = vector.load %arg14[%c0_163, %c0_164] : memref<15x60xf32, #tpu.memory_space<vmem>>, vector<15x60xf32>
    %cst_165 = arith.constant 0.000000e+00 : f32
    %481 = vector.broadcast %cst_165 : f32 to vector<2x15xf32>
    %c0_i32_166 = arith.constant 0 : i32
    %c7_i32_167 = arith.constant 7 : i32
    %482 = arith.subi %c7_i32_167, %c0_i32_166 : i32
    %c2_i32_168 = arith.constant 2 : i32
    %483 = arith.muli %c0_i32_166, %c2_i32_168 : i32
    %484 = tpu.assume_multiple %483, 2 : i32
    %c2_i32_169 = arith.constant 2 : i32
    %485 = arith.muli %482, %c2_i32_169 : i32
    %486 = tpu.assume_multiple %485, 2 : i32
    %487 = arith.index_cast %484 : i32 to index
    %c0_170 = arith.constant 0 : index
    %488 = vector.load %arg19[%487, %c0_170] : memref<16x60xf32, #tpu.memory_space<vmem>>, vector<2x60xf32>
    %cst_171 = arith.constant dense<0.000000e+00> : vector<2x60xf32>
    %489 = tpu.matmul %481, %479, %cst_171 {dimension_numbers = #tpu.dot_dimension_numbers<[1], [0], [0], [1], [0, 0, 1, 1], [], []>} : vector<2x15xf32>, vector<15x60xf32>, vector<2x60xf32> -> vector<2x60xf32>
    %490 = arith.addf %488, %489 : vector<2x60xf32>
    %491 = arith.index_cast %486 : i32 to index
    %c0_172 = arith.constant 0 : index
    %492 = vector.load %arg20[%491, %c0_172] : memref<16x60xf32, #tpu.memory_space<vmem>>, vector<2x60xf32>
    %cst_173 = arith.constant dense<0.000000e+00> : vector<2x60xf32>
    %493 = tpu.matmul %481, %480, %cst_173 {dimension_numbers = #tpu.dot_dimension_numbers<[1], [0], [0], [1], [0, 0, 1, 1], [], []>} : vector<2x15xf32>, vector<15x60xf32>, vector<2x60xf32> -> vector<2x60xf32>
    %494 = arith.addf %492, %493 : vector<2x60xf32>
    %495 = vector.extract_strided_slice %490 {offsets = [0, 0], sizes = [2, 45], strides = [1, 1]} : vector<2x60xf32> to vector<2x45xf32>
    %496 = arith.negf %495 : vector<2x45xf32>
    %497 = math.exp %496 : vector<2x45xf32>
    %cst_174 = arith.constant 1.000000e+00 : f32
    %498 = vector.broadcast %cst_174 : f32 to vector<2x45xf32>
    %499 = arith.addf %498, %497 : vector<2x45xf32>
    %500 = arith.divf %498, %499 : vector<2x45xf32>
    %501 = vector.extract_strided_slice %490 {offsets = [0, 45], sizes = [2, 15], strides = [1, 1]} : vector<2x60xf32> to vector<2x15xf32>
    %502 = math.tanh %501 : vector<2x15xf32>
    %503 = vector.extract_strided_slice %500 {offsets = [0, 0], sizes = [2, 15], strides = [1, 1]} : vector<2x45xf32> to vector<2x15xf32>
    %504 = vector.extract_strided_slice %500 {offsets = [0, 15], sizes = [2, 15], strides = [1, 1]} : vector<2x45xf32> to vector<2x15xf32>
    %505 = vector.extract_strided_slice %500 {offsets = [0, 30], sizes = [2, 15], strides = [1, 1]} : vector<2x45xf32> to vector<2x15xf32>
    %506 = arith.mulf %504, %481 : vector<2x15xf32>
    %507 = arith.mulf %503, %502 : vector<2x15xf32>
    %508 = arith.addf %506, %507 : vector<2x15xf32>
    %509 = math.tanh %508 : vector<2x15xf32>
    %510 = arith.mulf %505, %509 : vector<2x15xf32>
    %511 = vector.extract_strided_slice %494 {offsets = [0, 0], sizes = [2, 45], strides = [1, 1]} : vector<2x60xf32> to vector<2x45xf32>
    %512 = arith.negf %511 : vector<2x45xf32>
    %513 = math.exp %512 : vector<2x45xf32>
    %cst_175 = arith.constant 1.000000e+00 : f32
    %514 = vector.broadcast %cst_175 : f32 to vector<2x45xf32>
    %515 = arith.addf %514, %513 : vector<2x45xf32>
    %516 = arith.divf %514, %515 : vector<2x45xf32>
    %517 = vector.extract_strided_slice %494 {offsets = [0, 45], sizes = [2, 15], strides = [1, 1]} : vector<2x60xf32> to vector<2x15xf32>
    %518 = math.tanh %517 : vector<2x15xf32>
    %519 = vector.extract_strided_slice %516 {offsets = [0, 0], sizes = [2, 15], strides = [1, 1]} : vector<2x45xf32> to vector<2x15xf32>
    %520 = vector.extract_strided_slice %516 {offsets = [0, 15], sizes = [2, 15], strides = [1, 1]} : vector<2x45xf32> to vector<2x15xf32>
    %521 = vector.extract_strided_slice %516 {offsets = [0, 30], sizes = [2, 15], strides = [1, 1]} : vector<2x45xf32> to vector<2x15xf32>
    %522 = arith.mulf %520, %481 : vector<2x15xf32>
    %523 = arith.mulf %519, %518 : vector<2x15xf32>
    %524 = arith.addf %522, %523 : vector<2x15xf32>
    %525 = math.tanh %524 : vector<2x15xf32>
    %526 = arith.mulf %521, %525 : vector<2x15xf32>
    %527 = vector.shape_cast %510 : vector<2x15xf32> to vector<2x1x15xf32>
    %c0_176 = arith.constant 0 : index
    %528 = arith.index_cast %c0_i32_166 : i32 to index
    %c0_177 = arith.constant 0 : index
    %529 = vector.load %arg16[%c0_176, %528, %c0_177] : memref<2x8x30xf32, #tpu.memory_space<vmem>>, vector<2x1x15xf32>
    tpu.vector_store %arg16[%c0_176, %528, %c0_177], %527 {strides = array<i32>} : memref<2x8x30xf32, #tpu.memory_space<vmem>>, vector<2x1x15xf32>,
    %530 = vector.shape_cast %526 : vector<2x15xf32> to vector<2x1x15xf32>
    %c0_178 = arith.constant 0 : index
    %531 = arith.index_cast %482 : i32 to index
    %c15 = arith.constant 15 : index
    %532 = vector.load %arg16[%c0_178, %531, %c15] : memref<2x8x30xf32, #tpu.memory_space<vmem>>, vector<2x1x15xf32>
    tpu.vector_store %arg16[%c0_178, %531, %c15], %530 {strides = array<i32>} : memref<2x8x30xf32, #tpu.memory_space<vmem>>, vector<2x1x15xf32>,
    %c1_i32_179 = arith.constant 1 : i32
    %c7_i32_180 = arith.constant 7 : i32
    %533 = arith.subi %c7_i32_180, %c1_i32_179 : i32
    %c2_i32_181 = arith.constant 2 : i32
    %534 = arith.muli %c1_i32_179, %c2_i32_181 : i32
    %535 = tpu.assume_multiple %534, 2 : i32
    %c2_i32_182 = arith.constant 2 : i32
    %536 = arith.muli %533, %c2_i32_182 : i32
    %537 = tpu.assume_multiple %536, 2 : i32
    %538 = arith.index_cast %535 : i32 to index
    %c0_183 = arith.constant 0 : index
    %539 = vector.load %arg19[%538, %c0_183] : memref<16x60xf32, #tpu.memory_space<vmem>>, vector<2x60xf32>
    %cst_184 = arith.constant dense<0.000000e+00> : vector<2x60xf32>
    %540 = tpu.matmul %510, %479, %cst_184 {dimension_numbers = #tpu.dot_dimension_numbers<[1], [0], [0], [1], [0, 0, 1, 1], [], []>} : vector<2x15xf32>, vector<15x60xf32>, vector<2x60xf32> -> vector<2x60xf32>
    %541 = arith.addf %539, %540 : vector<2x60xf32>
    %542 = arith.index_cast %537 : i32 to index
    %c0_185 = arith.constant 0 : index
    %543 = vector.load %arg20[%542, %c0_185] : memref<16x60xf32, #tpu.memory_space<vmem>>, vector<2x60xf32>
    %cst_186 = arith.constant dense<0.000000e+00> : vector<2x60xf32>
    %544 = tpu.matmul %526, %480, %cst_186 {dimension_numbers = #tpu.dot_dimension_numbers<[1], [0], [0], [1], [0, 0, 1, 1], [], []>} : vector<2x15xf32>, vector<15x60xf32>, vector<2x60xf32> -> vector<2x60xf32>
    %545 = arith.addf %543, %544 : vector<2x60xf32>
    %546 = vector.extract_strided_slice %541 {offsets = [0, 0], sizes = [2, 45], strides = [1, 1]} : vector<2x60xf32> to vector<2x45xf32>
    %547 = arith.negf %546 : vector<2x45xf32>
    %548 = math.exp %547 : vector<2x45xf32>
    %cst_187 = arith.constant 1.000000e+00 : f32
    %549 = vector.broadcast %cst_187 : f32 to vector<2x45xf32>
    %550 = arith.addf %549, %548 : vector<2x45xf32>
    %551 = arith.divf %549, %550 : vector<2x45xf32>
    %552 = vector.extract_strided_slice %541 {offsets = [0, 45], sizes = [2, 15], strides = [1, 1]} : vector<2x60xf32> to vector<2x15xf32>
    %553 = math.tanh %552 : vector<2x15xf32>
    %554 = vector.extract_strided_slice %551 {offsets = [0, 0], sizes = [2, 15], strides = [1, 1]} : vector<2x45xf32> to vector<2x15xf32>
    %555 = vector.extract_strided_slice %551 {offsets = [0, 15], sizes = [2, 15], strides = [1, 1]} : vector<2x45xf32> to vector<2x15xf32>
    %556 = vector.extract_strided_slice %551 {offsets = [0, 30], sizes = [2, 15], strides = [1, 1]} : vector<2x45xf32> to vector<2x15xf32>
    %557 = arith.mulf %555, %508 : vector<2x15xf32>
    %558 = arith.mulf %554, %553 : vector<2x15xf32>
    %559 = arith.addf %557, %558 : vector<2x15xf32>
    %560 = math.tanh %559 : vector<2x15xf32>
    %561 = arith.mulf %556, %560 : vector<2x15xf32>
    %562 = vector.extract_strided_slice %545 {offsets = [0, 0], sizes = [2, 45], strides = [1, 1]} : vector<2x60xf32> to vector<2x45xf32>
    %563 = arith.negf %562 : vector<2x45xf32>
    %564 = math.exp %563 : vector<2x45xf32>
    %cst_188 = arith.constant 1.000000e+00 : f32
    %565 = vector.broadcast %cst_188 : f32 to vector<2x45xf32>
    %566 = arith.addf %565, %564 : vector<2x45xf32>
    %567 = arith.divf %565, %566 : vector<2x45xf32>
    %568 = vector.extract_strided_slice %545 {offsets = [0, 45], sizes = [2, 15], strides = [1, 1]} : vector<2x60xf32> to vector<2x15xf32>
    %569 = math.tanh %568 : vector<2x15xf32>
    %570 = vector.extract_strided_slice %567 {offsets = [0, 0], sizes = [2, 15], strides = [1, 1]} : vector<2x45xf32> to vector<2x15xf32>
    %571 = vector.extract_strided_slice %567 {offsets = [0, 15], sizes = [2, 15], strides = [1, 1]} : vector<2x45xf32> to vector<2x15xf32>
    %572 = vector.extract_strided_slice %567 {offsets = [0, 30], sizes = [2, 15], strides = [1, 1]} : vector<2x45xf32> to vector<2x15xf32>
    %573 = arith.mulf %571, %524 : vector<2x15xf32>
    %574 = arith.mulf %570, %569 : vector<2x15xf32>
    %575 = arith.addf %573, %574 : vector<2x15xf32>
    %576 = math.tanh %575 : vector<2x15xf32>
    %577 = arith.mulf %572, %576 : vector<2x15xf32>
    %578 = vector.shape_cast %561 : vector<2x15xf32> to vector<2x1x15xf32>
    %c0_189 = arith.constant 0 : index
    %579 = arith.index_cast %c1_i32_179 : i32 to index
    %c0_190 = arith.constant 0 : index
    %580 = vector.load %arg16[%c0_189, %579, %c0_190] : memref<2x8x30xf32, #tpu.memory_space<vmem>>, vector<2x1x15xf32>
    tpu.vector_store %arg16[%c0_189, %579, %c0_190], %578 {strides = array<i32>} : memref<2x8x30xf32, #tpu.memory_space<vmem>>, vector<2x1x15xf32>,
    %581 = vector.shape_cast %577 : vector<2x15xf32> to vector<2x1x15xf32>
    %c0_191 = arith.constant 0 : index
    %582 = arith.index_cast %533 : i32 to index
    %c15_192 = arith.constant 15 : index
    %583 = vector.load %arg16[%c0_191, %582, %c15_192] : memref<2x8x30xf32, #tpu.memory_space<vmem>>, vector<2x1x15xf32>
    tpu.vector_store %arg16[%c0_191, %582, %c15_192], %581 {strides = array<i32>} : memref<2x8x30xf32, #tpu.memory_space<vmem>>, vector<2x1x15xf32>,
    %c2_i32_193 = arith.constant 2 : i32
    %c7_i32_194 = arith.constant 7 : i32
    %584 = arith.subi %c7_i32_194, %c2_i32_193 : i32
    %c2_i32_195 = arith.constant 2 : i32
    %585 = arith.muli %c2_i32_193, %c2_i32_195 : i32
    %586 = tpu.assume_multiple %585, 2 : i32
    %c2_i32_196 = arith.constant 2 : i32
    %587 = arith.muli %584, %c2_i32_196 : i32
    %588 = tpu.assume_multiple %587, 2 : i32
    %589 = arith.index_cast %586 : i32 to index
    %c0_197 = arith.constant 0 : index
    %590 = vector.load %arg19[%589, %c0_197] : memref<16x60xf32, #tpu.memory_space<vmem>>, vector<2x60xf32>
    %cst_198 = arith.constant dense<0.000000e+00> : vector<2x60xf32>
    %591 = tpu.matmul %561, %479, %cst_198 {dimension_numbers = #tpu.dot_dimension_numbers<[1], [0], [0], [1], [0, 0, 1, 1], [], []>} : vector<2x15xf32>, vector<15x60xf32>, vector<2x60xf32> -> vector<2x60xf32>
    %592 = arith.addf %590, %591 : vector<2x60xf32>
    %593 = arith.index_cast %588 : i32 to index
    %c0_199 = arith.constant 0 : index
    %594 = vector.load %arg20[%593, %c0_199] : memref<16x60xf32, #tpu.memory_space<vmem>>, vector<2x60xf32>
    %cst_200 = arith.constant dense<0.000000e+00> : vector<2x60xf32>
    %595 = tpu.matmul %577, %480, %cst_200 {dimension_numbers = #tpu.dot_dimension_numbers<[1], [0], [0], [1], [0, 0, 1, 1], [], []>} : vector<2x15xf32>, vector<15x60xf32>, vector<2x60xf32> -> vector<2x60xf32>
    %596 = arith.addf %594, %595 : vector<2x60xf32>
    %597 = vector.extract_strided_slice %592 {offsets = [0, 0], sizes = [2, 45], strides = [1, 1]} : vector<2x60xf32> to vector<2x45xf32>
    %598 = arith.negf %597 : vector<2x45xf32>
    %599 = math.exp %598 : vector<2x45xf32>
    %cst_201 = arith.constant 1.000000e+00 : f32
    %600 = vector.broadcast %cst_201 : f32 to vector<2x45xf32>
    %601 = arith.addf %600, %599 : vector<2x45xf32>
    %602 = arith.divf %600, %601 : vector<2x45xf32>
    %603 = vector.extract_strided_slice %592 {offsets = [0, 45], sizes = [2, 15], strides = [1, 1]} : vector<2x60xf32> to vector<2x15xf32>
    %604 = math.tanh %603 : vector<2x15xf32>
    %605 = vector.extract_strided_slice %602 {offsets = [0, 0], sizes = [2, 15], strides = [1, 1]} : vector<2x45xf32> to vector<2x15xf32>
    %606 = vector.extract_strided_slice %602 {offsets = [0, 15], sizes = [2, 15], strides = [1, 1]} : vector<2x45xf32> to vector<2x15xf32>
    %607 = vector.extract_strided_slice %602 {offsets = [0, 30], sizes = [2, 15], strides = [1, 1]} : vector<2x45xf32> to vector<2x15xf32>
    %608 = arith.mulf %606, %559 : vector<2x15xf32>
    %609 = arith.mulf %605, %604 : vector<2x15xf32>
    %610 = arith.addf %608, %609 : vector<2x15xf32>
    %611 = math.tanh %610 : vector<2x15xf32>
    %612 = arith.mulf %607, %611 : vector<2x15xf32>
    %613 = vector.extract_strided_slice %596 {offsets = [0, 0], sizes = [2, 45], strides = [1, 1]} : vector<2x60xf32> to vector<2x45xf32>
    %614 = arith.negf %613 : vector<2x45xf32>
    %615 = math.exp %614 : vector<2x45xf32>
    %cst_202 = arith.constant 1.000000e+00 : f32
    %616 = vector.broadcast %cst_202 : f32 to vector<2x45xf32>
    %617 = arith.addf %616, %615 : vector<2x45xf32>
    %618 = arith.divf %616, %617 : vector<2x45xf32>
    %619 = vector.extract_strided_slice %596 {offsets = [0, 45], sizes = [2, 15], strides = [1, 1]} : vector<2x60xf32> to vector<2x15xf32>
    %620 = math.tanh %619 : vector<2x15xf32>
    %621 = vector.extract_strided_slice %618 {offsets = [0, 0], sizes = [2, 15], strides = [1, 1]} : vector<2x45xf32> to vector<2x15xf32>
    %622 = vector.extract_strided_slice %618 {offsets = [0, 15], sizes = [2, 15], strides = [1, 1]} : vector<2x45xf32> to vector<2x15xf32>
    %623 = vector.extract_strided_slice %618 {offsets = [0, 30], sizes = [2, 15], strides = [1, 1]} : vector<2x45xf32> to vector<2x15xf32>
    %624 = arith.mulf %622, %575 : vector<2x15xf32>
    %625 = arith.mulf %621, %620 : vector<2x15xf32>
    %626 = arith.addf %624, %625 : vector<2x15xf32>
    %627 = math.tanh %626 : vector<2x15xf32>
    %628 = arith.mulf %623, %627 : vector<2x15xf32>
    %629 = vector.shape_cast %612 : vector<2x15xf32> to vector<2x1x15xf32>
    %c0_203 = arith.constant 0 : index
    %630 = arith.index_cast %c2_i32_193 : i32 to index
    %c0_204 = arith.constant 0 : index
    %631 = vector.load %arg16[%c0_203, %630, %c0_204] : memref<2x8x30xf32, #tpu.memory_space<vmem>>, vector<2x1x15xf32>
    tpu.vector_store %arg16[%c0_203, %630, %c0_204], %629 {strides = array<i32>} : memref<2x8x30xf32, #tpu.memory_space<vmem>>, vector<2x1x15xf32>,
    %632 = vector.shape_cast %628 : vector<2x15xf32> to vector<2x1x15xf32>
    %c0_205 = arith.constant 0 : index
    %633 = arith.index_cast %584 : i32 to index
    %c15_206 = arith.constant 15 : index
    %634 = vector.load %arg16[%c0_205, %633, %c15_206] : memref<2x8x30xf32, #tpu.memory_space<vmem>>, vector<2x1x15xf32>
    tpu.vector_store %arg16[%c0_205, %633, %c15_206], %632 {strides = array<i32>} : memref<2x8x30xf32, #tpu.memory_space<vmem>>, vector<2x1x15xf32>,
    %c3_i32_207 = arith.constant 3 : i32
    %c7_i32_208 = arith.constant 7 : i32
    %635 = arith.subi %c7_i32_208, %c3_i32_207 : i32
    %c2_i32_209 = arith.constant 2 : i32
    %636 = arith.muli %c3_i32_207, %c2_i32_209 : i32
    %637 = tpu.assume_multiple %636, 2 : i32
    %c2_i32_210 = arith.constant 2 : i32
    %638 = arith.muli %635, %c2_i32_210 : i32
    %639 = tpu.assume_multiple %638, 2 : i32
    %640 = arith.index_cast %637 : i32 to index
    %c0_211 = arith.constant 0 : index
    %641 = vector.load %arg19[%640, %c0_211] : memref<16x60xf32, #tpu.memory_space<vmem>>, vector<2x60xf32>
    %cst_212 = arith.constant dense<0.000000e+00> : vector<2x60xf32>
    %642 = tpu.matmul %612, %479, %cst_212 {dimension_numbers = #tpu.dot_dimension_numbers<[1], [0], [0], [1], [0, 0, 1, 1], [], []>} : vector<2x15xf32>, vector<15x60xf32>, vector<2x60xf32> -> vector<2x60xf32>
    %643 = arith.addf %641, %642 : vector<2x60xf32>
    %644 = arith.index_cast %639 : i32 to index
    %c0_213 = arith.constant 0 : index
    %645 = vector.load %arg20[%644, %c0_213] : memref<16x60xf32, #tpu.memory_space<vmem>>, vector<2x60xf32>
    %cst_214 = arith.constant dense<0.000000e+00> : vector<2x60xf32>
    %646 = tpu.matmul %628, %480, %cst_214 {dimension_numbers = #tpu.dot_dimension_numbers<[1], [0], [0], [1], [0, 0, 1, 1], [], []>} : vector<2x15xf32>, vector<15x60xf32>, vector<2x60xf32> -> vector<2x60xf32>
    %647 = arith.addf %645, %646 : vector<2x60xf32>
    %648 = vector.extract_strided_slice %643 {offsets = [0, 0], sizes = [2, 45], strides = [1, 1]} : vector<2x60xf32> to vector<2x45xf32>
    %649 = arith.negf %648 : vector<2x45xf32>
    %650 = math.exp %649 : vector<2x45xf32>
    %cst_215 = arith.constant 1.000000e+00 : f32
    %651 = vector.broadcast %cst_215 : f32 to vector<2x45xf32>
    %652 = arith.addf %651, %650 : vector<2x45xf32>
    %653 = arith.divf %651, %652 : vector<2x45xf32>
    %654 = vector.extract_strided_slice %643 {offsets = [0, 45], sizes = [2, 15], strides = [1, 1]} : vector<2x60xf32> to vector<2x15xf32>
    %655 = math.tanh %654 : vector<2x15xf32>
    %656 = vector.extract_strided_slice %653 {offsets = [0, 0], sizes = [2, 15], strides = [1, 1]} : vector<2x45xf32> to vector<2x15xf32>
    %657 = vector.extract_strided_slice %653 {offsets = [0, 15], sizes = [2, 15], strides = [1, 1]} : vector<2x45xf32> to vector<2x15xf32>
    %658 = vector.extract_strided_slice %653 {offsets = [0, 30], sizes = [2, 15], strides = [1, 1]} : vector<2x45xf32> to vector<2x15xf32>
    %659 = arith.mulf %657, %610 : vector<2x15xf32>
    %660 = arith.mulf %656, %655 : vector<2x15xf32>
    %661 = arith.addf %659, %660 : vector<2x15xf32>
    %662 = math.tanh %661 : vector<2x15xf32>
    %663 = arith.mulf %658, %662 : vector<2x15xf32>
    %664 = vector.extract_strided_slice %647 {offsets = [0, 0], sizes = [2, 45], strides = [1, 1]} : vector<2x60xf32> to vector<2x45xf32>
    %665 = arith.negf %664 : vector<2x45xf32>
    %666 = math.exp %665 : vector<2x45xf32>
    %cst_216 = arith.constant 1.000000e+00 : f32
    %667 = vector.broadcast %cst_216 : f32 to vector<2x45xf32>
    %668 = arith.addf %667, %666 : vector<2x45xf32>
    %669 = arith.divf %667, %668 : vector<2x45xf32>
    %670 = vector.extract_strided_slice %647 {offsets = [0, 45], sizes = [2, 15], strides = [1, 1]} : vector<2x60xf32> to vector<2x15xf32>
    %671 = math.tanh %670 : vector<2x15xf32>
    %672 = vector.extract_strided_slice %669 {offsets = [0, 0], sizes = [2, 15], strides = [1, 1]} : vector<2x45xf32> to vector<2x15xf32>
    %673 = vector.extract_strided_slice %669 {offsets = [0, 15], sizes = [2, 15], strides = [1, 1]} : vector<2x45xf32> to vector<2x15xf32>
    %674 = vector.extract_strided_slice %669 {offsets = [0, 30], sizes = [2, 15], strides = [1, 1]} : vector<2x45xf32> to vector<2x15xf32>
    %675 = arith.mulf %673, %626 : vector<2x15xf32>
    %676 = arith.mulf %672, %671 : vector<2x15xf32>
    %677 = arith.addf %675, %676 : vector<2x15xf32>
    %678 = math.tanh %677 : vector<2x15xf32>
    %679 = arith.mulf %674, %678 : vector<2x15xf32>
    %680 = vector.shape_cast %663 : vector<2x15xf32> to vector<2x1x15xf32>
    %c0_217 = arith.constant 0 : index
    %681 = arith.index_cast %c3_i32_207 : i32 to index
    %c0_218 = arith.constant 0 : index
    %682 = vector.load %arg16[%c0_217, %681, %c0_218] : memref<2x8x30xf32, #tpu.memory_space<vmem>>, vector<2x1x15xf32>
    tpu.vector_store %arg16[%c0_217, %681, %c0_218], %680 {strides = array<i32>} : memref<2x8x30xf32, #tpu.memory_space<vmem>>, vector<2x1x15xf32>,
    %683 = vector.shape_cast %679 : vector<2x15xf32> to vector<2x1x15xf32>
    %c0_219 = arith.constant 0 : index
    %684 = arith.index_cast %635 : i32 to index
    %c15_220 = arith.constant 15 : index
    %685 = vector.load %arg16[%c0_219, %684, %c15_220] : memref<2x8x30xf32, #tpu.memory_space<vmem>>, vector<2x1x15xf32>
    tpu.vector_store %arg16[%c0_219, %684, %c15_220], %683 {strides = array<i32>} : memref<2x8x30xf32, #tpu.memory_space<vmem>>, vector<2x1x15xf32>,
    %c4_i32_221 = arith.constant 4 : i32
    %c7_i32_222 = arith.constant 7 : i32
    %686 = arith.subi %c7_i32_222, %c4_i32_221 : i32
    %c2_i32_223 = arith.constant 2 : i32
    %687 = arith.muli %c4_i32_221, %c2_i32_223 : i32
    %688 = tpu.assume_multiple %687, 2 : i32
    %c2_i32_224 = arith.constant 2 : i32
    %689 = arith.muli %686, %c2_i32_224 : i32
    %690 = tpu.assume_multiple %689, 2 : i32
    %691 = arith.index_cast %688 : i32 to index
    %c0_225 = arith.constant 0 : index
    %692 = vector.load %arg19[%691, %c0_225] : memref<16x60xf32, #tpu.memory_space<vmem>>, vector<2x60xf32>
    %cst_226 = arith.constant dense<0.000000e+00> : vector<2x60xf32>
    %693 = tpu.matmul %663, %479, %cst_226 {dimension_numbers = #tpu.dot_dimension_numbers<[1], [0], [0], [1], [0, 0, 1, 1], [], []>} : vector<2x15xf32>, vector<15x60xf32>, vector<2x60xf32> -> vector<2x60xf32>
    %694 = arith.addf %692, %693 : vector<2x60xf32>
    %695 = arith.index_cast %690 : i32 to index
    %c0_227 = arith.constant 0 : index
    %696 = vector.load %arg20[%695, %c0_227] : memref<16x60xf32, #tpu.memory_space<vmem>>, vector<2x60xf32>
    %cst_228 = arith.constant dense<0.000000e+00> : vector<2x60xf32>
    %697 = tpu.matmul %679, %480, %cst_228 {dimension_numbers = #tpu.dot_dimension_numbers<[1], [0], [0], [1], [0, 0, 1, 1], [], []>} : vector<2x15xf32>, vector<15x60xf32>, vector<2x60xf32> -> vector<2x60xf32>
    %698 = arith.addf %696, %697 : vector<2x60xf32>
    %699 = vector.extract_strided_slice %694 {offsets = [0, 0], sizes = [2, 45], strides = [1, 1]} : vector<2x60xf32> to vector<2x45xf32>
    %700 = arith.negf %699 : vector<2x45xf32>
    %701 = math.exp %700 : vector<2x45xf32>
    %cst_229 = arith.constant 1.000000e+00 : f32
    %702 = vector.broadcast %cst_229 : f32 to vector<2x45xf32>
    %703 = arith.addf %702, %701 : vector<2x45xf32>
    %704 = arith.divf %702, %703 : vector<2x45xf32>
    %705 = vector.extract_strided_slice %694 {offsets = [0, 45], sizes = [2, 15], strides = [1, 1]} : vector<2x60xf32> to vector<2x15xf32>
    %706 = math.tanh %705 : vector<2x15xf32>
    %707 = vector.extract_strided_slice %704 {offsets = [0, 0], sizes = [2, 15], strides = [1, 1]} : vector<2x45xf32> to vector<2x15xf32>
    %708 = vector.extract_strided_slice %704 {offsets = [0, 15], sizes = [2, 15], strides = [1, 1]} : vector<2x45xf32> to vector<2x15xf32>
    %709 = vector.extract_strided_slice %704 {offsets = [0, 30], sizes = [2, 15], strides = [1, 1]} : vector<2x45xf32> to vector<2x15xf32>
    %710 = arith.mulf %708, %661 : vector<2x15xf32>
    %711 = arith.mulf %707, %706 : vector<2x15xf32>
    %712 = arith.addf %710, %711 : vector<2x15xf32>
    %713 = math.tanh %712 : vector<2x15xf32>
    %714 = arith.mulf %709, %713 : vector<2x15xf32>
    %715 = vector.extract_strided_slice %698 {offsets = [0, 0], sizes = [2, 45], strides = [1, 1]} : vector<2x60xf32> to vector<2x45xf32>
    %716 = arith.negf %715 : vector<2x45xf32>
    %717 = math.exp %716 : vector<2x45xf32>
    %cst_230 = arith.constant 1.000000e+00 : f32
    %718 = vector.broadcast %cst_230 : f32 to vector<2x45xf32>
    %719 = arith.addf %718, %717 : vector<2x45xf32>
    %720 = arith.divf %718, %719 : vector<2x45xf32>
    %721 = vector.extract_strided_slice %698 {offsets = [0, 45], sizes = [2, 15], strides = [1, 1]} : vector<2x60xf32> to vector<2x15xf32>
    %722 = math.tanh %721 : vector<2x15xf32>
    %723 = vector.extract_strided_slice %720 {offsets = [0, 0], sizes = [2, 15], strides = [1, 1]} : vector<2x45xf32> to vector<2x15xf32>
    %724 = vector.extract_strided_slice %720 {offsets = [0, 15], sizes = [2, 15], strides = [1, 1]} : vector<2x45xf32> to vector<2x15xf32>
    %725 = vector.extract_strided_slice %720 {offsets = [0, 30], sizes = [2, 15], strides = [1, 1]} : vector<2x45xf32> to vector<2x15xf32>
    %726 = arith.mulf %724, %677 : vector<2x15xf32>
    %727 = arith.mulf %723, %722 : vector<2x15xf32>
    %728 = arith.addf %726, %727 : vector<2x15xf32>
    %729 = math.tanh %728 : vector<2x15xf32>
    %730 = arith.mulf %725, %729 : vector<2x15xf32>
    %731 = vector.shape_cast %714 : vector<2x15xf32> to vector<2x1x15xf32>
    %c0_231 = arith.constant 0 : index
    %732 = arith.index_cast %c4_i32_221 : i32 to index
    %c0_232 = arith.constant 0 : index
    %733 = vector.load %arg16[%c0_231, %732, %c0_232] : memref<2x8x30xf32, #tpu.memory_space<vmem>>, vector<2x1x15xf32>
    tpu.vector_store %arg16[%c0_231, %732, %c0_232], %731 {strides = array<i32>} : memref<2x8x30xf32, #tpu.memory_space<vmem>>, vector<2x1x15xf32>,
    %734 = vector.shape_cast %730 : vector<2x15xf32> to vector<2x1x15xf32>
    %c0_233 = arith.constant 0 : index
    %735 = arith.index_cast %686 : i32 to index
    %c15_234 = arith.constant 15 : index
    %736 = vector.load %arg16[%c0_233, %735, %c15_234] : memref<2x8x30xf32, #tpu.memory_space<vmem>>, vector<2x1x15xf32>
    tpu.vector_store %arg16[%c0_233, %735, %c15_234], %734 {strides = array<i32>} : memref<2x8x30xf32, #tpu.memory_space<vmem>>, vector<2x1x15xf32>,
    %c5_i32_235 = arith.constant 5 : i32
    %c7_i32_236 = arith.constant 7 : i32
    %737 = arith.subi %c7_i32_236, %c5_i32_235 : i32
    %c2_i32_237 = arith.constant 2 : i32
    %738 = arith.muli %c5_i32_235, %c2_i32_237 : i32
    %739 = tpu.assume_multiple %738, 2 : i32
    %c2_i32_238 = arith.constant 2 : i32
    %740 = arith.muli %737, %c2_i32_238 : i32
    %741 = tpu.assume_multiple %740, 2 : i32
    %742 = arith.index_cast %739 : i32 to index
    %c0_239 = arith.constant 0 : index
    %743 = vector.load %arg19[%742, %c0_239] : memref<16x60xf32, #tpu.memory_space<vmem>>, vector<2x60xf32>
    %cst_240 = arith.constant dense<0.000000e+00> : vector<2x60xf32>
    %744 = tpu.matmul %714, %479, %cst_240 {dimension_numbers = #tpu.dot_dimension_numbers<[1], [0], [0], [1], [0, 0, 1, 1], [], []>} : vector<2x15xf32>, vector<15x60xf32>, vector<2x60xf32> -> vector<2x60xf32>
    %745 = arith.addf %743, %744 : vector<2x60xf32>
    %746 = arith.index_cast %741 : i32 to index
    %c0_241 = arith.constant 0 : index
    %747 = vector.load %arg20[%746, %c0_241] : memref<16x60xf32, #tpu.memory_space<vmem>>, vector<2x60xf32>
    %cst_242 = arith.constant dense<0.000000e+00> : vector<2x60xf32>
    %748 = tpu.matmul %730, %480, %cst_242 {dimension_numbers = #tpu.dot_dimension_numbers<[1], [0], [0], [1], [0, 0, 1, 1], [], []>} : vector<2x15xf32>, vector<15x60xf32>, vector<2x60xf32> -> vector<2x60xf32>
    %749 = arith.addf %747, %748 : vector<2x60xf32>
    %750 = vector.extract_strided_slice %745 {offsets = [0, 0], sizes = [2, 45], strides = [1, 1]} : vector<2x60xf32> to vector<2x45xf32>
    %751 = arith.negf %750 : vector<2x45xf32>
    %752 = math.exp %751 : vector<2x45xf32>
    %cst_243 = arith.constant 1.000000e+00 : f32
    %753 = vector.broadcast %cst_243 : f32 to vector<2x45xf32>
    %754 = arith.addf %753, %752 : vector<2x45xf32>
    %755 = arith.divf %753, %754 : vector<2x45xf32>
    %756 = vector.extract_strided_slice %745 {offsets = [0, 45], sizes = [2, 15], strides = [1, 1]} : vector<2x60xf32> to vector<2x15xf32>
    %757 = math.tanh %756 : vector<2x15xf32>
    %758 = vector.extract_strided_slice %755 {offsets = [0, 0], sizes = [2, 15], strides = [1, 1]} : vector<2x45xf32> to vector<2x15xf32>
    %759 = vector.extract_strided_slice %755 {offsets = [0, 15], sizes = [2, 15], strides = [1, 1]} : vector<2x45xf32> to vector<2x15xf32>
    %760 = vector.extract_strided_slice %755 {offsets = [0, 30], sizes = [2, 15], strides = [1, 1]} : vector<2x45xf32> to vector<2x15xf32>
    %761 = arith.mulf %759, %712 : vector<2x15xf32>
    %762 = arith.mulf %758, %757 : vector<2x15xf32>
    %763 = arith.addf %761, %762 : vector<2x15xf32>
    %764 = math.tanh %763 : vector<2x15xf32>
    %765 = arith.mulf %760, %764 : vector<2x15xf32>
    %766 = vector.extract_strided_slice %749 {offsets = [0, 0], sizes = [2, 45], strides = [1, 1]} : vector<2x60xf32> to vector<2x45xf32>
    %767 = arith.negf %766 : vector<2x45xf32>
    %768 = math.exp %767 : vector<2x45xf32>
    %cst_244 = arith.constant 1.000000e+00 : f32
    %769 = vector.broadcast %cst_244 : f32 to vector<2x45xf32>
    %770 = arith.addf %769, %768 : vector<2x45xf32>
    %771 = arith.divf %769, %770 : vector<2x45xf32>
    %772 = vector.extract_strided_slice %749 {offsets = [0, 45], sizes = [2, 15], strides = [1, 1]} : vector<2x60xf32> to vector<2x15xf32>
    %773 = math.tanh %772 : vector<2x15xf32>
    %774 = vector.extract_strided_slice %771 {offsets = [0, 0], sizes = [2, 15], strides = [1, 1]} : vector<2x45xf32> to vector<2x15xf32>
    %775 = vector.extract_strided_slice %771 {offsets = [0, 15], sizes = [2, 15], strides = [1, 1]} : vector<2x45xf32> to vector<2x15xf32>
    %776 = vector.extract_strided_slice %771 {offsets = [0, 30], sizes = [2, 15], strides = [1, 1]} : vector<2x45xf32> to vector<2x15xf32>
    %777 = arith.mulf %775, %728 : vector<2x15xf32>
    %778 = arith.mulf %774, %773 : vector<2x15xf32>
    %779 = arith.addf %777, %778 : vector<2x15xf32>
    %780 = math.tanh %779 : vector<2x15xf32>
    %781 = arith.mulf %776, %780 : vector<2x15xf32>
    %782 = vector.shape_cast %765 : vector<2x15xf32> to vector<2x1x15xf32>
    %c0_245 = arith.constant 0 : index
    %783 = arith.index_cast %c5_i32_235 : i32 to index
    %c0_246 = arith.constant 0 : index
    %784 = vector.load %arg16[%c0_245, %783, %c0_246] : memref<2x8x30xf32, #tpu.memory_space<vmem>>, vector<2x1x15xf32>
    tpu.vector_store %arg16[%c0_245, %783, %c0_246], %782 {strides = array<i32>} : memref<2x8x30xf32, #tpu.memory_space<vmem>>, vector<2x1x15xf32>,
    %785 = vector.shape_cast %781 : vector<2x15xf32> to vector<2x1x15xf32>
    %c0_247 = arith.constant 0 : index
    %786 = arith.index_cast %737 : i32 to index
    %c15_248 = arith.constant 15 : index
    %787 = vector.load %arg16[%c0_247, %786, %c15_248] : memref<2x8x30xf32, #tpu.memory_space<vmem>>, vector<2x1x15xf32>
    tpu.vector_store %arg16[%c0_247, %786, %c15_248], %785 {strides = array<i32>} : memref<2x8x30xf32, #tpu.memory_space<vmem>>, vector<2x1x15xf32>,
    %c6_i32_249 = arith.constant 6 : i32
    %c7_i32_250 = arith.constant 7 : i32
    %788 = arith.subi %c7_i32_250, %c6_i32_249 : i32
    %c2_i32_251 = arith.constant 2 : i32
    %789 = arith.muli %c6_i32_249, %c2_i32_251 : i32
    %790 = tpu.assume_multiple %789, 2 : i32
    %c2_i32_252 = arith.constant 2 : i32
    %791 = arith.muli %788, %c2_i32_252 : i32
    %792 = tpu.assume_multiple %791, 2 : i32
    %793 = arith.index_cast %790 : i32 to index
    %c0_253 = arith.constant 0 : index
    %794 = vector.load %arg19[%793, %c0_253] : memref<16x60xf32, #tpu.memory_space<vmem>>, vector<2x60xf32>
    %cst_254 = arith.constant dense<0.000000e+00> : vector<2x60xf32>
    %795 = tpu.matmul %765, %479, %cst_254 {dimension_numbers = #tpu.dot_dimension_numbers<[1], [0], [0], [1], [0, 0, 1, 1], [], []>} : vector<2x15xf32>, vector<15x60xf32>, vector<2x60xf32> -> vector<2x60xf32>
    %796 = arith.addf %794, %795 : vector<2x60xf32>
    %797 = arith.index_cast %792 : i32 to index
    %c0_255 = arith.constant 0 : index
    %798 = vector.load %arg20[%797, %c0_255] : memref<16x60xf32, #tpu.memory_space<vmem>>, vector<2x60xf32>
    %cst_256 = arith.constant dense<0.000000e+00> : vector<2x60xf32>
    %799 = tpu.matmul %781, %480, %cst_256 {dimension_numbers = #tpu.dot_dimension_numbers<[1], [0], [0], [1], [0, 0, 1, 1], [], []>} : vector<2x15xf32>, vector<15x60xf32>, vector<2x60xf32> -> vector<2x60xf32>
    %800 = arith.addf %798, %799 : vector<2x60xf32>
    %801 = vector.extract_strided_slice %796 {offsets = [0, 0], sizes = [2, 45], strides = [1, 1]} : vector<2x60xf32> to vector<2x45xf32>
    %802 = arith.negf %801 : vector<2x45xf32>
    %803 = math.exp %802 : vector<2x45xf32>
    %cst_257 = arith.constant 1.000000e+00 : f32
    %804 = vector.broadcast %cst_257 : f32 to vector<2x45xf32>
    %805 = arith.addf %804, %803 : vector<2x45xf32>
    %806 = arith.divf %804, %805 : vector<2x45xf32>
    %807 = vector.extract_strided_slice %796 {offsets = [0, 45], sizes = [2, 15], strides = [1, 1]} : vector<2x60xf32> to vector<2x15xf32>
    %808 = math.tanh %807 : vector<2x15xf32>
    %809 = vector.extract_strided_slice %806 {offsets = [0, 0], sizes = [2, 15], strides = [1, 1]} : vector<2x45xf32> to vector<2x15xf32>
    %810 = vector.extract_strided_slice %806 {offsets = [0, 15], sizes = [2, 15], strides = [1, 1]} : vector<2x45xf32> to vector<2x15xf32>
    %811 = vector.extract_strided_slice %806 {offsets = [0, 30], sizes = [2, 15], strides = [1, 1]} : vector<2x45xf32> to vector<2x15xf32>
    %812 = arith.mulf %810, %763 : vector<2x15xf32>
    %813 = arith.mulf %809, %808 : vector<2x15xf32>
    %814 = arith.addf %812, %813 : vector<2x15xf32>
    %815 = math.tanh %814 : vector<2x15xf32>
    %816 = arith.mulf %811, %815 : vector<2x15xf32>
    %817 = vector.extract_strided_slice %800 {offsets = [0, 0], sizes = [2, 45], strides = [1, 1]} : vector<2x60xf32> to vector<2x45xf32>
    %818 = arith.negf %817 : vector<2x45xf32>
    %819 = math.exp %818 : vector<2x45xf32>
    %cst_258 = arith.constant 1.000000e+00 : f32
    %820 = vector.broadcast %cst_258 : f32 to vector<2x45xf32>
    %821 = arith.addf %820, %819 : vector<2x45xf32>
    %822 = arith.divf %820, %821 : vector<2x45xf32>
    %823 = vector.extract_strided_slice %800 {offsets = [0, 45], sizes = [2, 15], strides = [1, 1]} : vector<2x60xf32> to vector<2x15xf32>
    %824 = math.tanh %823 : vector<2x15xf32>
    %825 = vector.extract_strided_slice %822 {offsets = [0, 0], sizes = [2, 15], strides = [1, 1]} : vector<2x45xf32> to vector<2x15xf32>
    %826 = vector.extract_strided_slice %822 {offsets = [0, 15], sizes = [2, 15], strides = [1, 1]} : vector<2x45xf32> to vector<2x15xf32>
    %827 = vector.extract_strided_slice %822 {offsets = [0, 30], sizes = [2, 15], strides = [1, 1]} : vector<2x45xf32> to vector<2x15xf32>
    %828 = arith.mulf %826, %779 : vector<2x15xf32>
    %829 = arith.mulf %825, %824 : vector<2x15xf32>
    %830 = arith.addf %828, %829 : vector<2x15xf32>
    %831 = math.tanh %830 : vector<2x15xf32>
    %832 = arith.mulf %827, %831 : vector<2x15xf32>
    %833 = vector.shape_cast %816 : vector<2x15xf32> to vector<2x1x15xf32>
    %c0_259 = arith.constant 0 : index
    %834 = arith.index_cast %c6_i32_249 : i32 to index
    %c0_260 = arith.constant 0 : index
    %835 = vector.load %arg16[%c0_259, %834, %c0_260] : memref<2x8x30xf32, #tpu.memory_space<vmem>>, vector<2x1x15xf32>
    tpu.vector_store %arg16[%c0_259, %834, %c0_260], %833 {strides = array<i32>} : memref<2x8x30xf32, #tpu.memory_space<vmem>>, vector<2x1x15xf32>,
    %836 = vector.shape_cast %832 : vector<2x15xf32> to vector<2x1x15xf32>
    %c0_261 = arith.constant 0 : index
    %837 = arith.index_cast %788 : i32 to index
    %c15_262 = arith.constant 15 : index
    %838 = vector.load %arg16[%c0_261, %837, %c15_262] : memref<2x8x30xf32, #tpu.memory_space<vmem>>, vector<2x1x15xf32>
    tpu.vector_store %arg16[%c0_261, %837, %c15_262], %836 {strides = array<i32>} : memref<2x8x30xf32, #tpu.memory_space<vmem>>, vector<2x1x15xf32>,
    %c7_i32_263 = arith.constant 7 : i32
    %c7_i32_264 = arith.constant 7 : i32
    %839 = arith.subi %c7_i32_264, %c7_i32_263 : i32
    %c2_i32_265 = arith.constant 2 : i32
    %840 = arith.muli %c7_i32_263, %c2_i32_265 : i32
    %841 = tpu.assume_multiple %840, 2 : i32
    %c2_i32_266 = arith.constant 2 : i32
    %842 = arith.muli %839, %c2_i32_266 : i32
    %843 = tpu.assume_multiple %842, 2 : i32
    %844 = arith.index_cast %841 : i32 to index
    %c0_267 = arith.constant 0 : index
    %845 = vector.load %arg19[%844, %c0_267] : memref<16x60xf32, #tpu.memory_space<vmem>>, vector<2x60xf32>
    %cst_268 = arith.constant dense<0.000000e+00> : vector<2x60xf32>
    %846 = tpu.matmul %816, %479, %cst_268 {dimension_numbers = #tpu.dot_dimension_numbers<[1], [0], [0], [1], [0, 0, 1, 1], [], []>} : vector<2x15xf32>, vector<15x60xf32>, vector<2x60xf32> -> vector<2x60xf32>
    %847 = arith.addf %845, %846 : vector<2x60xf32>
    %848 = arith.index_cast %843 : i32 to index
    %c0_269 = arith.constant 0 : index
    %849 = vector.load %arg20[%848, %c0_269] : memref<16x60xf32, #tpu.memory_space<vmem>>, vector<2x60xf32>
    %cst_270 = arith.constant dense<0.000000e+00> : vector<2x60xf32>
    %850 = tpu.matmul %832, %480, %cst_270 {dimension_numbers = #tpu.dot_dimension_numbers<[1], [0], [0], [1], [0, 0, 1, 1], [], []>} : vector<2x15xf32>, vector<15x60xf32>, vector<2x60xf32> -> vector<2x60xf32>
    %851 = arith.addf %849, %850 : vector<2x60xf32>
    %852 = vector.extract_strided_slice %847 {offsets = [0, 0], sizes = [2, 45], strides = [1, 1]} : vector<2x60xf32> to vector<2x45xf32>
    %853 = arith.negf %852 : vector<2x45xf32>
    %854 = math.exp %853 : vector<2x45xf32>
    %cst_271 = arith.constant 1.000000e+00 : f32
    %855 = vector.broadcast %cst_271 : f32 to vector<2x45xf32>
    %856 = arith.addf %855, %854 : vector<2x45xf32>
    %857 = arith.divf %855, %856 : vector<2x45xf32>
    %858 = vector.extract_strided_slice %847 {offsets = [0, 45], sizes = [2, 15], strides = [1, 1]} : vector<2x60xf32> to vector<2x15xf32>
    %859 = math.tanh %858 : vector<2x15xf32>
    %860 = vector.extract_strided_slice %857 {offsets = [0, 0], sizes = [2, 15], strides = [1, 1]} : vector<2x45xf32> to vector<2x15xf32>
    %861 = vector.extract_strided_slice %857 {offsets = [0, 15], sizes = [2, 15], strides = [1, 1]} : vector<2x45xf32> to vector<2x15xf32>
    %862 = vector.extract_strided_slice %857 {offsets = [0, 30], sizes = [2, 15], strides = [1, 1]} : vector<2x45xf32> to vector<2x15xf32>
    %863 = arith.mulf %861, %814 : vector<2x15xf32>
    %864 = arith.mulf %860, %859 : vector<2x15xf32>
    %865 = arith.addf %863, %864 : vector<2x15xf32>
    %866 = math.tanh %865 : vector<2x15xf32>
    %867 = arith.mulf %862, %866 : vector<2x15xf32>
    %868 = vector.extract_strided_slice %851 {offsets = [0, 0], sizes = [2, 45], strides = [1, 1]} : vector<2x60xf32> to vector<2x45xf32>
    %869 = arith.negf %868 : vector<2x45xf32>
    %870 = math.exp %869 : vector<2x45xf32>
    %cst_272 = arith.constant 1.000000e+00 : f32
    %871 = vector.broadcast %cst_272 : f32 to vector<2x45xf32>
    %872 = arith.addf %871, %870 : vector<2x45xf32>
    %873 = arith.divf %871, %872 : vector<2x45xf32>
    %874 = vector.extract_strided_slice %851 {offsets = [0, 45], sizes = [2, 15], strides = [1, 1]} : vector<2x60xf32> to vector<2x15xf32>
    %875 = math.tanh %874 : vector<2x15xf32>
    %876 = vector.extract_strided_slice %873 {offsets = [0, 0], sizes = [2, 15], strides = [1, 1]} : vector<2x45xf32> to vector<2x15xf32>
    %877 = vector.extract_strided_slice %873 {offsets = [0, 15], sizes = [2, 15], strides = [1, 1]} : vector<2x45xf32> to vector<2x15xf32>
    %878 = vector.extract_strided_slice %873 {offsets = [0, 30], sizes = [2, 15], strides = [1, 1]} : vector<2x45xf32> to vector<2x15xf32>
    %879 = arith.mulf %877, %830 : vector<2x15xf32>
    %880 = arith.mulf %876, %875 : vector<2x15xf32>
    %881 = arith.addf %879, %880 : vector<2x15xf32>
    %882 = math.tanh %881 : vector<2x15xf32>
    %883 = arith.mulf %878, %882 : vector<2x15xf32>
    %884 = vector.shape_cast %867 : vector<2x15xf32> to vector<2x1x15xf32>
    %c0_273 = arith.constant 0 : index
    %885 = arith.index_cast %c7_i32_263 : i32 to index
    %c0_274 = arith.constant 0 : index
    %886 = vector.load %arg16[%c0_273, %885, %c0_274] : memref<2x8x30xf32, #tpu.memory_space<vmem>>, vector<2x1x15xf32>
    tpu.vector_store %arg16[%c0_273, %885, %c0_274], %884 {strides = array<i32>} : memref<2x8x30xf32, #tpu.memory_space<vmem>>, vector<2x1x15xf32>,
    %887 = vector.shape_cast %883 : vector<2x15xf32> to vector<2x1x15xf32>
    %c0_275 = arith.constant 0 : index
    %888 = arith.index_cast %839 : i32 to index
    %c15_276 = arith.constant 15 : index
    %889 = vector.load %arg16[%c0_275, %888, %c15_276] : memref<2x8x30xf32, #tpu.memory_space<vmem>>, vector<2x1x15xf32>
    tpu.vector_store %arg16[%c0_275, %888, %c15_276], %887 {strides = array<i32>} : memref<2x8x30xf32, #tpu.memory_space<vmem>>, vector<2x1x15xf32>,
    %c8_i32_277 = arith.constant 8 : i32
    %c2 = arith.constant 2 : index
    %c0_278 = arith.constant 0 : index
    %c0_279 = arith.constant 0 : index
    %890 = vector.load %arg17[%c2, %c0_278, %c0_279] : memref<4x2x15xf32, #tpu.memory_space<vmem>>, vector<1x2x15xf32>
    %891 = vector.shape_cast %890 : vector<1x2x15xf32> to vector<2x15xf32>
    %892 = vector.shape_cast %867 : vector<2x15xf32> to vector<1x2x15xf32>
    tpu.vector_store %arg17[%c2, %c0_278, %c0_279], %892 {strides = array<i32>} : memref<4x2x15xf32, #tpu.memory_space<vmem>>, vector<1x2x15xf32>,
    %c2_280 = arith.constant 2 : index
    %c0_281 = arith.constant 0 : index
    %c0_282 = arith.constant 0 : index
    %893 = vector.load %arg18[%c2_280, %c0_281, %c0_282] : memref<4x2x15xf32, #tpu.memory_space<vmem>>, vector<1x2x15xf32>
    %894 = vector.shape_cast %893 : vector<1x2x15xf32> to vector<2x15xf32>
    %895 = vector.shape_cast %865 : vector<2x15xf32> to vector<1x2x15xf32>
    tpu.vector_store %arg18[%c2_280, %c0_281, %c0_282], %895 {strides = array<i32>} : memref<4x2x15xf32, #tpu.memory_space<vmem>>, vector<1x2x15xf32>,
    %c3 = arith.constant 3 : index
    %c0_283 = arith.constant 0 : index
    %c0_284 = arith.constant 0 : index
    %896 = vector.load %arg17[%c3, %c0_283, %c0_284] : memref<4x2x15xf32, #tpu.memory_space<vmem>>, vector<1x2x15xf32>
    %897 = vector.shape_cast %896 : vector<1x2x15xf32> to vector<2x15xf32>
    %898 = vector.shape_cast %883 : vector<2x15xf32> to vector<1x2x15xf32>
    tpu.vector_store %arg17[%c3, %c0_283, %c0_284], %898 {strides = array<i32>} : memref<4x2x15xf32, #tpu.memory_space<vmem>>, vector<1x2x15xf32>,
    %c3_285 = arith.constant 3 : index
    %c0_286 = arith.constant 0 : index
    %c0_287 = arith.constant 0 : index
    %899 = vector.load %arg18[%c3_285, %c0_286, %c0_287] : memref<4x2x15xf32, #tpu.memory_space<vmem>>, vector<1x2x15xf32>
    %900 = vector.shape_cast %899 : vector<1x2x15xf32> to vector<2x15xf32>
    %901 = vector.shape_cast %881 : vector<2x15xf32> to vector<1x2x15xf32>
    tpu.vector_store %arg18[%c3_285, %c0_286, %c0_287], %901 {strides = array<i32>} : memref<4x2x15xf32, #tpu.memory_space<vmem>>, vector<1x2x15xf32>,
    return
  }
}

</mosaic_0001>

<bundles_post_ra>
// kernel: encoder_forward.1
= control target key start
LH: loop header
LB: loop body
LE: loop exit
PB: predicated region body
PF: predicated region fallthrough
CT: control target
= control target key end

     0   :  { %s6751_s0 = inlined_call_operand.vmem [shape: s32[16,1], index: 0, kind: input, shape index: {}]   ;;  %s6752_s1 = inlined_call_operand.vmem [shape: f32[11,5], index: 1, kind: input, shape index: {}]   ;;  %s6753_s2 = inlined_call_operand.hbm [shape: f32[5,60], index: 2, kind: input, shape index: {}]   ;;  %s6754_s3 = inlined_call_operand.vmem [shape: f32[15,60], index: 3, kind: input, shape index: {}]   ;;  %s6755_s4 = inlined_call_operand.vmem [shape: f32[1,60], index: 4, kind: input, shape index: {}]   ;;  %s6756_s5 = inlined_call_operand.hbm [shape: f32[5,60], index: 5, kind: input, shape index: {}]   ;;  %s6757_s6 = inlined_call_operand.vmem [shape: f32[15,60], index: 6, kind: input, shape index: {}]   ;;  %s6758_s7 = inlined_call_operand.hbm [shape: f32[1,60], index: 7, kind: input, shape index: {}]   ;;  %s6759_s8 = inlined_call_operand.vmem [shape: f32[15,60], index: 8, kind: input, shape index: {}]   ;;  %s6760_s9 = inlined_call_operand.vmem [shape: f32[15,60], index: 9, kind: input, shape index: {}]   ;;  %s6761_s10 = inlined_call_operand.hbm [shape: f32[15,60], index: 10, kind: input, shape index: {}]   ;;  %s6762_s11 = inlined_call_operand.hbm [shape: f32[1,60], index: 11, kind: input, shape index: {}]   ;;  %s6763_s12 = inlined_call_operand.hbm [shape: f32[15,60], index: 12, kind: input, shape index: {}]   ;;  %s6764_s13 = inlined_call_operand.vmem [shape: f32[15,60], index: 13, kind: input, shape index: {}]   ;;  %s6765_s14 = inlined_call_operand.hbm [shape: f32[15,60], index: 14, kind: input, shape index: {}]   ;;  %s6766_s15 = inlined_call_operand.vmem [shape: f32[1,60], index: 15, kind: input, shape index: {}]   ;;  %s6767_s16 = inlined_call_operand.hbm [shape: f32[2,8,30], index: 16, kind: output, shape index: {0}]   ;;  %s6768_s17 = inlined_call_operand.hbm [shape: f32[4,2,15], index: 17, kind: output, shape index: {1}]   ;;  %s6769_s18 = inlined_call_operand.hbm [shape: f32[4,2,15], index: 18, kind: output, shape index: {2}]  }
   0x1   :  { %6772 = sst [smem:[#allocation28_spill]] %s6751_s0 }
   0x2   :  { %6773 = sst [smem:[#allocation29_spill]] %s6752_s1 }
   0x3   :  { %6774 = sst [smem:[#allocation30_spill]] %s6753_s2 }
   0x4   :  { %24 = vsyncpa [#allocation7], 0 }
   0x5   :  { %25 = vsyncpa [#allocation10], 0 }
   0x6   :  { %26 = vsyncpa [#allocation13], 0 }
   0x7   :  { %27 = vsyncpa [#allocation16], 0 }
   0x8   :  { %28 = vsyncpa [#allocation8], 0 }
   0x9   :  { %29 = vsyncpa [#allocation20], 0  ;;  %s5796_s27 = smov [#allocation9]   ;;  %s5797_s29 = smov [#allocation12]  }
   0xa   :  { %s54_s28 = sshll.u32 %s5796_s27, 4  ;;  %s79_s30 = sshll.u32 %s5797_s29, 4  ;;  %s55_s28 = int_to_ptr.vmem [resolvable:$true] %s54_s28  ;;  %s80_s30 = int_to_ptr.vmem [resolvable:$true] %s79_s30 }
   0xb   :  { %s5592_s0 = scalar_lea.vmem %s55_s28, 128  ;;  %p5597_p1 = scmp.lt.s32.totalorder %s55_s28, %s55_s28 }
   0xc   :  { %p5593_p0 = scmp.ne.s32.totalorder %s55_s28, %s5592_s0  ;;  %p5598_p2 = scmp.lt.s32.totalorder %s5592_s0, %s5592_s0 }
   0xe   :  { %p5599_p3 = por %p5598_p2, %p5597_p1 }
  0x10   :  { %p5600_p4 = pnand %p5599_p3, %p5593_p0 }
  0x12   :  { %5603 = shalt.err (!%p5600_p4)
}
  0x13   :  { %57 = dma.hbm_to_vmem [thread:$0]  %s6756_s5, 128, %s55_s28, [#allocation10]  }
  0x14   :  { %s5612_s20 = scalar_lea.vmem %s80_s30, 256  ;;  %p5617_p6 = scmp.lt.s32.totalorder %s80_s30, %s80_s30 }
  0x15   :  { %p5613_p5 = scmp.ne.s32.totalorder %s80_s30, %s5612_s20  ;;  %p5618_p7 = scmp.lt.s32.totalorder %s5612_s20, %s5612_s20 }
  0x17   :  { %p5619_p8 = por %p5618_p7, %p5617_p6 }
  0x19   :  { %p5620_p9 = pnand %p5619_p8, %p5613_p5 }
  0x1b   :  { %5623 = shalt.err (!%p5620_p9)
}
  0x1c   :  { %s5798_s21 = smov 128   ;;  %s5799_s22 = smov 8  }
  0x1d   :  { %85 = dma.hbm_to_vmem [thread:$0]  %s6761_s10, 256, %s80_s30, [#allocation13], %s5798_s21, %s5798_s21, %s5799_s22  }
  0x1e   :  { %s5800_s24 = smov [#allocation15]   ;;  %s5801_s26 = smov [#allocation6]  }
  0x1f   :  { %s101_s25 = sshll.u32 %s5800_s24, 4  ;;  %s40_s5 = sshll.u32 %s5801_s26, 4  ;;  %s102_s25 = int_to_ptr.vmem [resolvable:$true] %s101_s25  ;;  %s41_s5 = int_to_ptr.vmem [resolvable:$true] %s40_s5 }
  0x20   :  { %s5632_s27 = scalar_lea.vmem %s102_s25, 256  ;;  %p5637_p11 = scmp.lt.s32.totalorder %s102_s25, %s102_s25 }
  0x21   :  { %p5633_p10 = scmp.ne.s32.totalorder %s102_s25, %s5632_s27  ;;  %p5638_p12 = scmp.lt.s32.totalorder %s5632_s27, %s5632_s27 }
  0x23   :  { %p5639_p13 = por %p5638_p12, %p5637_p11 }
  0x25   :  { %p5640_p0 = pnand %p5639_p13, %p5633_p10 }
  0x27   :  { %5643 = shalt.err (!%p5640_p0)
}
  0x28   :  { %107 = dma.hbm_to_vmem [thread:$0]  %s6763_s12, 256, %s102_s25, [#allocation16], %s5798_s21, %s5798_s21, %s5799_s22  }
  0x29   :  { %s5652_s10 = scalar_lea.vmem %s41_s5, 128  ;;  %p5657_p2 = scmp.lt.s32.totalorder %s41_s5, %s41_s5 }
  0x2a   :  { %p5653_p1 = scmp.ne.s32.totalorder %s41_s5, %s5652_s10  ;;  %p5658_p3 = scmp.lt.s32.totalorder %s5652_s10, %s5652_s10 }
  0x2c   :  { %p5659_p4 = por %p5658_p3, %p5657_p2 }
  0x2e   :  { %p5660_p5 = pnand %p5659_p4, %p5653_p1 }
  0x30   :  { %5663 = shalt.err (!%p5660_p5)
}
  0x31   :  { %s6775_s19 = sld [smem:[#allocation30_spill]]  ;;  %s5802_s1 = smov [#allocation11]  }
  0x32   :  { %s66_s20 = sshll.u32 %s5802_s1, 4  ;;  %s5803_s2 = smov [#allocation14]   ;;  %s67_s20 = int_to_ptr.vmem [resolvable:$true] %s66_s20 }
  0x33   :  { %s92_s23 = sshll.u32 %s5803_s2, 4  ;;  %s5672_s24 = scalar_lea.vmem %s67_s20, 16  ;;  %s93_s23 = int_to_ptr.vmem [resolvable:$true] %s92_s23 }
  0x34   :  { %p5673_p6 = scmp.ne.s32.totalorder %s67_s20, %s5672_s24  ;;  %s5676_s12 = scalar_lea.vmem %s67_s20, 32 }
  0x35   :  { %p5677_p7 = scmp.lt.s32.totalorder %s67_s20, %s67_s20  ;;  %p5678_p8 = scmp.lt.s32.totalorder %s5676_s12, %s5672_s24 }
  0x37   :  { %43 = dma.hbm_to_vmem [thread:$0]  %s6775_s19, 128, %s41_s5, [#allocation7]  }
  0x38   :  { %p5679_p9 = por %p5678_p8, %p5677_p7 }
  0x3a   :  { %p5680_p10 = pnand %p5679_p9, %p5673_p6 }
  0x3c   :  { %5683 = shalt.err (!%p5680_p10)
}
  0x3d   :  { %69 = dma.hbm_to_vmem [thread:$0]  %s6758_s7, 16, %s67_s20, [#allocation10]  }
  0x3e   :  { %s5692_s27 = scalar_lea.vmem %s93_s23, 16  ;;  %s5696_s5 = scalar_lea.vmem %s93_s23, 32 }
  0x3f   :  { %p5693_p11 = scmp.ne.s32.totalorder %s93_s23, %s5692_s27  ;;  %p5697_p12 = scmp.lt.s32.totalorder %s93_s23, %s93_s23 }
  0x40   :  { %p5698_p13 = scmp.lt.s32.totalorder %s5696_s5, %s5692_s27 }
  0x42   :  { %p5699_p0 = por %p5698_p13, %p5697_p12 }
  0x44   :  { %p5700_p1 = pnand %p5699_p0, %p5693_p11 }
  0x46   :  { %5703 = shalt.err (!%p5700_p1)
}
  0x47   :  { %95 = dma.hbm_to_vmem [thread:$0]  %s6762_s11, 16, %s93_s23, [#allocation13]  }
  0x48   :  { %s5804_s10 = smov [#allocation17]  }
  0x49   :  { %s115_s30 = sshll.u32 %s5804_s10, 4  ;;  %s116_s30 = int_to_ptr.vmem [resolvable:$true] %s115_s30 }
  0x4a   :  { %s5712_s0 = scalar_lea.vmem %s116_s30, 256  ;;  %p5717_p3 = scmp.lt.s32.totalorder %s116_s30, %s116_s30 }
  0x4b   :  { %p5713_p2 = scmp.ne.s32.totalorder %s116_s30, %s5712_s0  ;;  %p5718_p4 = scmp.lt.s32.totalorder %s5712_s0, %s5712_s0 }
  0x4d   :  { %p5719_p5 = por %p5718_p4, %p5717_p3 }
  0x4f   :  { %p5720_p6 = pnand %p5719_p5, %p5713_p2 }
  0x51   :  { %5723 = shalt.err (!%p5720_p6)
}
  0x52   :  { %121 = dma.hbm_to_vmem [thread:$0]  %s6765_s14, 256, %s116_s30, [#allocation16], %s5798_s21, %s5798_s21, %s5799_s22  }
  0x53   :  { %5784 = dma.done.wait [#allocation7], 128  }
  0x54   :  { %5785 = vsyncadd [#allocation7], 4294967168 }
  0x55   :  { %5786 = dma.done.wait [#allocation10], 144  }
  0x56   :  { %5787 = vsyncadd [#allocation10], 4294967152 }
  0x57   :  { %5788 = dma.done.wait [#allocation13], 272  }
  0x58   :  { %5789 = vsyncadd [#allocation13], 4294967024 }
  0x59   :  { %5790 = dma.done.wait [#allocation16], 512  }
  0x5a   :  { %5791 = vsyncadd [#allocation16], 4294966784  ;;  %v5805_v0 = vmov 0   ;;  %vm170_vm0 = vcmask 1042432   ;;  %s6776_s20 = sld [smem:[#allocation28_spill]]  ;;  %v5806_v5 = vmov 0.0   ;;  %v145_v6 = vlaneseq }
  0x5b   :  { %5327 = vset.pattern.permute.xlu0 %v5805_v0  ;;  %s6777_s24 = sld [smem:[#allocation29_spill]]  ;;  %vm163_vm1 = vcmask 89088   ;;  %v249_v12 = vld [vmem:[#allocation6] sm:$0x1f]  ;;  %vm264_vm4 = vcmask 1044480   ;;  %vm443_vm5 = vcmask 1046528  }
  0x5c   :  { %v146_v7 = vand.u32 127, %v145_v6  ;;  %5043 = vmatprep.subr.msk.mxu1 %vm264_vm4, %v249_v12  ;;  %v346_v13 = vld [vmem:[#allocation9] sm:$0x1f]  ;;  %v5973_v15 = vld [vmem:[%s6754_s3] sm:$0xff]  ;;  %vm5807_vm6 = vmmov 0   ;;  %vm257_vm7 = vcmask 39936  }
  0x5d   :  { %5044 = vmatpush3.msk.msra.mxu1 %vm264_vm4, %v249_v12  ;;  %v5965_v14 = vld [vmem:[%s6754_s3 + $0x8] sm:$0x7f]  ;;  %v5997_v19 = vld [vmem:[%s6757_s6] sm:$0xff]  ;;  %vm343_vm8 = vcmask 490496   ;;  %v4804_v26 = vld [vmem:[#allocation11] ss:$0 sm:$0xff] }
  0x5e   :  { %5048 = vmatprep.subr.msk.mxu1 %vm264_vm4, %v346_v13  ;;  %v5992_v18 = vld [vmem:[%s6757_s6 + $0x8] sm:$0x7f]  ;;  %v4800_v22 = vld [vmem:[%s6755_s4] ss:$0 sm:$0xff]  ;;  %s5808_s4 = smov 83   ;;  %s5809_s19 = smov 15  }
  0x5f   :  { %s5810_s11 = smov 98   ;;  %vm646_vm9 = vcmask 115712   ;;  %vm439_vm10 = vcmask 121856   ;;  %vm2733_vm11 = vcmask 114688   ;;  %vm2773_vm12 = vcmask 237688   ;;  %s5813_s28 = smov [#allocation19]  }
  0x60   :  { %v147_v1 = vld [vmem:[%s6776_s20] sm:$0xff]  ;;  %v148_v4 = vld [vmem:[%s6776_s20 + $0x8] sm:$0xff]  ;;  %s4761_s29 = sshll.u32 %s5813_s28, 4  ;;  %s4762_s29 = int_to_ptr.vmem [resolvable:$true] %s4761_s29 }
  0x61   :  { %v162_v2 = vld [vmem:[%s6777_s24 + $0x8] sm:$0x7]  ;;  %150 = vperm.xlu0 %5327, %v147_v1   ;;  %v161_v3 = vld [vmem:[%s6777_s24] sm:$0xff]  ;;  %s5724_s3 = scalar_lea.vmem %s4762_s29, 128  ;;  %p5729_p8 = scmp.lt.s32.totalorder %s4762_s29, %s4762_s29 }
  0x62   :  { %5036 = vmatprep.subr.msk.mxu0 %vm170_vm0, %v162_v2  ;;  %p5725_p7 = scmp.ne.s32.totalorder %s4762_s29, %s5724_s3  ;;  %p5730_p9 = scmp.lt.s32.totalorder %s5724_s3, %s5724_s3 }
  0x63   :  { %5037 = vmatpush3.msk.msra.mxu0 %vm170_vm0, %v162_v2 }
  0x64   :  { %5038 = vmatprep.subr.mxu0 %v161_v3  ;;  %p5731_p10 = por %p5730_p9, %p5729_p8 }
  0x65   :  { %5039 = vmatpush3.msra.mxu0 %v161_v3  ;;  %153 = vperm.xlu0 %5327, %v148_v4  }
  0x66   :  { %5053 = vmatprep.subr.mxu0 %v5806_v5  ;;  %p5732_p11 = pnand %p5731_p10, %p5725_p7 }
  0xdc   :  { %v151_v8 = vpop.permute.xlu0 %150 }
  0xdd   :  { %vm155_vm2 = vcmp.eq.s32.totalorder %v146_v7, %v151_v8 }
  0xde   :  { %v4795_v9 = vsel %vm155_vm2, 1.0, %v5806_v5 }
  0xdf   :  { %5040 = vmatprep.mubr.msk.f32.mxu0 %vm163_vm1, %v4795_v9 }
  0xe0   :  { %v154_v10 = vpop.permute.xlu0 %153 }
  0xe1   :  { %vm156_vm3 = vcmp.eq.s32.totalorder %v146_v7, %v154_v10 }
  0xe2   :  { %v4796_v11 = vsel %vm156_vm3, 1.0, %v5806_v5 }
  0xe3   :  { %5041 = vmatmul.mubr.msk.f32.vlgmr.msra.gmra.mxu0 %vm163_vm1, %v4796_v11 }
  0xe4   :  { %5054 = vmatpush3.msk.msra.mxu0 %vm443_vm5, %v5965_v14  ;;  %5057 = vmatprep.mubr.msk.f32.mxu0 %vm5807_vm6, %v5806_v5 }
  0xe5   :  { %5055 = vmatprep.subr.mxu0 %v5806_v5 }
  0xe6   :  { %5056 = vmatpush3.msra.mxu0 %v5973_v15 }
  0xe7   :  { %5058 = vmatmul.mubr.f32.vlgmr.msra.gmra.mxu0 %v5806_v5  ;;  %5067 = vmatprep.subr.mxu0 %v5806_v5 }
  0xe8   :  { %5068 = vmatpush3.msk.msra.mxu0 %vm443_vm5, %v5965_v14  ;;  %5071 = vmatprep.mubr.msk.f32.mxu0 %vm5807_vm6, %v5806_v5 }
  0xe9   :  { %5069 = vmatprep.subr.mxu0 %v5806_v5 }
  0xea   :  { %5070 = vmatpush3.msra.mxu0 %v5973_v15 }
  0xeb   :  { %5081 = vmatprep.subr.mxu0 %v5806_v5 }
 0x1a3   :  { %v5042_v16 = vpop.f32.mrf.mxu0 }
 0x1a5   :  { %v240_v17 = vpop.f32.mrf.mxu0 }
 0x1a6   :  { %5045 = vmatprep.mubr.msk.f32.mxu1 %vm257_vm7, %v240_v17 }
 0x1a7   :  { %5046 = vmatmul.mubr.msk.f32.vlgmr.msra.gmra.mxu1 %vm257_vm7, %v5042_v16  ;;  %v513_v20 = vpop.f32.mrf.mxu0 }
 0x1a8   :  { %5049 = vmatpush3.msk.msra.mxu1 %vm264_vm4, %v346_v13  ;;  %5050 = vmatprep.mubr.msk.f32.mxu1 %vm257_vm7, %v240_v17 }
 0x1a9   :  { %5060 = vmatprep.subr.mxu1 %v5806_v5  ;;  %v5059_v21 = vpop.f32.mrf.mxu0 }
 0x1ab   :  { %5051 = vmatmul.mubr.msk.f32.vlgmr.msra.gmra.mxu1 %vm257_vm7, %v5042_v16 }
 0x1ac   :  { %5061 = vmatpush3.msk.msra.mxu1 %vm443_vm5, %v5992_v18  ;;  %5064 = vmatprep.mubr.msk.f32.mxu1 %vm5807_vm6, %v5806_v5 }
 0x1ad   :  { %5062 = vmatprep.subr.mxu1 %v5806_v5 }
 0x1ae   :  { %5063 = vmatpush3.msra.mxu1 %v5997_v19 }
 0x1af   :  { %5065 = vmatmul.mubr.f32.vlgmr.msra.gmra.mxu1 %v5806_v5  ;;  %5074 = vmatprep.subr.mxu1 %v5806_v5 }
 0x1b0   :  { %5075 = vmatpush3.msk.msra.mxu1 %vm443_vm5, %v5992_v18  ;;  %5078 = vmatprep.mubr.msk.f32.mxu1 %vm5807_vm6, %v5806_v5 }
 0x1b1   :  { %5076 = vmatprep.subr.mxu1 %v5806_v5 }
 0x1b2   :  { %5077 = vmatpush3.msra.mxu1 %v5997_v19 }
 0x1b3   :  { %5088 = vmatprep.subr.mxu1 %v5806_v5 }
 0x267   :  { %v5047_v23 = vpop.f32.mrf.mxu1 }
 0x268   :  { %v340_v24 = vadd.f32 %v5047_v23, %v4800_v22 }
 0x269   :  { %v334_v25 = vpop.f32.mrf.mxu1 }
 0x26a   :  { %345 = vst.msk [vmem:[#allocation2 + $0x8] sm:$0xff] %vm343_vm8, %v340_v24  ;;  %v335_v27 = vadd.f32 %v4800_v22, %v334_v25 }
 0x26b   :  { %v5052_v28 = vpop.f32.mrf.mxu1 }
 0x26c   :  { %344 = vst.msk [vmem:[#allocation2] sm:$0xff] %vm343_vm8, %v335_v27  ;;  %v429_v29 = vadd.f32 %v5052_v28, %v4804_v26 }
 0x26d   :  { %v423_v30 = vpop.f32.mrf.mxu1 }
 0x26e   :  { %433 = vst.msk [vmem:[#allocation3 + $0x8] sm:$0xff] %vm343_vm8, %v429_v29  ;;  %v424_v31 = vadd.f32 %v4804_v26, %v423_v30 }
 0x26f   :  { %v589_v32 = vpop.f32.mrf.mxu1 }
 0x270   :  { %432 = vst.msk [vmem:[#allocation3] sm:$0xff] %vm343_vm8, %v424_v31 }
 0x271   :  { %v5066_v33 = vpop.f32.mrf.mxu1 }
 0x273   :  { %v438_v35 = vld [vmem:[#allocation2] sm:$0x3]  ;;  %v655_v8 = vld [vmem:[#allocation2 + $0x2] sm:$0x3] }
 0x274   :  { %v517_v37 = vadd.f32 %v513_v20, %v438_v35 }
 0x275   :  { %v519_v34 = vld [vmem:[#allocation3 + $0xe] sm:$0x3]  ;;  %v730_v2 = vld [vmem:[#allocation3 + $0xc] sm:$0x3] }
 0x276   :  { %v593_v36 = vadd.f32 %v589_v32, %v519_v34  ;;  %v4810_v41 = vmul.f32 -1.442695, %v517_v37 }
 0x278   :  { %5328 = vtanh.f32 %v593_v36  ;;  %v4811_v40 = vmul.f32 -1.442695, %v593_v36 }
 0x279   :  { %5330 = vtanh.f32 %v517_v37 }
 0x27a   :  { %5332 = vpow2.f32 %v4811_v40 }
 0x27b   :  { %5334 = vpow2.f32 %v4810_v41 }
 0x285   :  { %v5329_v38 = vpop.eup %5328 }
 0x286   :  { %627 = vrot.lane.b32.xlu1 %v5329_v38, %s5808_s4  ;;  %v5331_v39 = vpop.eup %5330 }
 0x287   :  { %v5333_v42 = vpop.eup %5332 }
 0x288   :  { %v621_v43 = vadd.f32 1.0, %v5333_v42  ;;  %v5335_v44 = vpop.eup %5334 }
 0x289   :  { %v597_v45 = vadd.f32 1.0, %v5335_v44  ;;  %v940_v44 = vld [vmem:[#allocation3 + $0xa] sm:$0x3] }
 0x28a   :  { %603 = vrot.lane.b32.xlu1 %v5331_v39, %s5808_s4  ;;  %5336 = vrcp.f32 %v621_v43 }
 0x28b   :  { %5338 = vrcp.f32 %v597_v45 }
 0x297   :  { %v5337_v46 = vpop.eup %5336 }
 0x298   :  { %v5339_v49 = vpop.eup %5338  ;;  %v625_v52 = vmul.f32 0.0, %v5337_v46 }
 0x299   :  { %v601_v55 = vmul.f32 0.0, %v5339_v49 }
 0x2f8   :  { %v628_v47 = vpop.permute.xlu1 %627 }
 0x2f9   :  { %v630_v48 = vmul.f32 %v5337_v46, %v628_v47 }
 0x2fb   :  { %632 = vrot.lane.b32.xlu0 %v630_v48, %s5809_s19  ;;  %v865_v48 = vld [vmem:[#allocation2 + $0x4] sm:$0x3] }
 0x2fc   :  { %v604_v50 = vpop.permute.xlu1 %603 }
 0x2fd   :  { %v606_v51 = vmul.f32 %v5339_v49, %v604_v50 }
 0x2ff   :  { %608 = vrot.lane.b32.xlu1 %v606_v51, %s5809_s19 }
 0x36d   :  { %v633_v53 = vpop.permute.xlu0 %632 }
 0x36e   :  { %v6025_v54 = vadd.f32 %v633_v53, %v625_v52 }
 0x370   :  { %5340 = vtanh.f32 %v6025_v54 }
 0x371   :  { %v609_v56 = vpop.permute.xlu1 %608 }
 0x372   :  { %v6028_v57 = vadd.f32 %v609_v56, %v601_v55 }
 0x374   :  { %5342 = vtanh.f32 %v6028_v57 }
 0x37d   :  { %v5341_v58 = vpop.eup %5340 }
 0x37e   :  { %638 = vrot.lane.b32.xlu0 %v5341_v58, %s5809_s19 }
 0x381   :  { %v5343_v59 = vpop.eup %5342 }
 0x382   :  { %614 = vrot.lane.b32.xlu1 %v5343_v59, %s5809_s19 }
 0x3f0   :  { %v639_v60 = vpop.permute.xlu0 %638 }
 0x3f1   :  { %v641_v61 = vmul.f32 %v5337_v46, %v639_v60 }
 0x3f3   :  { %649 = vrot.lane.b32.xlu0 %v641_v61, %s5810_s11 }
 0x3f4   :  { %v615_v62 = vpop.permute.xlu1 %614 }
 0x3f5   :  { %v617_v63 = vmul.f32 %v5339_v49, %v615_v62 }
 0x3f7   :  { %643 = vrot.lane.b32.xlu1 %v617_v63, %s5810_s11 }
 0x465   :  { %v650_v0 = vpop.permute.xlu0 %649 }
 0x466   :  { %653 = vst.msk [vmem:[#allocation5 + $0xe] sm:$0x3] %vm646_vm9, %v650_v0  ;;  %5079 = vmatmul.mubr.msk.f32.vlgmr.msra.gmra.mxu1 %vm439_vm10, %v650_v0 }
 0x467   :  { %5089 = vmatpush3.msk.msra.mxu1 %vm443_vm5, %v5992_v18  ;;  %5092 = vmatprep.mubr.msk.f32.mxu1 %vm5807_vm6, %v5806_v5 }
 0x468   :  { %5090 = vmatprep.subr.mxu1 %v5806_v5 }
 0x469   :  { %v644_v1 = vpop.permute.xlu1 %643  ;;  %5091 = vmatpush3.msra.mxu1 %v5997_v19 }
 0x46a   :  { %647 = vst.msk [vmem:[#allocation4] sm:$0x3] %vm646_vm9, %v644_v1  ;;  %5072 = vmatmul.mubr.msk.f32.vlgmr.msra.gmra.mxu0 %vm439_vm10, %v644_v1  ;;  %5102 = vmatprep.subr.mxu1 %v5806_v5 }
 0x46b   :  { %5082 = vmatpush3.msk.msra.mxu0 %vm443_vm5, %v5965_v14  ;;  %5085 = vmatprep.mubr.msk.f32.mxu0 %vm5807_vm6, %v5806_v5 }
 0x46c   :  { %5083 = vmatprep.subr.mxu0 %v5806_v5 }
 0x46d   :  { %5084 = vmatpush3.msra.mxu0 %v5973_v15 }
 0x46e   :  { %5095 = vmatprep.subr.mxu0 %v5806_v5 }
 0x526   :  { %v799_v3 = vpop.f32.mrf.mxu1 }
 0x527   :  { %v803_v4 = vadd.f32 %v799_v3, %v730_v2 }
 0x528   :  { %v5080_v7 = vpop.f32.mrf.mxu1 }
 0x529   :  { %5344 = vtanh.f32 %v803_v4  ;;  %v4817_v16 = vmul.f32 -1.442695, %v803_v4 }
 0x52a   :  { %v724_v9 = vpop.f32.mrf.mxu0 }
 0x52b   :  { %v728_v10 = vadd.f32 %v724_v9, %v655_v8 }
 0x52c   :  { %v5073_v11 = vpop.f32.mrf.mxu0 }
 0x52d   :  { %5346 = vtanh.f32 %v728_v10  ;;  %v4816_v17 = vmul.f32 -1.442695, %v728_v10 }
 0x52e   :  { %5348 = vpow2.f32 %v4817_v16 }
 0x52f   :  { %5350 = vpow2.f32 %v4816_v17 }
 0x536   :  { %v5345_v12 = vpop.eup %5344 }
 0x537   :  { %837 = vrot.lane.b32.xlu0 %v5345_v12, %s5808_s4 }
 0x53a   :  { %v5347_v13 = vpop.eup %5346 }
 0x53b   :  { %813 = vrot.lane.b32.xlu1 %v5347_v13, %s5808_s4  ;;  %v5349_v20 = vpop.eup %5348 }
 0x53c   :  { %v831_v21 = vadd.f32 1.0, %v5349_v20  ;;  %v5351_v22 = vpop.eup %5350 }
 0x53d   :  { %v807_v23 = vadd.f32 1.0, %v5351_v22  ;;  %v1150_v22 = vld [vmem:[#allocation3 + $0x8] sm:$0x3] }
 0x53e   :  { %5352 = vrcp.f32 %v831_v21 }
 0x53f   :  { %5354 = vrcp.f32 %v807_v23 }
 0x54b   :  { %v5353_v24 = vpop.eup %5352 }
 0x54c   :  { %v5355_v27 = vpop.eup %5354  ;;  %v835_v30 = vmul.f32 %v5353_v24, %v6025_v54 }
 0x54d   :  { %v811_v33 = vmul.f32 %v5355_v27, %v6028_v57 }
 0x5a9   :  { %v838_v25 = vpop.permute.xlu0 %837 }
 0x5aa   :  { %v840_v26 = vmul.f32 %v5353_v24, %v838_v25 }
 0x5ac   :  { %842 = vrot.lane.b32.xlu0 %v840_v26, %s5809_s19  ;;  %v1075_v26 = vld [vmem:[#allocation2 + $0x6] sm:$0x3] }
 0x5ad   :  { %v814_v28 = vpop.permute.xlu1 %813 }
 0x5ae   :  { %v816_v29 = vmul.f32 %v5355_v27, %v814_v28 }
 0x5b0   :  { %818 = vrot.lane.b32.xlu1 %v816_v29, %s5809_s19 }
 0x61e   :  { %v843_v31 = vpop.permute.xlu0 %842 }
 0x61f   :  { %v6058_v32 = vadd.f32 %v843_v31, %v835_v30 }
 0x621   :  { %5356 = vtanh.f32 %v6058_v32 }
 0x622   :  { %v819_v34 = vpop.permute.xlu1 %818 }
 0x623   :  { %v6062_v35 = vadd.f32 %v819_v34, %v811_v33 }
 0x625   :  { %5358 = vtanh.f32 %v6062_v35 }
 0x62e   :  { %v5357_v36 = vpop.eup %5356 }
 0x62f   :  { %848 = vrot.lane.b32.xlu0 %v5357_v36, %s5809_s19 }
 0x632   :  { %v5359_v37 = vpop.eup %5358 }
 0x633   :  { %824 = vrot.lane.b32.xlu1 %v5359_v37, %s5809_s19 }
 0x6a1   :  { %v849_v38 = vpop.permute.xlu0 %848 }
 0x6a2   :  { %v851_v39 = vmul.f32 %v5353_v24, %v849_v38 }
 0x6a4   :  { %859 = vrot.lane.b32.xlu0 %v851_v39, %s5810_s11 }
 0x6a5   :  { %v825_v40 = vpop.permute.xlu1 %824 }
 0x6a6   :  { %v827_v41 = vmul.f32 %v5355_v27, %v825_v40 }
 0x6a8   :  { %853 = vrot.lane.b32.xlu1 %v827_v41, %s5810_s11 }
 0x716   :  { %v860_v42 = vpop.permute.xlu0 %859 }
 0x717   :  { %863 = vst.msk [vmem:[#allocation5 + $0xc] sm:$0x3] %vm646_vm9, %v860_v42  ;;  %5093 = vmatmul.mubr.msk.f32.vlgmr.msra.gmra.mxu1 %vm439_vm10, %v860_v42 }
 0x718   :  { %5103 = vmatpush3.msk.msra.mxu1 %vm443_vm5, %v5992_v18  ;;  %5106 = vmatprep.mubr.msk.f32.mxu1 %vm5807_vm6, %v5806_v5 }
 0x719   :  { %5104 = vmatprep.subr.mxu1 %v5806_v5 }
 0x71a   :  { %v854_v43 = vpop.permute.xlu1 %853  ;;  %5105 = vmatpush3.msra.mxu1 %v5997_v19 }
 0x71b   :  { %857 = vst.msk [vmem:[#allocation4 + $0x2] sm:$0x3] %vm646_vm9, %v854_v43  ;;  %5086 = vmatmul.mubr.msk.f32.vlgmr.msra.gmra.mxu0 %vm439_vm10, %v854_v43  ;;  %5116 = vmatprep.subr.mxu1 %v5806_v5 }
 0x71c   :  { %5096 = vmatpush3.msk.msra.mxu0 %vm443_vm5, %v5965_v14  ;;  %5099 = vmatprep.mubr.msk.f32.mxu0 %vm5807_vm6, %v5806_v5 }
 0x71d   :  { %5097 = vmatprep.subr.mxu0 %v5806_v5 }
 0x71e   :  { %5098 = vmatpush3.msra.mxu0 %v5973_v15 }
 0x71f   :  { %5109 = vmatprep.subr.mxu0 %v5806_v5 }
 0x7d7   :  { %v1009_v45 = vpop.f32.mrf.mxu1 }
 0x7d8   :  { %v1013_v46 = vadd.f32 %v1009_v45, %v940_v44 }
 0x7d9   :  { %v5094_v47 = vpop.f32.mrf.mxu1 }
 0x7da   :  { %5360 = vtanh.f32 %v1013_v46  ;;  %v4823_v54 = vmul.f32 -1.442695, %v1013_v46 }
 0x7db   :  { %v934_v49 = vpop.f32.mrf.mxu0 }
 0x7dc   :  { %v938_v50 = vadd.f32 %v934_v49, %v865_v48 }
 0x7dd   :  { %v5087_v51 = vpop.f32.mrf.mxu0 }
 0x7de   :  { %5362 = vtanh.f32 %v938_v50  ;;  %v4822_v55 = vmul.f32 -1.442695, %v938_v50 }
 0x7df   :  { %5364 = vpow2.f32 %v4823_v54 }
 0x7e0   :  { %5366 = vpow2.f32 %v4822_v55 }
 0x7e7   :  { %v5361_v52 = vpop.eup %5360 }
 0x7e8   :  { %1047 = vrot.lane.b32.xlu0 %v5361_v52, %s5808_s4 }
 0x7eb   :  { %v5363_v53 = vpop.eup %5362 }
 0x7ec   :  { %1023 = vrot.lane.b32.xlu1 %v5363_v53, %s5808_s4  ;;  %v5365_v56 = vpop.eup %5364 }
 0x7ed   :  { %v1041_v57 = vadd.f32 1.0, %v5365_v56  ;;  %v5367_v58 = vpop.eup %5366 }
 0x7ee   :  { %v1017_v59 = vadd.f32 1.0, %v5367_v58  ;;  %v1360_v58 = vld [vmem:[#allocation3 + $0x6] sm:$0x3] }
 0x7ef   :  { %5368 = vrcp.f32 %v1041_v57 }
 0x7f0   :  { %5370 = vrcp.f32 %v1017_v59 }
 0x7fc   :  { %v5369_v60 = vpop.eup %5368 }
 0x7fd   :  { %v5371_v63 = vpop.eup %5370  ;;  %v1045_v2 = vmul.f32 %v5369_v60, %v6058_v32 }
 0x7fe   :  { %v1021_v7 = vmul.f32 %v5371_v63, %v6062_v35 }
 0x85a   :  { %v1048_v61 = vpop.permute.xlu0 %1047 }
 0x85b   :  { %v1050_v62 = vmul.f32 %v5369_v60, %v1048_v61 }
 0x85d   :  { %1052 = vrot.lane.b32.xlu0 %v1050_v62, %s5809_s19  ;;  %v1285_v62 = vld [vmem:[#allocation2 + $0x8] sm:$0x3] }
 0x85e   :  { %v1024_v0 = vpop.permute.xlu1 %1023 }
 0x85f   :  { %v1026_v1 = vmul.f32 %v5371_v63, %v1024_v0 }
 0x861   :  { %1028 = vrot.lane.b32.xlu1 %v1026_v1, %s5809_s19 }
 0x8cf   :  { %v1053_v3 = vpop.permute.xlu0 %1052 }
 0x8d0   :  { %v6092_v4 = vadd.f32 %v1053_v3, %v1045_v2 }
 0x8d2   :  { %5372 = vtanh.f32 %v6092_v4 }
 0x8d3   :  { %v1029_v8 = vpop.permute.xlu1 %1028 }
 0x8d4   :  { %v6096_v9 = vadd.f32 %v1029_v8, %v1021_v7 }
 0x8d6   :  { %5374 = vtanh.f32 %v6096_v9 }
 0x8df   :  { %v5373_v10 = vpop.eup %5372 }
 0x8e0   :  { %1058 = vrot.lane.b32.xlu0 %v5373_v10, %s5809_s19 }
 0x8e3   :  { %v5375_v11 = vpop.eup %5374 }
 0x8e4   :  { %1034 = vrot.lane.b32.xlu1 %v5375_v11, %s5809_s19 }
 0x952   :  { %v1059_v12 = vpop.permute.xlu0 %1058 }
 0x953   :  { %v1061_v13 = vmul.f32 %v5369_v60, %v1059_v12 }
 0x955   :  { %1069 = vrot.lane.b32.xlu0 %v1061_v13, %s5810_s11 }
 0x956   :  { %v1035_v16 = vpop.permute.xlu1 %1034 }
 0x957   :  { %v1037_v17 = vmul.f32 %v5371_v63, %v1035_v16 }
 0x959   :  { %1063 = vrot.lane.b32.xlu1 %v1037_v17, %s5810_s11 }
 0x9c7   :  { %v1070_v20 = vpop.permute.xlu0 %1069 }
 0x9c8   :  { %1073 = vst.msk [vmem:[#allocation5 + $0xa] sm:$0x3] %vm646_vm9, %v1070_v20  ;;  %5107 = vmatmul.mubr.msk.f32.vlgmr.msra.gmra.mxu1 %vm439_vm10, %v1070_v20 }
 0x9c9   :  { %5117 = vmatpush3.msk.msra.mxu1 %vm443_vm5, %v5992_v18  ;;  %5120 = vmatprep.mubr.msk.f32.mxu1 %vm5807_vm6, %v5806_v5 }
 0x9ca   :  { %5118 = vmatprep.subr.mxu1 %v5806_v5 }
 0x9cb   :  { %v1064_v21 = vpop.permute.xlu1 %1063  ;;  %5119 = vmatpush3.msra.mxu1 %v5997_v19 }
 0x9cc   :  { %1067 = vst.msk [vmem:[#allocation4 + $0x4] sm:$0x3] %vm646_vm9, %v1064_v21  ;;  %5100 = vmatmul.mubr.msk.f32.vlgmr.msra.gmra.mxu0 %vm439_vm10, %v1064_v21  ;;  %5130 = vmatprep.subr.mxu1 %v5806_v5 }
 0x9cd   :  { %5110 = vmatpush3.msk.msra.mxu0 %vm443_vm5, %v5965_v14  ;;  %5113 = vmatprep.mubr.msk.f32.mxu0 %vm5807_vm6, %v5806_v5 }
 0x9ce   :  { %5111 = vmatprep.subr.mxu0 %v5806_v5 }
 0x9cf   :  { %5112 = vmatpush3.msra.mxu0 %v5973_v15 }
 0x9d0   :  { %5123 = vmatprep.subr.mxu0 %v5806_v5 }
 0xa88   :  { %v1219_v23 = vpop.f32.mrf.mxu1 }
 0xa89   :  { %v1223_v24 = vadd.f32 %v1219_v23, %v1150_v22 }
 0xa8a   :  { %v5108_v25 = vpop.f32.mrf.mxu1 }
 0xa8b   :  { %5376 = vtanh.f32 %v1223_v24  ;;  %v4829_v32 = vmul.f32 -1.442695, %v1223_v24 }
 0xa8c   :  { %v1144_v27 = vpop.f32.mrf.mxu0 }
 0xa8d   :  { %v1148_v28 = vadd.f32 %v1144_v27, %v1075_v26 }
 0xa8e   :  { %v5101_v29 = vpop.f32.mrf.mxu0 }
 0xa8f   :  { %5378 = vtanh.f32 %v1148_v28  ;;  %v4828_v33 = vmul.f32 -1.442695, %v1148_v28 }
 0xa90   :  { %5380 = vpow2.f32 %v4829_v32 }
 0xa91   :  { %5382 = vpow2.f32 %v4828_v33 }
 0xa98   :  { %v5377_v30 = vpop.eup %5376 }
 0xa99   :  { %1257 = vrot.lane.b32.xlu0 %v5377_v30, %s5808_s4 }
 0xa9c   :  { %v5379_v31 = vpop.eup %5378 }
 0xa9d   :  { %1233 = vrot.lane.b32.xlu1 %v5379_v31, %s5808_s4  ;;  %v5381_v34 = vpop.eup %5380 }
 0xa9e   :  { %v1251_v35 = vadd.f32 1.0, %v5381_v34  ;;  %v5383_v36 = vpop.eup %5382 }
 0xa9f   :  { %v1227_v37 = vadd.f32 1.0, %v5383_v36  ;;  %v1570_v36 = vld [vmem:[#allocation3 + $0x4] sm:$0x3] }
 0xaa0   :  { %5384 = vrcp.f32 %v1251_v35 }
 0xaa1   :  { %5386 = vrcp.f32 %v1227_v37 }
 0xaad   :  { %v5385_v38 = vpop.eup %5384 }
 0xaae   :  { %v5387_v41 = vpop.eup %5386  ;;  %v1255_v44 = vmul.f32 %v5385_v38, %v6092_v4 }
 0xaaf   :  { %v1231_v47 = vmul.f32 %v5387_v41, %v6096_v9 }
 0xb0b   :  { %v1258_v39 = vpop.permute.xlu0 %1257 }
 0xb0c   :  { %v1260_v40 = vmul.f32 %v5385_v38, %v1258_v39 }
 0xb0e   :  { %1262 = vrot.lane.b32.xlu0 %v1260_v40, %s5809_s19  ;;  %v1495_v40 = vld [vmem:[#allocation2 + $0xa] sm:$0x3] }
 0xb0f   :  { %v1234_v42 = vpop.permute.xlu1 %1233 }
 0xb10   :  { %v1236_v43 = vmul.f32 %v5387_v41, %v1234_v42 }
 0xb12   :  { %1238 = vrot.lane.b32.xlu1 %v1236_v43, %s5809_s19 }
 0xb80   :  { %v1263_v45 = vpop.permute.xlu0 %1262 }
 0xb81   :  { %v6126_v46 = vadd.f32 %v1263_v45, %v1255_v44 }
 0xb83   :  { %5388 = vtanh.f32 %v6126_v46 }
 0xb84   :  { %v1239_v48 = vpop.permute.xlu1 %1238 }
 0xb85   :  { %v6130_v49 = vadd.f32 %v1239_v48, %v1231_v47 }
 0xb87   :  { %5390 = vtanh.f32 %v6130_v49 }
 0xb90   :  { %v5389_v50 = vpop.eup %5388 }
 0xb91   :  { %1268 = vrot.lane.b32.xlu0 %v5389_v50, %s5809_s19 }
 0xb94   :  { %v5391_v51 = vpop.eup %5390 }
 0xb95   :  { %1244 = vrot.lane.b32.xlu1 %v5391_v51, %s5809_s19 }
 0xc03   :  { %v1269_v52 = vpop.permute.xlu0 %1268 }
 0xc04   :  { %v1271_v53 = vmul.f32 %v5385_v38, %v1269_v52 }
 0xc06   :  { %1279 = vrot.lane.b32.xlu0 %v1271_v53, %s5810_s11 }
 0xc07   :  { %v1245_v54 = vpop.permute.xlu1 %1244 }
 0xc08   :  { %v1247_v55 = vmul.f32 %v5387_v41, %v1245_v54 }
 0xc0a   :  { %1273 = vrot.lane.b32.xlu1 %v1247_v55, %s5810_s11 }
 0xc78   :  { %v1280_v56 = vpop.permute.xlu0 %1279 }
 0xc79   :  { %1283 = vst.msk [vmem:[#allocation5 + $0x8] sm:$0x3] %vm646_vm9, %v1280_v56  ;;  %5121 = vmatmul.mubr.msk.f32.vlgmr.msra.gmra.mxu1 %vm439_vm10, %v1280_v56 }
 0xc7a   :  { %5131 = vmatpush3.msk.msra.mxu1 %vm443_vm5, %v5992_v18  ;;  %5134 = vmatprep.mubr.msk.f32.mxu1 %vm5807_vm6, %v5806_v5 }
 0xc7b   :  { %5132 = vmatprep.subr.mxu1 %v5806_v5 }
 0xc7c   :  { %v1274_v57 = vpop.permute.xlu1 %1273  ;;  %5133 = vmatpush3.msra.mxu1 %v5997_v19 }
 0xc7d   :  { %1277 = vst.msk [vmem:[#allocation4 + $0x6] sm:$0x3] %vm646_vm9, %v1274_v57  ;;  %5114 = vmatmul.mubr.msk.f32.vlgmr.msra.gmra.mxu0 %vm439_vm10, %v1274_v57  ;;  %5144 = vmatprep.subr.mxu1 %v5806_v5 }
 0xc7e   :  { %5124 = vmatpush3.msk.msra.mxu0 %vm443_vm5, %v5965_v14  ;;  %5127 = vmatprep.mubr.msk.f32.mxu0 %vm5807_vm6, %v5806_v5 }
 0xc7f   :  { %5125 = vmatprep.subr.mxu0 %v5806_v5 }
 0xc80   :  { %5126 = vmatpush3.msra.mxu0 %v5973_v15 }
 0xc81   :  { %5137 = vmatprep.subr.mxu0 %v5806_v5 }
 0xd39   :  { %v1429_v59 = vpop.f32.mrf.mxu1 }
 0xd3a   :  { %v1433_v60 = vadd.f32 %v1429_v59, %v1360_v58 }
 0xd3b   :  { %v5122_v61 = vpop.f32.mrf.mxu1 }
 0xd3c   :  { %5392 = vtanh.f32 %v1433_v60  ;;  %v4835_v4 = vmul.f32 -1.442695, %v1433_v60 }
 0xd3d   :  { %v1354_v63 = vpop.f32.mrf.mxu0 }
 0xd3e   :  { %v1358_v0 = vadd.f32 %v1354_v63, %v1285_v62 }
 0xd3f   :  { %v5115_v1 = vpop.f32.mrf.mxu0 }
 0xd40   :  { %5394 = vtanh.f32 %v1358_v0  ;;  %v4834_v7 = vmul.f32 -1.442695, %v1358_v0 }
 0xd41   :  { %5396 = vpow2.f32 %v4835_v4 }
 0xd42   :  { %5398 = vpow2.f32 %v4834_v7 }
 0xd49   :  { %v5393_v2 = vpop.eup %5392 }
 0xd4a   :  { %1467 = vrot.lane.b32.xlu0 %v5393_v2, %s5808_s4 }
 0xd4d   :  { %v5395_v3 = vpop.eup %5394 }
 0xd4e   :  { %1443 = vrot.lane.b32.xlu1 %v5395_v3, %s5808_s4  ;;  %v5397_v8 = vpop.eup %5396 }
 0xd4f   :  { %v1461_v9 = vadd.f32 1.0, %v5397_v8  ;;  %v5399_v10 = vpop.eup %5398 }
 0xd50   :  { %v1437_v11 = vadd.f32 1.0, %v5399_v10 }
 0xd51   :  { %5400 = vrcp.f32 %v1461_v9 }
 0xd52   :  { %5402 = vrcp.f32 %v1437_v11 }
 0xd5e   :  { %v5401_v12 = vpop.eup %5400 }
 0xd5f   :  { %v5403_v17 = vpop.eup %5402  ;;  %v1465_v22 = vmul.f32 %v5401_v12, %v6126_v46 }
 0xd60   :  { %v1441_v25 = vmul.f32 %v5403_v17, %v6130_v49 }
 0xdbc   :  { %v1468_v13 = vpop.permute.xlu0 %1467 }
 0xdbd   :  { %v1470_v16 = vmul.f32 %v5401_v12, %v1468_v13 }
 0xdbf   :  { %1472 = vrot.lane.b32.xlu0 %v1470_v16, %s5809_s19 }
 0xdc0   :  { %v1444_v20 = vpop.permute.xlu1 %1443 }
 0xdc1   :  { %v1446_v21 = vmul.f32 %v5403_v17, %v1444_v20 }
 0xdc3   :  { %1448 = vrot.lane.b32.xlu1 %v1446_v21, %s5809_s19 }
 0xe31   :  { %v1473_v23 = vpop.permute.xlu0 %1472 }
 0xe32   :  { %v6160_v24 = vadd.f32 %v1473_v23, %v1465_v22 }
 0xe34   :  { %5404 = vtanh.f32 %v6160_v24 }
 0xe35   :  { %v1449_v26 = vpop.permute.xlu1 %1448 }
 0xe36   :  { %v6164_v27 = vadd.f32 %v1449_v26, %v1441_v25 }
 0xe38   :  { %5406 = vtanh.f32 %v6164_v27 }
 0xe41   :  { %v5405_v28 = vpop.eup %5404 }
 0xe42   :  { %1478 = vrot.lane.b32.xlu0 %v5405_v28, %s5809_s19 }
 0xe45   :  { %v5407_v29 = vpop.eup %5406 }
 0xe46   :  { %1454 = vrot.lane.b32.xlu1 %v5407_v29, %s5809_s19 }
 0xeb4   :  { %v1479_v30 = vpop.permute.xlu0 %1478 }
 0xeb5   :  { %v1481_v31 = vmul.f32 %v5401_v12, %v1479_v30 }
 0xeb7   :  { %1489 = vrot.lane.b32.xlu0 %v1481_v31, %s5810_s11 }
 0xeb8   :  { %v1455_v32 = vpop.permute.xlu1 %1454 }
 0xeb9   :  { %v1457_v33 = vmul.f32 %v5403_v17, %v1455_v32 }
 0xebb   :  { %1483 = vrot.lane.b32.xlu1 %v1457_v33, %s5810_s11 }
 0xf29   :  { %v1490_v34 = vpop.permute.xlu0 %1489 }
 0xf2a   :  { %1493 = vst.msk [vmem:[#allocation5 + $0x6] sm:$0x3] %vm646_vm9, %v1490_v34  ;;  %5135 = vmatmul.mubr.msk.f32.vlgmr.msra.gmra.mxu1 %vm439_vm10, %v1490_v34 }
 0xf2b   :  { %5145 = vmatpush3.msk.msra.mxu1 %vm443_vm5, %v5992_v18  ;;  %5148 = vmatprep.mubr.msk.f32.mxu1 %vm5807_vm6, %v5806_v5 }
 0xf2c   :  { %5146 = vmatprep.subr.mxu1 %v5806_v5 }
 0xf2d   :  { %v1484_v35 = vpop.permute.xlu1 %1483  ;;  %5147 = vmatpush3.msra.mxu1 %v5997_v19 }
 0xf2e   :  { %1487 = vst.msk [vmem:[#allocation4 + $0x8] sm:$0x3] %vm646_vm9, %v1484_v35  ;;  %5128 = vmatmul.mubr.msk.f32.vlgmr.msra.gmra.mxu0 %vm439_vm10, %v1484_v35  ;;  %5158 = vmatprep.subr.mxu1 %v5806_v5 }
 0xf2f   :  { %5138 = vmatpush3.msk.msra.mxu0 %vm443_vm5, %v5965_v14  ;;  %5141 = vmatprep.mubr.msk.f32.mxu0 %vm5807_vm6, %v5806_v5 }
 0xf30   :  { %5139 = vmatprep.subr.mxu0 %v5806_v5 }
 0xf31   :  { %5140 = vmatpush3.msra.mxu0 %v5973_v15 }
 0xf32   :  { %5151 = vmatprep.subr.mxu0 %v5806_v5 }
 0xfea   :  { %v1639_v37 = vpop.f32.mrf.mxu1 }
 0xfeb   :  { %v1643_v38 = vadd.f32 %v1639_v37, %v1570_v36 }
 0xfec   :  { %v5136_v39 = vpop.f32.mrf.mxu1 }
 0xfed   :  { %5408 = vtanh.f32 %v1643_v38  ;;  %v4841_v46 = vmul.f32 -1.442695, %v1643_v38 }
 0xfee   :  { %v1564_v41 = vpop.f32.mrf.mxu0 }
 0xfef   :  { %v1568_v42 = vadd.f32 %v1564_v41, %v1495_v40 }
 0xff0   :  { %v5129_v43 = vpop.f32.mrf.mxu0 }
 0xff1   :  { %5410 = vtanh.f32 %v1568_v42  ;;  %v4840_v47 = vmul.f32 -1.442695, %v1568_v42 }
 0xff2   :  { %5412 = vpow2.f32 %v4841_v46 }
 0xff3   :  { %5414 = vpow2.f32 %v4840_v47  ;;  %v1989_v47 = vld [vmem:[#allocation3] sm:$0x3] }
 0xffa   :  { %v5409_v44 = vpop.eup %5408 }
 0xffb   :  { %1677 = vrot.lane.b32.xlu0 %v5409_v44, %s5808_s4 }
 0xffe   :  { %v5411_v45 = vpop.eup %5410 }
 0xfff   :  { %1653 = vrot.lane.b32.xlu1 %v5411_v45, %s5808_s4  ;;  %v5413_v48 = vpop.eup %5412  ;;  %v6225_v45 = vld [vmem:[#allocation4] sm:$0xff] }
0x1000   :  { %v1671_v49 = vadd.f32 1.0, %v5413_v48  ;;  %v5415_v50 = vpop.eup %5414 }
0x1001   :  { %v1647_v51 = vadd.f32 1.0, %v5415_v50 }
0x1002   :  { %5416 = vrcp.f32 %v1671_v49 }
0x1003   :  { %5418 = vrcp.f32 %v1647_v51  ;;  %v1915_v51 = vld [vmem:[#allocation2 + $0xe] sm:$0x3] }
0x100f   :  { %v5417_v52 = vpop.eup %5416 }
0x1010   :  { %v5419_v55 = vpop.eup %5418  ;;  %v1675_v58 = vmul.f32 %v5417_v52, %v6160_v24 }
0x1011   :  { %v1651_v61 = vmul.f32 %v5419_v55, %v6164_v27 }
0x106d   :  { %v1678_v53 = vpop.permute.xlu0 %1677 }
0x106e   :  { %v1680_v54 = vmul.f32 %v5417_v52, %v1678_v53 }
0x1070   :  { %1682 = vrot.lane.b32.xlu0 %v1680_v54, %s5809_s19 }
0x1071   :  { %v1654_v56 = vpop.permute.xlu1 %1653 }
0x1072   :  { %v1656_v57 = vmul.f32 %v5419_v55, %v1654_v56 }
0x1074   :  { %1658 = vrot.lane.b32.xlu1 %v1656_v57, %s5809_s19 }
0x10e2   :  { %v1683_v59 = vpop.permute.xlu0 %1682 }
0x10e3   :  { %v1685_v60 = vadd.f32 %v1683_v59, %v1675_v58 }
0x10e5   :  { %5420 = vtanh.f32 %v1685_v60 }
0x10e6   :  { %v1659_v62 = vpop.permute.xlu1 %1658 }
0x10e7   :  { %v1661_v63 = vadd.f32 %v1659_v62, %v1651_v61 }
0x10e9   :  { %5422 = vtanh.f32 %v1661_v63 }
0x10f2   :  { %v5421_v0 = vpop.eup %5420 }
0x10f3   :  { %1688 = vrot.lane.b32.xlu0 %v5421_v0, %s5809_s19 }
0x10f6   :  { %v5423_v1 = vpop.eup %5422 }
0x10f7   :  { %1664 = vrot.lane.b32.xlu1 %v5423_v1, %s5809_s19 }
0x1165   :  { %v1689_v2 = vpop.permute.xlu0 %1688 }
0x1166   :  { %v1691_v3 = vmul.f32 %v5417_v52, %v1689_v2 }
0x1168   :  { %1699 = vrot.lane.b32.xlu0 %v1691_v3, %s5810_s11 }
0x1169   :  { %v1665_v4 = vpop.permute.xlu1 %1664 }
0x116a   :  { %v1667_v7 = vmul.f32 %v5419_v55, %v1665_v4 }
0x116c   :  { %1693 = vrot.lane.b32.xlu1 %v1667_v7, %s5810_s11 }
0x11da   :  { %v1700_v8 = vpop.permute.xlu0 %1699 }
0x11db   :  { %1703 = vst.msk [vmem:[#allocation5 + $0x4] sm:$0x3] %vm646_vm9, %v1700_v8  ;;  %5149 = vmatmul.mubr.msk.f32.vlgmr.msra.gmra.mxu1 %vm439_vm10, %v1700_v8 }
0x11dc   :  { %5159 = vmatpush3.msk.msra.mxu1 %vm443_vm5, %v5992_v18  ;;  %5162 = vmatprep.mubr.msk.f32.mxu1 %vm5807_vm6, %v5806_v5  ;;  %v1780_v18 = vld [vmem:[#allocation3 + $0x2] sm:$0x3] }
0x11dd   :  { %5160 = vmatprep.subr.mxu1 %v5806_v5 }
0x11de   :  { %v1694_v9 = vpop.permute.xlu1 %1693  ;;  %5161 = vmatpush3.msra.mxu1 %v5997_v19  ;;  %v1705_v19 = vld [vmem:[#allocation2 + $0xc] sm:$0x3] }
0x11df   :  { %1697 = vst.msk [vmem:[#allocation4 + $0xa] sm:$0x3] %vm646_vm9, %v1694_v9  ;;  %5142 = vmatmul.mubr.msk.f32.vlgmr.msra.gmra.mxu0 %vm439_vm10, %v1694_v9 }
0x11e0   :  { %5152 = vmatpush3.msk.msra.mxu0 %vm443_vm5, %v5965_v14  ;;  %5155 = vmatprep.mubr.msk.f32.mxu0 %vm5807_vm6, %v5806_v5 }
0x11e1   :  { %5153 = vmatprep.subr.mxu0 %v5806_v5 }
0x11e2   :  { %5154 = vmatpush3.msra.mxu0 %v5973_v15 }
0x129b   :  { %v1849_v10 = vpop.f32.mrf.mxu1 }
0x129c   :  { %v1853_v11 = vadd.f32 %v1849_v10, %v1780_v18 }
0x129d   :  { %v5150_v12 = vpop.f32.mrf.mxu1 }
0x129e   :  { %5424 = vtanh.f32 %v1853_v11  ;;  %v4847_v21 = vmul.f32 -1.442695, %v1853_v11 }
0x129f   :  { %v1774_v13 = vpop.f32.mrf.mxu0 }
0x12a0   :  { %v1778_v16 = vadd.f32 %v1774_v13, %v1705_v19  ;;  %v2143_v13 = vld [vmem:[%s6760_s9 + $0x8] sm:$0x7f] }
0x12a1   :  { %v5143_v17 = vpop.f32.mrf.mxu0  ;;  %5165 = vmatprep.subr.msk.mxu0 %vm443_vm5, %v2143_v13 }
0x12a2   :  { %5426 = vtanh.f32 %v1778_v16  ;;  %v4846_v22 = vmul.f32 -1.442695, %v1778_v16  ;;  %v2142_v16 = vld [vmem:[%s6760_s9] sm:$0xff]  ;;  %v2141_v17 = vld [vmem:[%s6759_s8 + $0x8] sm:$0x7f] }
0x12a3   :  { %5428 = vpow2.f32 %v4847_v21  ;;  %5172 = vmatprep.subr.msk.mxu1 %vm443_vm5, %v2141_v17 }
0x12a4   :  { %5430 = vpow2.f32 %v4846_v22 }
0x12ab   :  { %v5425_v20 = vpop.eup %5424 }
0x12ac   :  { %1887 = vrot.lane.b32.xlu0 %v5425_v20, %s5808_s4  ;;  %v2326_v20 = vld [vmem:[%s6764_s13 + $0x8] sm:$0x7f] }
0x12af   :  { %v5427_v14 = vpop.eup %5426 }
0x12b0   :  { %1863 = vrot.lane.b32.xlu1 %v5427_v14, %s5808_s4  ;;  %v5429_v15 = vpop.eup %5428  ;;  %v2140_v14 = vld [vmem:[%s6759_s8] sm:$0xff] }
0x12b1   :  { %v1881_v23 = vadd.f32 1.0, %v5429_v15  ;;  %v5431_v24 = vpop.eup %5430  ;;  %v2324_v15 = vld [vmem:[#allocation15 + $0x8] sm:$0x7f] }
0x12b2   :  { %v1857_v25 = vadd.f32 1.0, %v5431_v24 }
0x12b3   :  { %5432 = vrcp.f32 %v1881_v23 }
0x12b4   :  { %5434 = vrcp.f32 %v1857_v25 }
0x12c0   :  { %v5433_v26 = vpop.eup %5432 }
0x12c1   :  { %v5435_v29 = vpop.eup %5434  ;;  %v1885_v32 = vmul.f32 %v5433_v26, %v1685_v60 }
0x12c2   :  { %v1861_v35 = vmul.f32 %v5435_v29, %v1661_v63 }
0x131e   :  { %v1888_v27 = vpop.permute.xlu0 %1887 }
0x131f   :  { %v1890_v28 = vmul.f32 %v5433_v26, %v1888_v27 }
0x1321   :  { %1892 = vrot.lane.b32.xlu0 %v1890_v28, %s5809_s19  ;;  %v2139_v28 = vld [vmem:[#allocation5 + $0x8] sm:$0xff] }
0x1322   :  { %v1864_v30 = vpop.permute.xlu1 %1863 }
0x1323   :  { %v1866_v31 = vmul.f32 %v5435_v29, %v1864_v30 }
0x1325   :  { %1868 = vrot.lane.b32.xlu1 %v1866_v31, %s5809_s19  ;;  %v2323_v31 = vld [vmem:[#allocation15] sm:$0xff] }
0x1393   :  { %v1893_v33 = vpop.permute.xlu0 %1892 }
0x1394   :  { %v1895_v34 = vadd.f32 %v1893_v33, %v1885_v32  ;;  %v6280_v32 = vld [vmem:[#allocation12 + $0x8] sm:$0x7f]  ;;  %v6285_v33 = vld [vmem:[#allocation12] sm:$0xff] }
0x1396   :  { %5436 = vtanh.f32 %v1895_v34 }
0x1397   :  { %v1869_v36 = vpop.permute.xlu1 %1868 }
0x1398   :  { %v1871_v37 = vadd.f32 %v1869_v36, %v1861_v35  ;;  %v6297_v35 = vld [vmem:[#allocation17] sm:$0xff] }
0x139a   :  { %5438 = vtanh.f32 %v1871_v37 }
0x13a3   :  { %v5437_v38 = vpop.eup %5436 }
0x13a4   :  { %1898 = vrot.lane.b32.xlu0 %v5437_v38, %s5809_s19 }
0x13a7   :  { %v5439_v39 = vpop.eup %5438 }
0x13a8   :  { %1874 = vrot.lane.b32.xlu1 %v5439_v39, %s5809_s19  ;;  %v4860_v39 = vld [vmem:[#allocation14] ss:$0 sm:$0xff] }
0x1416   :  { %v1899_v40 = vpop.permute.xlu0 %1898 }
0x1417   :  { %v1901_v41 = vmul.f32 %v5433_v26, %v1899_v40 }
0x1419   :  { %1909 = vrot.lane.b32.xlu0 %v1901_v41, %s5810_s11 }
0x141a   :  { %v1875_v42 = vpop.permute.xlu1 %1874 }
0x141b   :  { %v1877_v43 = vmul.f32 %v5435_v29, %v1875_v42  ;;  %v2325_v29 = vld [vmem:[%s6764_s13] sm:$0xff] }
0x141d   :  { %1903 = vrot.lane.b32.xlu1 %v1877_v43, %s5810_s11 }
0x148b   :  { %v1910_v44 = vpop.permute.xlu0 %1909 }
0x148c   :  { %1913 = vst.msk [vmem:[#allocation5 + $0x2] sm:$0x3] %vm646_vm9, %v1910_v44  ;;  %5163 = vmatmul.mubr.msk.f32.vlgmr.msra.gmra.mxu1 %vm439_vm10, %v1910_v44 }
0x148d   :  { %5176 = vmatprep.mubr.msk.f32.mxu1 %vm439_vm10, %v6225_v45  ;;  %5173 = vmatpush3.msk.msra.mxu1 %vm443_vm5, %v2141_v17 }
0x148e   :  { %5174 = vmatprep.subr.mxu1 %v2140_v14 }
0x148f   :  { %v1904_v46 = vpop.permute.xlu1 %1903  ;;  %5175 = vmatpush3.msra.mxu1 %v2140_v14 }
0x1490   :  { %1907 = vst.msk [vmem:[#allocation4 + $0xc] sm:$0x3] %vm646_vm9, %v1904_v46  ;;  %5156 = vmatmul.mubr.msk.f32.vlgmr.msra.gmra.mxu0 %vm439_vm10, %v1904_v46  ;;  %5186 = vmatprep.subr.msk.mxu1 %vm443_vm5, %v2324_v15  ;;  %v4867_v46 = vld [vmem:[%s6766_s15] ss:$0 sm:$0xff]  ;;  %s5812_s15 = smov 113  }
0x1491   :  { %5166 = vmatpush3.msk.msra.mxu0 %vm443_vm5, %v2143_v13 }
0x1492   :  { %5167 = vmatprep.subr.mxu0 %v2142_v16 }
0x1493   :  { %5168 = vmatpush3.msra.mxu0 %v2142_v16 }
0x1494   :  { %5179 = vmatprep.subr.msk.mxu0 %vm443_vm5, %v2326_v20 }
0x154c   :  { %v2058_v48 = vpop.f32.mrf.mxu1 }
0x154d   :  { %v2062_v49 = vadd.f32 %v2058_v48, %v1989_v47 }
0x154e   :  { %v5164_v50 = vpop.f32.mrf.mxu1 }
0x154f   :  { %5440 = vtanh.f32 %v2062_v49  ;;  %v4853_v57 = vmul.f32 -1.442695, %v2062_v49 }
0x1550   :  { %v1984_v52 = vpop.f32.mrf.mxu0 }
0x1551   :  { %v1988_v53 = vadd.f32 %v1984_v52, %v1915_v51 }
0x1552   :  { %v5157_v54 = vpop.f32.mrf.mxu0 }
0x1553   :  { %5442 = vtanh.f32 %v1988_v53  ;;  %v4852_v58 = vmul.f32 -1.442695, %v1988_v53 }
0x1554   :  { %5444 = vpow2.f32 %v4853_v57 }
0x1555   :  { %5446 = vpow2.f32 %v4852_v58 }
0x155c   :  { %v5441_v55 = vpop.eup %5440 }
0x155d   :  { %2096 = vrot.lane.b32.xlu0 %v5441_v55, %s5808_s4 }
0x1560   :  { %v5443_v56 = vpop.eup %5442 }
0x1561   :  { %2072 = vrot.lane.b32.xlu1 %v5443_v56, %s5808_s4  ;;  %v5445_v59 = vpop.eup %5444 }
0x1562   :  { %v2090_v60 = vadd.f32 1.0, %v5445_v59  ;;  %v5447_v61 = vpop.eup %5446 }
0x1563   :  { %v2066_v62 = vadd.f32 1.0, %v5447_v61 }
0x1564   :  { %5448 = vrcp.f32 %v2090_v60 }
0x1565   :  { %5450 = vrcp.f32 %v2066_v62 }
0x1571   :  { %v5449_v63 = vpop.eup %5448 }
0x1572   :  { %v5451_v2 = vpop.eup %5450  ;;  %v2094_v7 = vmul.f32 %v5449_v63, %v1895_v34  ;;  %v6290_v34 = vld [vmem:[#allocation17 + $0x8] sm:$0x7f] }
0x1573   :  { %v2070_v18 = vmul.f32 %v5451_v2, %v1871_v37 }
0x15cf   :  { %v2097_v0 = vpop.permute.xlu0 %2096 }
0x15d0   :  { %v2099_v1 = vmul.f32 %v5449_v63, %v2097_v0 }
0x15d2   :  { %2101 = vrot.lane.b32.xlu0 %v2099_v1, %s5809_s19 }
0x15d3   :  { %v2073_v3 = vpop.permute.xlu1 %2072 }
0x15d4   :  { %v2075_v4 = vmul.f32 %v5451_v2, %v2073_v3 }
0x15d6   :  { %2077 = vrot.lane.b32.xlu1 %v2075_v4, %s5809_s19 }
0x1644   :  { %v2102_v8 = vpop.permute.xlu0 %2101 }
0x1645   :  { %v6235_v9 = vadd.f32 %v2102_v8, %v2094_v7 }
0x1647   :  { %5452 = vtanh.f32 %v6235_v9 }
0x1648   :  { %v2078_v10 = vpop.permute.xlu1 %2077 }
0x1649   :  { %v6238_v11 = vadd.f32 %v2078_v10, %v2070_v18 }
0x164b   :  { %5454 = vtanh.f32 %v6238_v11 }
0x1654   :  { %v5453_v12 = vpop.eup %5452 }
0x1655   :  { %2107 = vrot.lane.b32.xlu0 %v5453_v12, %s5809_s19 }
0x1658   :  { %v5455_v19 = vpop.eup %5454 }
0x1659   :  { %2083 = vrot.lane.b32.xlu1 %v5455_v19, %s5809_s19 }
0x16c7   :  { %v2108_v21 = vpop.permute.xlu0 %2107 }
0x16c8   :  { %v2110_v22 = vmul.f32 %v5449_v63, %v2108_v21 }
0x16ca   :  { %2118 = vrot.lane.b32.xlu0 %v2110_v22, %s5810_s11 }
0x16cb   :  { %v2084_v23 = vpop.permute.xlu1 %2083 }
0x16cc   :  { %v2086_v24 = vmul.f32 %v5451_v2, %v2084_v23 }
0x16ce   :  { %2112 = vrot.lane.b32.xlu1 %v2086_v24, %s5810_s11 }
0x173c   :  { %v2119_v25 = vpop.permute.xlu0 %2118 }
0x173d   :  { %2121 = vst.msk [vmem:[#allocation5] sm:$0x3] %vm646_vm9, %v2119_v25  ;;  %2129 = vst.msk [vmem:[#allocation19 + $0x2] sm:$0x3] %vm646_vm9, %v2119_v25 }
0x1740   :  { %v2113_v26 = vpop.permute.xlu1 %2112 }
0x1741   :  { %2116 = vst.msk [vmem:[#allocation4 + $0xe] sm:$0x3] %vm646_vm9, %v2113_v26  ;;  %2122 = vst.msk [vmem:[#allocation19] sm:$0x3] %vm646_vm9, %v2113_v26 }
0x1744   :  { %v2138_v27 = vld [vmem:[#allocation5] sm:$0xff] }
0x1745   :  { %5169 = vmatprep.mubr.msk.f32.mxu0 %vm439_vm10, %v2138_v27 }
0x1746   :  { %5170 = vmatmul.mubr.msk.f32.vlgmr.msra.gmra.mxu0 %vm439_vm10, %v2139_v28 }
0x1747   :  { %5180 = vmatpush3.msk.msra.mxu0 %vm443_vm5, %v2326_v20  ;;  %5183 = vmatprep.mubr.msk.f32.mxu0 %vm439_vm10, %v2138_v27 }
0x1748   :  { %5181 = vmatprep.subr.mxu0 %v2325_v29  ;;  %v2137_v30 = vld [vmem:[#allocation4 + $0x8] sm:$0xff] }
0x1749   :  { %5177 = vmatmul.mubr.msk.f32.vlgmr.msra.gmra.mxu1 %vm439_vm10, %v2137_v30  ;;  %5182 = vmatpush3.msra.mxu0 %v2325_v29 }
0x174a   :  { %5184 = vmatmul.mubr.msk.f32.vlgmr.msra.gmra.mxu0 %vm439_vm10, %v2139_v28  ;;  %5187 = vmatpush3.msk.msra.mxu1 %vm443_vm5, %v2324_v15 }
0x174b   :  { %5190 = vmatprep.mubr.msk.f32.mxu1 %vm439_vm10, %v6225_v45  ;;  %5188 = vmatprep.subr.mxu1 %v2323_v31 }
0x174c   :  { %5189 = vmatpush3.msra.mxu1 %v2323_v31  ;;  %5193 = vmatprep.subr.mxu0 %v5806_v5 }
0x174d   :  { %5191 = vmatmul.mubr.msk.f32.vlgmr.msra.gmra.mxu1 %vm439_vm10, %v2137_v30  ;;  %5194 = vmatpush3.msk.msra.mxu0 %vm443_vm5, %v6280_v32 }
0x174e   :  { %5195 = vmatprep.subr.mxu0 %v5806_v5  ;;  %5197 = vmatprep.mubr.msk.f32.mxu0 %vm5807_vm6, %v5806_v5 }
0x174f   :  { %5196 = vmatpush3.msra.mxu0 %v6285_v33  ;;  %5200 = vmatprep.subr.mxu1 %v5806_v5 }
0x1750   :  { %5198 = vmatmul.mubr.f32.vlgmr.msra.gmra.mxu0 %v5806_v5  ;;  %5201 = vmatpush3.msk.msra.mxu1 %vm443_vm5, %v6290_v34 }
0x1751   :  { %5202 = vmatprep.subr.mxu1 %v5806_v5  ;;  %5204 = vmatprep.mubr.msk.f32.mxu1 %vm5807_vm6, %v5806_v5 }
0x1752   :  { %5203 = vmatpush3.msra.mxu1 %v6297_v35  ;;  %5207 = vmatprep.subr.mxu0 %v5806_v5 }
0x1753   :  { %5205 = vmatmul.mubr.f32.vlgmr.msra.gmra.mxu1 %v5806_v5  ;;  %5208 = vmatpush3.msk.msra.mxu0 %vm443_vm5, %v6280_v32 }
0x1754   :  { %5209 = vmatprep.subr.mxu0 %v5806_v5  ;;  %5214 = vmatprep.subr.mxu1 %v5806_v5 }
0x1755   :  { %5210 = vmatpush3.msra.mxu0 %v6285_v33  ;;  %5211 = vmatprep.mubr.msk.f32.mxu0 %vm5807_vm6, %v5806_v5 }
0x1756   :  { %5215 = vmatpush3.msk.msra.mxu1 %vm443_vm5, %v6290_v34  ;;  %5218 = vmatprep.mubr.msk.f32.mxu1 %vm5807_vm6, %v5806_v5 }
0x1757   :  { %5216 = vmatprep.subr.mxu1 %v5806_v5  ;;  %5221 = vmatprep.subr.mxu0 %v5806_v5 }
0x1758   :  { %5217 = vmatpush3.msra.mxu1 %v6297_v35 }
0x1759   :  { %5228 = vmatprep.subr.mxu1 %v5806_v5 }
0x1806   :  { %v5171_v36 = vpop.f32.mrf.mxu0 }
0x1808   :  { %v2219_v37 = vpop.f32.mrf.mxu0 }
0x1809   :  { %v5178_v38 = vpop.f32.mrf.mxu1 }
0x180a   :  { %v2309_v40 = vadd.f32 %v5178_v38, %v5171_v36  ;;  %v5185_v41 = vpop.f32.mrf.mxu0 }
0x180b   :  { %v2303_v42 = vpop.f32.mrf.mxu1 }
0x180c   :  { %v2320_v43 = vadd.f32 %v4860_v39, %v2309_v40  ;;  %v2304_v44 = vadd.f32 %v2303_v42, %v2219_v37  ;;  %v2396_v48 = vpop.f32.mrf.mxu0 }
0x180d   :  { %v5192_v45 = vpop.f32.mrf.mxu1 }
0x180e   :  { %2322 = vst.msk [vmem:[#allocation2 + $0x8] sm:$0xff] %vm343_vm8, %v2320_v43  ;;  %v2319_v47 = vadd.f32 %v4860_v39, %v2304_v44  ;;  %v2480_v49 = vadd.f32 %v5192_v45, %v5185_v41 }
0x180f   :  { %v2474_v50 = vpop.f32.mrf.mxu1 }
0x1810   :  { %2321 = vst.msk [vmem:[#allocation2] sm:$0xff] %vm343_vm8, %v2319_v47  ;;  %v2491_v51 = vadd.f32 %v4867_v46, %v2480_v49  ;;  %v2475_v52 = vadd.f32 %v2474_v50, %v2396_v48  ;;  %v2568_v53 = vpop.f32.mrf.mxu0 }
0x1812   :  { %2493 = vst.msk [vmem:[#allocation3 + $0x8] sm:$0xff] %vm343_vm8, %v2491_v51  ;;  %v2490_v54 = vadd.f32 %v4867_v46, %v2475_v52  ;;  %v5199_v55 = vpop.f32.mrf.mxu0 }
0x1813   :  { %v2643_v56 = vpop.f32.mrf.mxu1 }
0x1814   :  { %2492 = vst.msk [vmem:[#allocation3] sm:$0xff] %vm343_vm8, %v2490_v54 }
0x1815   :  { %v5206_v57 = vpop.f32.mrf.mxu1 }
0x1817   :  { %v2498_v58 = vld [vmem:[#allocation2] sm:$0x3]  ;;  %v2776_v30 = vld [vmem:[#allocation2 + $0x2] sm:$0x3] }
0x1818   :  { %v2572_v59 = vadd.f32 %v2568_v53, %v2498_v58 }
0x1819   :  { %v2573_v60 = vld [vmem:[#allocation3 + $0xe] sm:$0x3]  ;;  %v2852_v38 = vld [vmem:[#allocation3 + $0xc] sm:$0x3] }
0x181a   :  { %5456 = vtanh.f32 %v2572_v59  ;;  %v2647_v61 = vadd.f32 %v2643_v56, %v2573_v60  ;;  %v4870_v0 = vmul.f32 -1.442695, %v2572_v59 }
0x181c   :  { %5458 = vtanh.f32 %v2647_v61  ;;  %v4871_v1 = vmul.f32 -1.442695, %v2647_v61 }
0x181d   :  { %5460 = vpow2.f32 %v4870_v0 }
0x181e   :  { %5462 = vpow2.f32 %v4871_v1 }
0x1827   :  { %v5457_v62 = vpop.eup %5456 }
0x1828   :  { %2657 = vrot.lane.b32.xlu0 %v5457_v62, %s5808_s4 }
0x1829   :  { %v5459_v63 = vpop.eup %5458 }
0x182a   :  { %2681 = vrot.lane.b32.xlu1 %v5459_v63, %s5808_s4  ;;  %v5461_v2 = vpop.eup %5460 }
0x182b   :  { %v5463_v3 = vpop.eup %5462  ;;  %v2651_v4 = vadd.f32 1.0, %v5461_v2 }
0x182c   :  { %v2675_v7 = vadd.f32 1.0, %v5463_v3 }
0x182d   :  { %5464 = vrcp.f32 %v2651_v4 }
0x182e   :  { %5466 = vrcp.f32 %v2675_v7 }
0x183a   :  { %v5465_v8 = vpop.eup %5464 }
0x183b   :  { %v5467_v12 = vpop.eup %5466  ;;  %v2655_v16 = vmul.f32 0.0, %v5465_v8 }
0x183c   :  { %v2679_v14 = vmul.f32 0.0, %v5467_v12 }
0x189a   :  { %v2658_v18 = vpop.permute.xlu0 %2657 }
0x189b   :  { %v2660_v10 = vmul.f32 %v5465_v8, %v2658_v18 }
0x189c   :  { %v2682_v19 = vpop.permute.xlu1 %2681 }
0x189d   :  { %2662 = vrot.lane.b32.xlu0 %v2660_v10, %s5809_s19  ;;  %v2684_v13 = vmul.f32 %v5467_v12, %v2682_v19  ;;  %v3130_v19 = vld [vmem:[#allocation3 + $0xa] sm:$0x3] }
0x189f   :  { %2686 = vrot.lane.b32.xlu1 %v2684_v13, %s5809_s19 }
0x190f   :  { %v2663_v17 = vpop.permute.xlu0 %2662 }
0x1910   :  { %v2665_v20 = vadd.f32 %v2663_v17, %v2655_v16 }
0x1911   :  { %v2687_v21 = vpop.permute.xlu1 %2686 }
0x1912   :  { %5468 = vtanh.f32 %v2665_v20  ;;  %v2689_v22 = vadd.f32 %v2687_v21, %v2679_v14 }
0x1914   :  { %5470 = vtanh.f32 %v2689_v22 }
0x191f   :  { %v5469_v15 = vpop.eup %5468 }
0x1920   :  { %2668 = vrot.lane.b32.xlu0 %v5469_v15, %s5809_s19 }
0x1921   :  { %v5471_v23 = vpop.eup %5470 }
0x1922   :  { %2692 = vrot.lane.b32.xlu1 %v5471_v23, %s5809_s19 }
0x1992   :  { %v2669_v24 = vpop.permute.xlu0 %2668 }
0x1993   :  { %v6336_v25 = vmul.f32 %v5465_v8, %v2669_v24  ;;  %v3054_v8 = vld [vmem:[#allocation2 + $0x4] sm:$0x3] }
0x1994   :  { %v2693_v26 = vpop.permute.xlu1 %2692 }
0x1995   :  { %2777 = vrot.lane.b32.xlu0 %v6336_v25, %s5810_s11  ;;  %v6340_v27 = vmul.f32 %v5467_v12, %v2693_v26 }
0x1997   :  { %2853 = vrot.lane.b32.xlu1 %v6340_v27, %s5810_s11 }
0x1a07   :  { %v2778_v28 = vpop.permute.xlu0 %2777 }
0x1a08   :  { %5212 = vmatmul.mubr.msk.f32.vlgmr.msra.gmra.mxu0 %vm439_vm10, %v2778_v28 }
0x1a09   :  { %5222 = vmatpush3.msk.msra.mxu0 %vm443_vm5, %v6280_v32  ;;  %5225 = vmatprep.mubr.msk.f32.mxu0 %vm5807_vm6, %v5806_v5  ;;  %v2854_v29 = vpop.permute.xlu1 %2853 }
0x1a0a   :  { %5223 = vmatprep.subr.mxu0 %v5806_v5  ;;  %5219 = vmatmul.mubr.msk.f32.vlgmr.msra.gmra.mxu1 %vm439_vm10, %v2854_v29 }
0x1a0b   :  { %5224 = vmatpush3.msra.mxu0 %v6285_v33  ;;  %5229 = vmatpush3.msk.msra.mxu1 %vm443_vm5, %v6290_v34 }
0x1a0c   :  { %5232 = vmatprep.mubr.msk.f32.mxu1 %vm5807_vm6, %v5806_v5  ;;  %5230 = vmatprep.subr.mxu1 %v5806_v5 }
0x1a0d   :  { %5235 = vmatprep.subr.mxu0 %v5806_v5  ;;  %5231 = vmatpush3.msra.mxu1 %v6297_v35 }
0x1a0e   :  { %5242 = vmatprep.subr.mxu1 %v5806_v5 }
0x1ac8   :  { %v2847_v31 = vpop.f32.mrf.mxu0 }
0x1ac9   :  { %v2851_v36 = vadd.f32 %v2847_v31, %v2776_v30 }
0x1aca   :  { %v5213_v37 = vpop.f32.mrf.mxu0  ;;  %v2923_v39 = vpop.f32.mrf.mxu1 }
0x1acb   :  { %5472 = vtanh.f32 %v2851_v36  ;;  %v2927_v40 = vadd.f32 %v2923_v39, %v2852_v38  ;;  %v4876_v44 = vmul.f32 -1.442695, %v2851_v36 }
0x1acc   :  { %v5220_v41 = vpop.f32.mrf.mxu1 }
0x1acd   :  { %5474 = vtanh.f32 %v2927_v40  ;;  %v4877_v45 = vmul.f32 -1.442695, %v2927_v40 }
0x1ace   :  { %5476 = vpow2.f32 %v4876_v44 }
0x1acf   :  { %5478 = vpow2.f32 %v4877_v45 }
0x1ad8   :  { %v5473_v42 = vpop.eup %5472 }
0x1ad9   :  { %2937 = vrot.lane.b32.xlu0 %v5473_v42, %s5808_s4 }
0x1ada   :  { %v5475_v43 = vpop.eup %5474 }
0x1adb   :  { %2961 = vrot.lane.b32.xlu1 %v5475_v43, %s5808_s4  ;;  %v5477_v46 = vpop.eup %5476 }
0x1adc   :  { %v5479_v47 = vpop.eup %5478  ;;  %v2931_v48 = vadd.f32 1.0, %v5477_v46 }
0x1add   :  { %v2955_v49 = vadd.f32 1.0, %v5479_v47 }
0x1ade   :  { %5480 = vrcp.f32 %v2931_v48 }
0x1adf   :  { %5482 = vrcp.f32 %v2955_v49 }
0x1aeb   :  { %v5481_v50 = vpop.eup %5480 }
0x1aec   :  { %v5483_v53 = vpop.eup %5482  ;;  %v2935_v56 = vmul.f32 %v5481_v50, %v2665_v20 }
0x1aed   :  { %v2959_v59 = vmul.f32 %v5483_v53, %v2689_v22 }
0x1b4b   :  { %v2938_v51 = vpop.permute.xlu0 %2937 }
0x1b4c   :  { %v2940_v52 = vmul.f32 %v5481_v50, %v2938_v51 }
0x1b4d   :  { %v2962_v54 = vpop.permute.xlu1 %2961 }
0x1b4e   :  { %2942 = vrot.lane.b32.xlu0 %v2940_v52, %s5809_s19  ;;  %v2964_v55 = vmul.f32 %v5483_v53, %v2962_v54  ;;  %v3332_v52 = vld [vmem:[#allocation2 + $0x6] sm:$0x3] }
0x1b50   :  { %2966 = vrot.lane.b32.xlu1 %v2964_v55, %s5809_s19 }
0x1bc0   :  { %v2943_v57 = vpop.permute.xlu0 %2942 }
0x1bc1   :  { %v2945_v58 = vadd.f32 %v2943_v57, %v2935_v56  ;;  %v3408_v56 = vld [vmem:[#allocation3 + $0x8] sm:$0x3] }
0x1bc2   :  { %v2967_v60 = vpop.permute.xlu1 %2966 }
0x1bc3   :  { %5484 = vtanh.f32 %v2945_v58  ;;  %v2969_v61 = vadd.f32 %v2967_v60, %v2959_v59 }
0x1bc5   :  { %5486 = vtanh.f32 %v2969_v61 }
0x1bd0   :  { %v5485_v62 = vpop.eup %5484 }
0x1bd1   :  { %2948 = vrot.lane.b32.xlu0 %v5485_v62, %s5809_s19 }
0x1bd2   :  { %v5487_v63 = vpop.eup %5486 }
0x1bd3   :  { %2972 = vrot.lane.b32.xlu1 %v5487_v63, %s5809_s19 }
0x1c43   :  { %v2949_v0 = vpop.permute.xlu0 %2948 }
0x1c44   :  { %v6366_v1 = vmul.f32 %v5481_v50, %v2949_v0 }
0x1c45   :  { %v2973_v2 = vpop.permute.xlu1 %2972 }
0x1c46   :  { %3055 = vrot.lane.b32.xlu0 %v6366_v1, %s5810_s11  ;;  %v6370_v3 = vmul.f32 %v5483_v53, %v2973_v2 }
0x1c48   :  { %3131 = vrot.lane.b32.xlu1 %v6370_v3, %s5810_s11 }
0x1cb8   :  { %v3056_v4 = vpop.permute.xlu0 %3055 }
0x1cb9   :  { %5226 = vmatmul.mubr.msk.f32.vlgmr.msra.gmra.mxu0 %vm439_vm10, %v3056_v4 }
0x1cba   :  { %5236 = vmatpush3.msk.msra.mxu0 %vm443_vm5, %v6280_v32  ;;  %5239 = vmatprep.mubr.msk.f32.mxu0 %vm5807_vm6, %v5806_v5  ;;  %v3132_v7 = vpop.permute.xlu1 %3131 }
0x1cbb   :  { %5237 = vmatprep.subr.mxu0 %v5806_v5  ;;  %5233 = vmatmul.mubr.msk.f32.vlgmr.msra.gmra.mxu1 %vm439_vm10, %v3132_v7 }
0x1cbc   :  { %5238 = vmatpush3.msra.mxu0 %v6285_v33  ;;  %5243 = vmatpush3.msk.msra.mxu1 %vm443_vm5, %v6290_v34 }
0x1cbd   :  { %5246 = vmatprep.mubr.msk.f32.mxu1 %vm5807_vm6, %v5806_v5  ;;  %5244 = vmatprep.subr.mxu1 %v5806_v5 }
0x1cbe   :  { %5249 = vmatprep.subr.mxu0 %v5806_v5  ;;  %5245 = vmatpush3.msra.mxu1 %v6297_v35 }
0x1cbf   :  { %5256 = vmatprep.subr.mxu1 %v5806_v5 }
0x1d79   :  { %v3125_v18 = vpop.f32.mrf.mxu0 }
0x1d7a   :  { %v3129_v10 = vadd.f32 %v3125_v18, %v3054_v8 }
0x1d7b   :  { %v5227_v12 = vpop.f32.mrf.mxu0  ;;  %v3201_v13 = vpop.f32.mrf.mxu1 }
0x1d7c   :  { %5488 = vtanh.f32 %v3129_v10  ;;  %v3205_v16 = vadd.f32 %v3201_v13, %v3130_v19  ;;  %v4882_v21 = vmul.f32 -1.442695, %v3129_v10 }
0x1d7d   :  { %v5234_v17 = vpop.f32.mrf.mxu1 }
0x1d7e   :  { %5490 = vtanh.f32 %v3205_v16  ;;  %v4883_v22 = vmul.f32 -1.442695, %v3205_v16 }
0x1d7f   :  { %5492 = vpow2.f32 %v4882_v21 }
0x1d80   :  { %5494 = vpow2.f32 %v4883_v22 }
0x1d89   :  { %v5489_v20 = vpop.eup %5488 }
0x1d8a   :  { %3215 = vrot.lane.b32.xlu0 %v5489_v20, %s5808_s4 }
0x1d8b   :  { %v5491_v14 = vpop.eup %5490 }
0x1d8c   :  { %3239 = vrot.lane.b32.xlu1 %v5491_v14, %s5808_s4  ;;  %v5493_v15 = vpop.eup %5492 }
0x1d8d   :  { %v5495_v23 = vpop.eup %5494  ;;  %v3209_v24 = vadd.f32 1.0, %v5493_v15 }
0x1d8e   :  { %v3233_v26 = vadd.f32 1.0, %v5495_v23 }
0x1d8f   :  { %5496 = vrcp.f32 %v3209_v24 }
0x1d90   :  { %5498 = vrcp.f32 %v3233_v26 }
0x1d9c   :  { %v5497_v28 = vpop.eup %5496 }
0x1d9d   :  { %v5499_v31 = vpop.eup %5498  ;;  %v3213_v38 = vmul.f32 %v5497_v28, %v2945_v58 }
0x1d9e   :  { %v3237_v41 = vmul.f32 %v5499_v31, %v2969_v61 }
0x1dfc   :  { %v3216_v29 = vpop.permute.xlu0 %3215 }
0x1dfd   :  { %v3218_v30 = vmul.f32 %v5497_v28, %v3216_v29 }
0x1dfe   :  { %v3240_v36 = vpop.permute.xlu1 %3239 }
0x1dff   :  { %3220 = vrot.lane.b32.xlu0 %v3218_v30, %s5809_s19  ;;  %v3242_v37 = vmul.f32 %v5499_v31, %v3240_v36  ;;  %v3610_v36 = vld [vmem:[#allocation2 + $0x8] sm:$0x3] }
0x1e01   :  { %3244 = vrot.lane.b32.xlu1 %v3242_v37, %s5809_s19 }
0x1e71   :  { %v3221_v39 = vpop.permute.xlu0 %3220 }
0x1e72   :  { %v3223_v40 = vadd.f32 %v3221_v39, %v3213_v38 }
0x1e73   :  { %v3245_v42 = vpop.permute.xlu1 %3244 }
0x1e74   :  { %5500 = vtanh.f32 %v3223_v40  ;;  %v3247_v43 = vadd.f32 %v3245_v42, %v3237_v41 }
0x1e76   :  { %5502 = vtanh.f32 %v3247_v43 }
0x1e81   :  { %v5501_v44 = vpop.eup %5500 }
0x1e82   :  { %3226 = vrot.lane.b32.xlu0 %v5501_v44, %s5809_s19 }
0x1e83   :  { %v5503_v45 = vpop.eup %5502 }
0x1e84   :  { %3250 = vrot.lane.b32.xlu1 %v5503_v45, %s5809_s19 }
0x1ef4   :  { %v3227_v46 = vpop.permute.xlu0 %3226 }
0x1ef5   :  { %v6396_v47 = vmul.f32 %v5497_v28, %v3227_v46 }
0x1ef6   :  { %v3251_v48 = vpop.permute.xlu1 %3250 }
0x1ef7   :  { %3333 = vrot.lane.b32.xlu0 %v6396_v47, %s5810_s11  ;;  %v6400_v49 = vmul.f32 %v5499_v31, %v3251_v48 }
0x1ef9   :  { %3409 = vrot.lane.b32.xlu1 %v6400_v49, %s5810_s11 }
0x1f69   :  { %v3334_v50 = vpop.permute.xlu0 %3333 }
0x1f6a   :  { %5240 = vmatmul.mubr.msk.f32.vlgmr.msra.gmra.mxu0 %vm439_vm10, %v3334_v50 }
0x1f6b   :  { %5250 = vmatpush3.msk.msra.mxu0 %vm443_vm5, %v6280_v32  ;;  %5253 = vmatprep.mubr.msk.f32.mxu0 %vm5807_vm6, %v5806_v5  ;;  %v3410_v51 = vpop.permute.xlu1 %3409 }
0x1f6c   :  { %5251 = vmatprep.subr.mxu0 %v5806_v5  ;;  %5247 = vmatmul.mubr.msk.f32.vlgmr.msra.gmra.mxu1 %vm439_vm10, %v3410_v51 }
0x1f6d   :  { %5252 = vmatpush3.msra.mxu0 %v6285_v33  ;;  %5257 = vmatpush3.msk.msra.mxu1 %vm443_vm5, %v6290_v34 }
0x1f6e   :  { %5260 = vmatprep.mubr.msk.f32.mxu1 %vm5807_vm6, %v5806_v5  ;;  %5258 = vmatprep.subr.mxu1 %v5806_v5 }
0x1f6f   :  { %5263 = vmatprep.subr.mxu0 %v5806_v5  ;;  %5259 = vmatpush3.msra.mxu1 %v6297_v35 }
0x1f70   :  { %5270 = vmatprep.subr.mxu1 %v5806_v5 }
0x202a   :  { %v3403_v53 = vpop.f32.mrf.mxu0 }
0x202b   :  { %v3407_v54 = vadd.f32 %v3403_v53, %v3332_v52 }
0x202c   :  { %v5241_v55 = vpop.f32.mrf.mxu0  ;;  %v3479_v57 = vpop.f32.mrf.mxu1 }
0x202d   :  { %5504 = vtanh.f32 %v3407_v54  ;;  %v3483_v58 = vadd.f32 %v3479_v57, %v3408_v56  ;;  %v4888_v62 = vmul.f32 -1.442695, %v3407_v54 }
0x202e   :  { %v5248_v59 = vpop.f32.mrf.mxu1 }
0x202f   :  { %5506 = vtanh.f32 %v3483_v58  ;;  %v4889_v63 = vmul.f32 -1.442695, %v3483_v58 }
0x2030   :  { %5508 = vpow2.f32 %v4888_v62 }
0x2031   :  { %5510 = vpow2.f32 %v4889_v63 }
0x203a   :  { %v5505_v60 = vpop.eup %5504 }
0x203b   :  { %3493 = vrot.lane.b32.xlu0 %v5505_v60, %s5808_s4 }
0x203c   :  { %v5507_v61 = vpop.eup %5506 }
0x203d   :  { %3517 = vrot.lane.b32.xlu1 %v5507_v61, %s5808_s4  ;;  %v5509_v0 = vpop.eup %5508 }
0x203e   :  { %v5511_v2 = vpop.eup %5510  ;;  %v3487_v4 = vadd.f32 1.0, %v5509_v0 }
0x203f   :  { %v3511_v7 = vadd.f32 1.0, %v5511_v2 }
0x2040   :  { %5512 = vrcp.f32 %v3487_v4 }
0x2041   :  { %5514 = vrcp.f32 %v3511_v7 }
0x204d   :  { %v5513_v8 = vpop.eup %5512 }
0x204e   :  { %v5515_v12 = vpop.eup %5514  ;;  %v3491_v16 = vmul.f32 %v5513_v8, %v3223_v40  ;;  %v3686_v40 = vld [vmem:[#allocation3 + $0x6] sm:$0x3] }
0x204f   :  { %v3515_v14 = vmul.f32 %v5515_v12, %v3247_v43 }
0x20ad   :  { %v3494_v18 = vpop.permute.xlu0 %3493 }
0x20ae   :  { %v3496_v10 = vmul.f32 %v5513_v8, %v3494_v18 }
0x20af   :  { %v3518_v19 = vpop.permute.xlu1 %3517 }
0x20b0   :  { %3498 = vrot.lane.b32.xlu0 %v3496_v10, %s5809_s19  ;;  %v3520_v13 = vmul.f32 %v5515_v12, %v3518_v19 }
0x20b2   :  { %3522 = vrot.lane.b32.xlu1 %v3520_v13, %s5809_s19 }
0x2122   :  { %v3499_v17 = vpop.permute.xlu0 %3498 }
0x2123   :  { %v3501_v20 = vadd.f32 %v3499_v17, %v3491_v16  ;;  %v3888_v16 = vld [vmem:[#allocation2 + $0xa] sm:$0x3] }
0x2124   :  { %v3523_v21 = vpop.permute.xlu1 %3522 }
0x2125   :  { %5516 = vtanh.f32 %v3501_v20  ;;  %v3525_v22 = vadd.f32 %v3523_v21, %v3515_v14  ;;  %v3964_v21 = vld [vmem:[#allocation3 + $0x4] sm:$0x3] }
0x2127   :  { %5518 = vtanh.f32 %v3525_v22 }
0x2132   :  { %v5517_v15 = vpop.eup %5516 }
0x2133   :  { %3504 = vrot.lane.b32.xlu0 %v5517_v15, %s5809_s19 }
0x2134   :  { %v5519_v23 = vpop.eup %5518 }
0x2135   :  { %3528 = vrot.lane.b32.xlu1 %v5519_v23, %s5809_s19 }
0x21a5   :  { %v3505_v24 = vpop.permute.xlu0 %3504 }
0x21a6   :  { %v6426_v26 = vmul.f32 %v5513_v8, %v3505_v24 }
0x21a7   :  { %v3529_v28 = vpop.permute.xlu1 %3528 }
0x21a8   :  { %3611 = vrot.lane.b32.xlu0 %v6426_v26, %s5810_s11  ;;  %v6430_v29 = vmul.f32 %v5515_v12, %v3529_v28 }
0x21aa   :  { %3687 = vrot.lane.b32.xlu1 %v6430_v29, %s5810_s11 }
0x221a   :  { %v3612_v30 = vpop.permute.xlu0 %3611 }
0x221b   :  { %5254 = vmatmul.mubr.msk.f32.vlgmr.msra.gmra.mxu0 %vm439_vm10, %v3612_v30 }
0x221c   :  { %5264 = vmatpush3.msk.msra.mxu0 %vm443_vm5, %v6280_v32  ;;  %5267 = vmatprep.mubr.msk.f32.mxu0 %vm5807_vm6, %v5806_v5  ;;  %v3688_v31 = vpop.permute.xlu1 %3687 }
0x221d   :  { %5265 = vmatprep.subr.mxu0 %v5806_v5  ;;  %5261 = vmatmul.mubr.msk.f32.vlgmr.msra.gmra.mxu1 %vm439_vm10, %v3688_v31 }
0x221e   :  { %5266 = vmatpush3.msra.mxu0 %v6285_v33  ;;  %5271 = vmatpush3.msk.msra.mxu1 %vm443_vm5, %v6290_v34 }
0x221f   :  { %5274 = vmatprep.mubr.msk.f32.mxu1 %vm5807_vm6, %v5806_v5  ;;  %5272 = vmatprep.subr.mxu1 %v5806_v5 }
0x2220   :  { %5277 = vmatprep.subr.mxu0 %v5806_v5  ;;  %5273 = vmatpush3.msra.mxu1 %v6297_v35 }
0x2221   :  { %5284 = vmatprep.subr.mxu1 %v5806_v5 }
0x22db   :  { %v3681_v37 = vpop.f32.mrf.mxu0 }
0x22dc   :  { %v3685_v38 = vadd.f32 %v3681_v37, %v3610_v36 }
0x22dd   :  { %v5255_v39 = vpop.f32.mrf.mxu0  ;;  %v3757_v41 = vpop.f32.mrf.mxu1 }
0x22de   :  { %5520 = vtanh.f32 %v3685_v38  ;;  %v3761_v42 = vadd.f32 %v3757_v41, %v3686_v40  ;;  %v4894_v46 = vmul.f32 -1.442695, %v3685_v38 }
0x22df   :  { %v5262_v43 = vpop.f32.mrf.mxu1 }
0x22e0   :  { %5522 = vtanh.f32 %v3761_v42  ;;  %v4895_v48 = vmul.f32 -1.442695, %v3761_v42 }
0x22e1   :  { %5524 = vpow2.f32 %v4894_v46 }
0x22e2   :  { %5526 = vpow2.f32 %v4895_v48 }
0x22eb   :  { %v5521_v44 = vpop.eup %5520 }
0x22ec   :  { %3771 = vrot.lane.b32.xlu0 %v5521_v44, %s5808_s4 }
0x22ed   :  { %v5523_v45 = vpop.eup %5522 }
0x22ee   :  { %3795 = vrot.lane.b32.xlu1 %v5523_v45, %s5808_s4  ;;  %v5525_v50 = vpop.eup %5524 }
0x22ef   :  { %v5527_v51 = vpop.eup %5526  ;;  %v3765_v52 = vadd.f32 1.0, %v5525_v50 }
0x22f0   :  { %v3789_v53 = vadd.f32 1.0, %v5527_v51 }
0x22f1   :  { %5528 = vrcp.f32 %v3765_v52 }
0x22f2   :  { %5530 = vrcp.f32 %v3789_v53 }
0x22fe   :  { %v5529_v54 = vpop.eup %5528 }
0x22ff   :  { %v5531_v57 = vpop.eup %5530  ;;  %v3769_v60 = vmul.f32 %v5529_v54, %v3501_v20 }
0x2300   :  { %v3793_v63 = vmul.f32 %v5531_v57, %v3525_v22 }
0x235e   :  { %v3772_v55 = vpop.permute.xlu0 %3771 }
0x235f   :  { %v3774_v56 = vmul.f32 %v5529_v54, %v3772_v55 }
0x2360   :  { %v3796_v58 = vpop.permute.xlu1 %3795 }
0x2361   :  { %3776 = vrot.lane.b32.xlu0 %v3774_v56, %s5809_s19  ;;  %v3798_v59 = vmul.f32 %v5531_v57, %v3796_v58 }
0x2363   :  { %3800 = vrot.lane.b32.xlu1 %v3798_v59, %s5809_s19 }
0x23d3   :  { %v3777_v61 = vpop.permute.xlu0 %3776 }
0x23d4   :  { %v3779_v62 = vadd.f32 %v3777_v61, %v3769_v60 }
0x23d5   :  { %v3801_v0 = vpop.permute.xlu1 %3800 }
0x23d6   :  { %5532 = vtanh.f32 %v3779_v62  ;;  %v3803_v2 = vadd.f32 %v3801_v0, %v3793_v63 }
0x23d8   :  { %5534 = vtanh.f32 %v3803_v2 }
0x23e3   :  { %v5533_v4 = vpop.eup %5532 }
0x23e4   :  { %3782 = vrot.lane.b32.xlu0 %v5533_v4, %s5809_s19 }
0x23e5   :  { %v5535_v7 = vpop.eup %5534 }
0x23e6   :  { %3806 = vrot.lane.b32.xlu1 %v5535_v7, %s5809_s19 }
0x2456   :  { %v3783_v8 = vpop.permute.xlu0 %3782 }
0x2457   :  { %v6456_v18 = vmul.f32 %v5529_v54, %v3783_v8 }
0x2458   :  { %v3807_v10 = vpop.permute.xlu1 %3806 }
0x2459   :  { %3889 = vrot.lane.b32.xlu0 %v6456_v18, %s5810_s11  ;;  %v6460_v12 = vmul.f32 %v5531_v57, %v3807_v10 }
0x245b   :  { %3965 = vrot.lane.b32.xlu1 %v6460_v12, %s5810_s11 }
0x24cb   :  { %v3890_v19 = vpop.permute.xlu0 %3889 }
0x24cc   :  { %5268 = vmatmul.mubr.msk.f32.vlgmr.msra.gmra.mxu0 %vm439_vm10, %v3890_v19 }
0x24cd   :  { %5278 = vmatpush3.msk.msra.mxu0 %vm443_vm5, %v6280_v32  ;;  %5281 = vmatprep.mubr.msk.f32.mxu0 %vm5807_vm6, %v5806_v5  ;;  %v3966_v13 = vpop.permute.xlu1 %3965 }
0x24ce   :  { %5279 = vmatprep.subr.mxu0 %v5806_v5  ;;  %5275 = vmatmul.mubr.msk.f32.vlgmr.msra.gmra.mxu1 %vm439_vm10, %v3966_v13 }
0x24cf   :  { %5280 = vmatpush3.msra.mxu0 %v6285_v33  ;;  %5285 = vmatpush3.msk.msra.mxu1 %vm443_vm5, %v6290_v34 }
0x24d0   :  { %5288 = vmatprep.mubr.msk.f32.mxu1 %vm5807_vm6, %v5806_v5  ;;  %5286 = vmatprep.subr.mxu1 %v5806_v5 }
0x24d1   :  { %5291 = vmatprep.subr.mxu0 %v5806_v5  ;;  %5287 = vmatpush3.msra.mxu1 %v6297_v35 }
0x24d2   :  { %5298 = vmatprep.subr.mxu1 %v5806_v5 }
0x258c   :  { %v3959_v17 = vpop.f32.mrf.mxu0 }
0x258d   :  { %v3963_v20 = vadd.f32 %v3959_v17, %v3888_v16 }
0x258e   :  { %v5269_v14 = vpop.f32.mrf.mxu0  ;;  %v4035_v22 = vpop.f32.mrf.mxu1 }
0x258f   :  { %5536 = vtanh.f32 %v3963_v20  ;;  %v4039_v15 = vadd.f32 %v4035_v22, %v3964_v21  ;;  %v4900_v30 = vmul.f32 -1.442695, %v3963_v20 }
0x2590   :  { %v5276_v23 = vpop.f32.mrf.mxu1 }
0x2591   :  { %5538 = vtanh.f32 %v4039_v15  ;;  %v4901_v31 = vmul.f32 -1.442695, %v4039_v15 }
0x2592   :  { %5540 = vpow2.f32 %v4900_v30 }
0x2593   :  { %5542 = vpow2.f32 %v4901_v31 }
0x259c   :  { %v5537_v24 = vpop.eup %5536 }
0x259d   :  { %4049 = vrot.lane.b32.xlu0 %v5537_v24, %s5808_s4 }
0x259e   :  { %v5539_v28 = vpop.eup %5538 }
0x259f   :  { %4073 = vrot.lane.b32.xlu1 %v5539_v28, %s5808_s4  ;;  %v5541_v36 = vpop.eup %5540 }
0x25a0   :  { %v5543_v37 = vpop.eup %5542  ;;  %v4043_v38 = vadd.f32 1.0, %v5541_v36 }
0x25a1   :  { %v4067_v39 = vadd.f32 1.0, %v5543_v37 }
0x25a2   :  { %5544 = vrcp.f32 %v4043_v38 }
0x25a3   :  { %5546 = vrcp.f32 %v4067_v39 }
0x25af   :  { %v5545_v40 = vpop.eup %5544 }
0x25b0   :  { %v5547_v43 = vpop.eup %5546  ;;  %v4047_v46 = vmul.f32 %v5545_v40, %v3779_v62 }
0x25b1   :  { %v4071_v51 = vmul.f32 %v5547_v43, %v3803_v2  ;;  %v4242_v2 = vld [vmem:[#allocation3 + $0x2] sm:$0x3] }
0x260f   :  { %v4050_v41 = vpop.permute.xlu0 %4049 }
0x2610   :  { %v4052_v42 = vmul.f32 %v5545_v40, %v4050_v41 }
0x2611   :  { %v4074_v44 = vpop.permute.xlu1 %4073 }
0x2612   :  { %4054 = vrot.lane.b32.xlu0 %v4052_v42, %s5809_s19  ;;  %v4076_v45 = vmul.f32 %v5547_v43, %v4074_v44 }
0x2614   :  { %4078 = vrot.lane.b32.xlu1 %v4076_v45, %s5809_s19  ;;  %v4444_v45 = vld [vmem:[#allocation2 + $0xe] sm:$0x3] }
0x2684   :  { %v4055_v48 = vpop.permute.xlu0 %4054 }
0x2685   :  { %v4057_v50 = vadd.f32 %v4055_v48, %v4047_v46 }
0x2686   :  { %v4079_v52 = vpop.permute.xlu1 %4078 }
0x2687   :  { %5548 = vtanh.f32 %v4057_v50  ;;  %v4081_v53 = vadd.f32 %v4079_v52, %v4071_v51  ;;  %v4520_v51 = vld [vmem:[#allocation3] sm:$0x3] }
0x2689   :  { %5550 = vtanh.f32 %v4081_v53 }
0x2694   :  { %v5549_v54 = vpop.eup %5548 }
0x2695   :  { %4060 = vrot.lane.b32.xlu0 %v5549_v54, %s5809_s19 }
0x2696   :  { %v5551_v55 = vpop.eup %5550 }
0x2697   :  { %4084 = vrot.lane.b32.xlu1 %v5551_v55, %s5809_s19 }
0x2707   :  { %v4061_v56 = vpop.permute.xlu0 %4060 }
0x2708   :  { %v6486_v57 = vmul.f32 %v5545_v40, %v4061_v56 }
0x2709   :  { %v4085_v58 = vpop.permute.xlu1 %4084 }
0x270a   :  { %4167 = vrot.lane.b32.xlu0 %v6486_v57, %s5810_s11  ;;  %v6490_v59 = vmul.f32 %v5547_v43, %v4085_v58 }
0x270c   :  { %4243 = vrot.lane.b32.xlu1 %v6490_v59, %s5810_s11 }
0x277c   :  { %v4168_v60 = vpop.permute.xlu0 %4167 }
0x277d   :  { %5282 = vmatmul.mubr.msk.f32.vlgmr.msra.gmra.mxu0 %vm439_vm10, %v4168_v60 }
0x277e   :  { %5292 = vmatpush3.msk.msra.mxu0 %vm443_vm5, %v6280_v32  ;;  %5295 = vmatprep.mubr.msk.f32.mxu0 %vm5807_vm6, %v5806_v5  ;;  %v4244_v61 = vpop.permute.xlu1 %4243  ;;  %v4166_v32 = vld [vmem:[#allocation2 + $0xc] sm:$0x3] }
0x277f   :  { %5293 = vmatprep.subr.mxu0 %v5806_v5  ;;  %5289 = vmatmul.mubr.msk.f32.vlgmr.msra.gmra.mxu1 %vm439_vm10, %v4244_v61 }
0x2780   :  { %5294 = vmatpush3.msra.mxu0 %v6285_v33  ;;  %5299 = vmatpush3.msk.msra.mxu1 %vm443_vm5, %v6290_v34 }
0x2781   :  { %5302 = vmatprep.mubr.msk.f32.mxu1 %vm5807_vm6, %v5806_v5  ;;  %5300 = vmatprep.subr.mxu1 %v5806_v5 }
0x2782   :  { %5301 = vmatpush3.msra.mxu1 %v6297_v35 }
0x283d   :  { %v4237_v62 = vpop.f32.mrf.mxu0 }
0x283e   :  { %v4241_v63 = vadd.f32 %v4237_v62, %v4166_v32 }
0x283f   :  { %v5283_v0 = vpop.f32.mrf.mxu0  ;;  %v4313_v4 = vpop.f32.mrf.mxu1 }
0x2840   :  { %5552 = vtanh.f32 %v4241_v63  ;;  %v4317_v7 = vadd.f32 %v4313_v4, %v4242_v2  ;;  %v4906_v10 = vmul.f32 -1.442695, %v4241_v63  ;;  %v5811_v0 = vmov 1966171168  }
0x2841   :  { %v5290_v8 = vpop.f32.mrf.mxu1  ;;  %v2698_v2 = vunpack.c.l.s4 %v5811_v0 }
0x2842   :  { %5554 = vtanh.f32 %v4317_v7  ;;  %v4907_v5 = vmul.f32 -1.442695, %v4317_v7  ;;  %v2701_v7 = vshrl.u32 %v145_v6, 7 }
0x2843   :  { %5556 = vpow2.f32 %v4906_v10  ;;  %v2699_v4 = vunpack.c.0.s8 %v2698_v2 }
0x2844   :  { %5558 = vpow2.f32 %v4907_v5 }
0x2845   :  { %v6533_v8 = vsub.s32 %v2699_v4, %v2701_v7 }
0x284d   :  { %v5553_v33 = vpop.eup %5552 }
0x284e   :  { %4327 = vrot.lane.b32.xlu0 %v5553_v33, %s5808_s4 }
0x284f   :  { %v5555_v34 = vpop.eup %5554 }
0x2850   :  { %4351 = vrot.lane.b32.xlu1 %v5555_v34, %s5808_s4  ;;  %v5557_v35 = vpop.eup %5556  ;;  %v2703_v34 = vrot.slane %v6336_v25, %v6533_v8 }
0x2851   :  { %v5559_v19 = vpop.eup %5558  ;;  %v4321_v13 = vadd.f32 1.0, %v5557_v35 }
0x2852   :  { %v4345_v16 = vadd.f32 1.0, %v5559_v19  ;;  %v2711_v6 = vrot.slane %v2703_v34, %v6533_v8 }
0x2853   :  { %5560 = vrcp.f32 %v4321_v13  ;;  %v2704_v13 = vcombine.high %v2703_v34, %v2703_v34 }
0x2854   :  { %5562 = vrcp.f32 %v4345_v16 }
0x2855   :  { %v2718_v25 = vrot.slane %v2704_v13, %v6533_v8  ;;  %v3817_v13 = vrot.slane %v6456_v18, %v6533_v8 }
0x2860   :  { %v5561_v17 = vpop.eup %5560 }
0x2861   :  { %v5563_v21 = vpop.eup %5562  ;;  %v4325_v23 = vmul.f32 %v5561_v17, %v4057_v50 }
0x2862   :  { %v4349_v30 = vmul.f32 %v5563_v21, %v4081_v53 }
0x28c0   :  { %v4328_v20 = vpop.permute.xlu0 %4327 }
0x28c1   :  { %v4330_v14 = vmul.f32 %v5561_v17, %v4328_v20 }
0x28c2   :  { %v4352_v22 = vpop.permute.xlu1 %4351 }
0x28c3   :  { %4332 = vrot.lane.b32.xlu0 %v4330_v14, %s5809_s19  ;;  %v4354_v15 = vmul.f32 %v5563_v21, %v4352_v22 }
0x28c5   :  { %4356 = vrot.lane.b32.xlu1 %v4354_v15, %s5809_s19 }
0x2935   :  { %v4333_v24 = vpop.permute.xlu0 %4332 }
0x2936   :  { %v6512_v28 = vadd.f32 %v4333_v24, %v4325_v23 }
0x2937   :  { %v4357_v31 = vpop.permute.xlu1 %4356 }
0x2938   :  { %5564 = vtanh.f32 %v6512_v28  ;;  %v6515_v36 = vadd.f32 %v4357_v31, %v4349_v30  ;;  %v2743_v31 = vrot.slane %v6340_v27, %v6533_v8 }
0x293a   :  { %5566 = vtanh.f32 %v6515_v36 }
0x2945   :  { %v5565_v37 = vpop.eup %5564 }
0x2946   :  { %4338 = vrot.lane.b32.xlu0 %v5565_v37, %s5809_s19  ;;  %v2744_v37 = vcombine.high %v2743_v31, %v2743_v31 }
0x2947   :  { %v5567_v38 = vpop.eup %5566 }
0x2948   :  { %4362 = vrot.lane.b32.xlu1 %v5567_v38, %s5809_s19  ;;  %v2983_v38 = vrot.slane %v6366_v1, %v6533_v8 }
0x29b8   :  { %v4339_v39 = vpop.permute.xlu0 %4338 }
0x29b9   :  { %v6520_v40 = vmul.f32 %v5561_v17, %v4339_v39  ;;  %v6544_v17 = vsub.s32 0, %v2701_v7  ;;  %v2751_v39 = vrot.slane %v2743_v31, %v6533_v8  ;;  %v3578_v7 = vrot.slane %v6430_v29, %v6533_v8 }
0x29ba   :  { %v4363_v41 = vpop.permute.xlu1 %4362 }
0x29bb   :  { %4445 = vrot.lane.b32.xlu0 %v6520_v40, %s5810_s11  ;;  %v6524_v42 = vmul.f32 %v5563_v21, %v4363_v41  ;;  %v2722_v20 = vrot.slane %v2711_v6, %v6544_v17  ;;  %v2726_v14 = vrot.slane %v2718_v25, %v6544_v17  ;;  %v2762_v27 = vrot.slane %v2751_v39, %v6544_v17 }
0x29bc   :  { %v3586_v6 = vrot.slane %v3578_v7, %v6533_v8 }
0x29bd   :  { %4521 = vrot.lane.b32.xlu1 %v6524_v42, %s5810_s11 }
0x29be   :  { %v3597_v18 = vrot.slane %v3586_v6, %v6544_v17 }
0x2a2d   :  { %v4446_v43 = vpop.permute.xlu0 %4445 }
0x2a2e   :  { %5296 = vmatmul.mubr.msk.f32.vlgmr.msra.gmra.mxu0 %vm439_vm10, %v4446_v43  ;;  %v2758_v43 = vrot.slane %v2744_v37, %v6533_v8  ;;  %v4134_v37 = vrot.slane %v6490_v59, %v6533_v8 }
0x2a2f   :  { %v4522_v44 = vpop.permute.xlu1 %4521 }
0x2a30   :  { %5303 = vmatmul.mubr.msk.f32.vlgmr.msra.gmra.mxu1 %vm439_vm10, %v4522_v44  ;;  %v2984_v44 = vcombine.high %v2983_v38, %v2983_v38 }
0x2a32   :  { %v2998_v1 = vrot.slane %v2984_v44, %v6533_v8  ;;  %v4373_v44 = vrot.slane %v6520_v40, %v6533_v8 }
0x2aee   :  { %v4515_v46 = vpop.f32.mrf.mxu0 }
0x2aef   :  { %v4519_v48 = vadd.f32 %v4515_v46, %v4444_v45  ;;  %v3022_v45 = vrot.slane %v6370_v3, %v6533_v8 }
0x2af0   :  { %v5297_v50 = vpop.f32.mrf.mxu0  ;;  %v4591_v52 = vpop.f32.mrf.mxu1 }
0x2af1   :  { %5568 = vtanh.f32 %v4519_v48  ;;  %v4595_v53 = vadd.f32 %v4591_v52, %v4520_v51  ;;  %v4912_v58 = vmul.f32 -1.442695, %v4519_v48  ;;  %v2991_v48 = vrot.slane %v2983_v38, %v6533_v8 }
0x2af2   :  { %v5304_v54 = vpop.f32.mrf.mxu1  ;;  %v3023_v50 = vcombine.high %v3022_v45, %v3022_v45  ;;  %v3261_v51 = vrot.slane %v6396_v47, %v6533_v8  ;;  %v2766_v52 = vrot.slane %v2758_v43, %v6544_v17  ;;  %v3030_v3 = vrot.slane %v3022_v45, %v6533_v8 }
0x2af3   :  { %5570 = vtanh.f32 %v4595_v53  ;;  %v4913_v60 = vmul.f32 -1.442695, %v4595_v53  ;;  %v3002_v53 = vrot.slane %v2991_v48, %v6544_v17  ;;  %v4135_v43 = vcombine.high %v4134_v37, %v4134_v37 }
0x2af4   :  { %5572 = vpow2.f32 %v4912_v58  ;;  %v3037_v54 = vrot.slane %v3023_v50, %v6533_v8  ;;  %v3006_v58 = vrot.slane %v2998_v1, %v6544_v17  ;;  %v3041_v47 = vrot.slane %v3030_v3, %v6544_v17 }
0x2af5   :  { %5574 = vpow2.f32 %v4913_v60  ;;  %v3269_v60 = vrot.slane %v3261_v51, %v6533_v8  ;;  %v4374_v48 = vcombine.high %v4373_v44, %v4373_v44  ;;  %v4412_v1 = vrot.slane %v6524_v42, %v6533_v8 }
0x2afe   :  { %v5569_v55 = vpop.eup %5568 }
0x2aff   :  { %4605 = vrot.lane.b32.xlu0 %v5569_v55, %s5808_s4  ;;  %v3262_v55 = vcombine.high %v3261_v51, %v3261_v51  ;;  %v4381_v51 = vrot.slane %v4373_v44, %v6533_v8 }
0x2b00   :  { %v5571_v56 = vpop.eup %5570 }
0x2b01   :  { %4629 = vrot.lane.b32.xlu1 %v5571_v56, %s5808_s4  ;;  %v5573_v61 = vpop.eup %5572  ;;  %v3300_v56 = vrot.slane %v6400_v49, %v6533_v8  ;;  %v3280_v49 = vrot.slane %v3269_v60, %v6544_v17 }
0x2b02   :  { %v5575_v32 = vpop.eup %5574  ;;  %v4599_v62 = vadd.f32 1.0, %v5573_v61  ;;  %v3276_v61 = vrot.slane %v3262_v55, %v6533_v8  ;;  %v4420_v55 = vrot.slane %v4412_v1, %v6533_v8 }
0x2b03   :  { %v4623_v63 = vadd.f32 1.0, %v5575_v32  ;;  %v3301_v32 = vcombine.high %v3300_v56, %v3300_v56  ;;  %v3308_v0 = vrot.slane %v3300_v56, %v6533_v8 }
0x2b04   :  { %5576 = vrcp.f32 %v4599_v62  ;;  %v3539_v62 = vrot.slane %v6426_v26, %v6533_v8  ;;  %v3284_v34 = vrot.slane %v3276_v61, %v6544_v17 }
0x2b05   :  { %5578 = vrcp.f32 %v4623_v63  ;;  %v3045_v63 = vrot.slane %v3037_v54, %v6544_v17  ;;  %v3315_v2 = vrot.slane %v3301_v32, %v6533_v8  ;;  %v3319_v26 = vrot.slane %v3308_v0, %v6544_v17 }
0x2b06   :  { %v3540_v4 = vcombine.high %v3539_v62, %v3539_v62  ;;  %v4392_v54 = vrot.slane %v4381_v51, %v6544_v17 }
0x2b11   :  { %v6535_v33 = vpop.eup %5576 }
0x2b12   :  { %v6540_v35 = vpop.eup %5578  ;;  %v4603_v21 = vmul.f32 %v6535_v33, %v6512_v28 }
0x2b71   :  { %v4606_v10 = vpop.permute.xlu0 %4605 }
0x2b72   :  { %v4608_v5 = vmul.f32 %v6535_v33, %v4606_v10  ;;  %v3547_v10 = vrot.slane %v3539_v62, %v6533_v8 }
0x2b73   :  { %v4630_v19 = vpop.permute.xlu1 %4629 }
0x2b74   :  { %4610 = vrot.lane.b32.xlu0 %v4608_v5, %s5809_s19  ;;  %v4632_v16 = vmul.f32 %v6540_v35, %v4630_v19  ;;  %v3554_v5 = vrot.slane %v3540_v4, %v6533_v8  ;;  %v3579_v19 = vcombine.high %v3578_v7, %v3578_v7  ;;  %v3558_v29 = vrot.slane %v3547_v10, %v6544_v17 }
0x2b76   :  { %4634 = vrot.lane.b32.xlu1 %v4632_v16, %s5809_s19  ;;  %v3323_v16 = vrot.slane %v3315_v2, %v6544_v17  ;;  %v3593_v25 = vrot.slane %v3579_v19, %v6533_v8 }
0x2b78   :  { %2124 = vrot.lane.b32.xlu0 %v6238_v11, %s5812_s15  ;;  %v4627_v11 = vmul.f32 %v6540_v35, %v6515_v36 }
0x2b7a   :  { %2131 = vrot.lane.b32.xlu1 %v6235_v9, %s5812_s15 }
0x2b7c   :  { %2727 = vrot.lane.b32.xlu0 %v2722_v20, %s5810_s11  ;;  %v3818_v20 = vcombine.high %v3817_v13, %v3817_v13 }
0x2b7e   :  { %2729 = vrot.lane.b32.xlu1 %v2726_v14, %s5810_s11  ;;  %v3856_v14 = vrot.slane %v6460_v12, %v6533_v8 }
0x2be6   :  { %v4611_v22 = vpop.permute.xlu0 %4610 }
0x2be7   :  { %v6559_v15 = vadd.f32 %v4611_v22, %v4603_v21  ;;  %v3562_v21 = vrot.slane %v3554_v5, %v6544_v17  ;;  %v3825_v22 = vrot.slane %v3817_v13, %v6533_v8 }
0x2be8   :  { %v4635_v23 = vpop.permute.xlu1 %4634 }
0x2be9   :  { %5580 = vtanh.f32 %v6559_v15  ;;  %v6564_v24 = vadd.f32 %v4635_v23, %v4627_v11  ;;  %v3832_v11 = vrot.slane %v3818_v20, %v6533_v8  ;;  %v3857_v23 = vcombine.high %v3856_v14, %v3856_v14 }
0x2bea   :  { %v2125_v9 = vpop.permute.xlu0 %2124  ;;  %v3836_v12 = vrot.slane %v3825_v22, %v6544_v17 }
0x2beb   :  { %2127 = vst.msk [vmem:[#allocation21] sm:$0x3] %vm646_vm9, %v2125_v9  ;;  %5582 = vtanh.f32 %v6564_v24  ;;  %v4095_v9 = vrot.slane %v6486_v57, %v6533_v8  ;;  %v3871_v31 = vrot.slane %v3857_v23, %v6533_v8  ;;  %v3840_v38 = vrot.slane %v3832_v11, %v6544_v17 }
0x2bec   :  { %v2132_v30 = vpop.permute.xlu1 %2131 }
0x2bed   :  { %2135 = vst.msk [vmem:[#allocation21 + $0x2] sm:$0x3] %vm646_vm9, %v2132_v30  ;;  %v3601_v30 = vrot.slane %v3593_v25, %v6544_v17  ;;  %v4103_v39 = vrot.slane %v4095_v9, %v6533_v8  ;;  %v3879_v45 = vrot.slane %v3871_v31, %v6544_v17 }
0x2bee   :  { %v2728_v28 = vpop.permute.xlu0 %2727 }
0x2bef   :  { %2734 = vst.msk [vmem:[#allocation18] sm:$0x1] %vm2733_vm11, %v2728_v28  ;;  %v3864_v28 = vrot.slane %v3856_v14, %v6533_v8  ;;  %v4114_v59 = vrot.slane %v4103_v39, %v6544_v17 }
0x2bf0   :  { %v2730_v36 = vpop.permute.xlu1 %2729 }
0x2bf1   :  { %2735 = vst.msk [vmem:[#allocation18 + $0x8] sm:$0x1] %vm2733_vm11, %v2730_v36  ;;  %v4096_v36 = vcombine.high %v4095_v9, %v4095_v9  ;;  %v3875_v57 = vrot.slane %v3864_v28, %v6544_v17 }
0x2bf6   :  { %v5581_v41 = vpop.eup %5580 }
0x2bf7   :  { %4616 = vrot.lane.b32.xlu0 %v5581_v41, %s5809_s19  ;;  %v4110_v41 = vrot.slane %v4096_v36, %v6533_v8 }
0x2bf8   :  { %v5583_v46 = vpop.eup %5582 }
0x2bf9   :  { %4640 = vrot.lane.b32.xlu1 %v5583_v46, %s5809_s19  ;;  %v4142_v46 = vrot.slane %v4134_v37, %v6533_v8  ;;  %v4118_v50 = vrot.slane %v4110_v41, %v6544_v17 }
0x2bfb   :  { %2767 = vrot.lane.b32.xlu0 %v2762_v27, %s5812_s15  ;;  %v4149_v27 = vrot.slane %v4135_v43, %v6533_v8  ;;  %v4153_v40 = vrot.slane %v4142_v46, %v6544_v17 }
0x2bfd   :  { %2769 = vrot.lane.b32.xlu1 %v2766_v52, %s5812_s15  ;;  %v4388_v52 = vrot.slane %v4374_v48, %v6533_v8  ;;  %v4157_v3 = vrot.slane %v4149_v27, %v6544_v17 }
0x2bff   :  { %3007 = vrot.lane.b32.xlu0 %v3002_v53, %s5810_s11  ;;  %v4413_v53 = vcombine.high %v4412_v1, %v4412_v1  ;;  %v4396_v56 = vrot.slane %v4388_v52, %v6544_v17 }
0x2c01   :  { %3009 = vrot.lane.b32.xlu1 %v3006_v58, %s5810_s11  ;;  %v4427_v42 = vrot.slane %v4413_v53, %v6533_v8  ;;  %v4431_v58 = vrot.slane %v4420_v55, %v6544_v17 }
0x2c03   :  { %3046 = vrot.lane.b32.xlu0 %v3041_v47, %s5812_s15  ;;  %v4435_v47 = vrot.slane %v4427_v42, %v6544_v17 }
0x2c05   :  { %3048 = vrot.lane.b32.xlu1 %v3045_v63, %s5812_s15 }
0x2c07   :  { %3285 = vrot.lane.b32.xlu0 %v3280_v49, %s5810_s11 }
0x2c09   :  { %3287 = vrot.lane.b32.xlu1 %v3284_v34, %s5810_s11 }
0x2c0b   :  { %3324 = vrot.lane.b32.xlu0 %v3319_v26, %s5812_s15 }
0x2c0d   :  { %3326 = vrot.lane.b32.xlu1 %v3323_v16, %s5812_s15 }
0x2c0f   :  { %3563 = vrot.lane.b32.xlu0 %v3558_v29, %s5810_s11 }
0x2c11   :  { %3565 = vrot.lane.b32.xlu1 %v3562_v21, %s5810_s11 }
0x2c13   :  { %3602 = vrot.lane.b32.xlu0 %v3597_v18, %s5812_s15 }
0x2c15   :  { %3604 = vrot.lane.b32.xlu1 %v3601_v30, %s5812_s15 }
0x2c17   :  { %3841 = vrot.lane.b32.xlu0 %v3836_v12, %s5810_s11 }
0x2c19   :  { %3843 = vrot.lane.b32.xlu1 %v3840_v38, %s5810_s11 }
0x2c1b   :  { %3880 = vrot.lane.b32.xlu0 %v3875_v57, %s5812_s15 }
0x2c1d   :  { %3882 = vrot.lane.b32.xlu1 %v3879_v45, %s5812_s15 }
0x2c1f   :  { %4119 = vrot.lane.b32.xlu0 %v4114_v59, %s5810_s11 }
0x2c21   :  { %4121 = vrot.lane.b32.xlu1 %v4118_v50, %s5810_s11 }
0x2c23   :  { %4158 = vrot.lane.b32.xlu0 %v4153_v40, %s5812_s15 }
0x2c25   :  { %4160 = vrot.lane.b32.xlu1 %v4157_v3, %s5812_s15 }
0x2c27   :  { %4397 = vrot.lane.b32.xlu0 %v4392_v54, %s5810_s11 }
0x2c29   :  { %4399 = vrot.lane.b32.xlu1 %v4396_v56, %s5810_s11 }
0x2c2b   :  { %4436 = vrot.lane.b32.xlu0 %v4431_v58, %s5812_s15 }
0x2c2d   :  { %4438 = vrot.lane.b32.xlu1 %v4435_v47, %s5812_s15 }
0x2c69   :  { %v4617_v60 = vpop.permute.xlu0 %4616 }
0x2c6a   :  { %v4619_v61 = vmul.f32 %v6535_v33, %v4617_v60 }
0x2c6b   :  { %v4641_v62 = vpop.permute.xlu1 %4640 }
0x2c6c   :  { %v4651_v32 = vrot.slane %v4619_v61, %v6533_v8  ;;  %4722 = vrot.lane.b32.xlu0 %v4619_v61, %s5810_s11  ;;  %v4643_v63 = vmul.f32 %v6540_v35, %v4641_v62 }
0x2c6d   :  { %v2768_v49 = vpop.permute.xlu0 %2767 }
0x2c6e   :  { %v4652_v0 = vcombine.high %v4651_v32, %v4651_v32  ;;  %v4659_v2 = vrot.slane %v4651_v32, %v6533_v8  ;;  %2774 = vst.msk [vmem:[#allocation18 + $0x7] sm:$0x1] %vm2773_vm12, %v2768_v49  ;;  %v4690_v4 = vrot.slane %v4643_v63, %v6533_v8  ;;  %4733 = vrot.lane.b32.xlu1 %v4643_v63, %s5810_s11 }
0x2c6f   :  { %v2770_v34 = vpop.permute.xlu1 %2769 }
0x2c70   :  { %v4666_v33 = vrot.slane %v4652_v0, %v6533_v8  ;;  %v4670_v7 = vrot.slane %v4659_v2, %v6544_v17  ;;  %v4691_v26 = vcombine.high %v4690_v4, %v4690_v4  ;;  %v4698_v10 = vrot.slane %v4690_v4, %v6533_v8  ;;  %2775 = vst.msk [vmem:[#allocation18 + $0xf] sm:$0x1] %vm2773_vm12, %v2770_v34 }
0x2c71   :  { %v3008_v35 = vpop.permute.xlu0 %3007 }
0x2c72   :  { %3013 = vst.msk [vmem:[#allocation18 + $0x1] sm:$0x1] %vm2733_vm11, %v3008_v35  ;;  %4675 = vrot.lane.b32.xlu0 %v4670_v7, %s5810_s11  ;;  %v4674_v5 = vrot.slane %v4666_v33, %v6544_v17  ;;  %v4705_v19 = vrot.slane %v4691_v26, %v6533_v8  ;;  %v4709_v13 = vrot.slane %v4698_v10, %v6544_v17 }
0x2c73   :  { %v3010_v16 = vpop.permute.xlu1 %3009 }
0x2c74   :  { %4677 = vrot.lane.b32.xlu1 %v4674_v5, %s5810_s11  ;;  %3014 = vst.msk [vmem:[#allocation18 + $0x9] sm:$0x1] %vm2733_vm11, %v3010_v16  ;;  %v4713_v6 = vrot.slane %v4705_v19, %v6544_v17 }
0x2c75   :  { %v3047_v29 = vpop.permute.xlu0 %3046 }
0x2c76   :  { %3052 = vst.msk [vmem:[#allocation18 + $0x6] sm:$0x1] %vm2773_vm12, %v3047_v29  ;;  %4714 = vrot.lane.b32.xlu0 %v4709_v13, %s5812_s15 }
0x2c77   :  { %v3049_v25 = vpop.permute.xlu1 %3048 }
0x2c78   :  { %4716 = vrot.lane.b32.xlu1 %v4713_v6, %s5812_s15  ;;  %3053 = vst.msk [vmem:[#allocation18 + $0xe] sm:$0x1] %vm2773_vm12, %v3049_v25 }
0x2c79   :  { %v3286_v8 = vpop.permute.xlu0 %3285 }
0x2c7a   :  { %3291 = vst.msk [vmem:[#allocation18 + $0x2] sm:$0x1] %vm2733_vm11, %v3286_v8  ;;  %4728 = vrot.lane.b32.xlu0 %v6559_v15, %s5812_s15 }
0x2c7b   :  { %v3288_v20 = vpop.permute.xlu1 %3287 }
0x2c7c   :  { %4739 = vrot.lane.b32.xlu1 %v6564_v24, %s5812_s15  ;;  %3292 = vst.msk [vmem:[#allocation18 + $0xa] sm:$0x1] %vm2733_vm11, %v3288_v20 }
0x2c7d   :  { %v3325_v14 = vpop.permute.xlu0 %3324 }
0x2c7e   :  { %3330 = vst.msk [vmem:[#allocation18 + $0x5] sm:$0x1] %vm2773_vm12, %v3325_v14 }
0x2c7f   :  { %v3327_v17 = vpop.permute.xlu1 %3326 }
0x2c80   :  { %3331 = vst.msk [vmem:[#allocation18 + $0xd] sm:$0x1] %vm2773_vm12, %v3327_v17 }
0x2c81   :  { %v3564_v21 = vpop.permute.xlu0 %3563 }
0x2c82   :  { %3569 = vst.msk [vmem:[#allocation18 + $0x3] sm:$0x1] %vm2733_vm11, %v3564_v21 }
0x2c83   :  { %v3566_v18 = vpop.permute.xlu1 %3565 }
0x2c84   :  { %3570 = vst.msk [vmem:[#allocation18 + $0xb] sm:$0x1] %vm2733_vm11, %v3566_v18 }
0x2c85   :  { %v3603_v22 = vpop.permute.xlu0 %3602 }
0x2c86   :  { %3608 = vst.msk [vmem:[#allocation18 + $0x4] sm:$0x1] %vm2773_vm12, %v3603_v22 }
0x2c87   :  { %v3605_v15 = vpop.permute.xlu1 %3604 }
0x2c88   :  { %3609 = vst.msk [vmem:[#allocation18 + $0xc] sm:$0x1] %vm2773_vm12, %v3605_v15 }
0x2c89   :  { %v3842_v24 = vpop.permute.xlu0 %3841 }
0x2c8a   :  { %3847 = vst.msk [vmem:[#allocation18 + $0x4] sm:$0x1] %vm2733_vm11, %v3842_v24 }
0x2c8b   :  { %v3844_v11 = vpop.permute.xlu1 %3843 }
0x2c8c   :  { %3848 = vst.msk [vmem:[#allocation18 + $0xc] sm:$0x1] %vm2733_vm11, %v3844_v11 }
0x2c8d   :  { %v3881_v23 = vpop.permute.xlu0 %3880 }
0x2c8e   :  { %3886 = vst.msk [vmem:[#allocation18 + $0x3] sm:$0x1] %vm2773_vm12, %v3881_v23 }
0x2c8f   :  { %v3883_v9 = vpop.permute.xlu1 %3882 }
0x2c90   :  { %3887 = vst.msk [vmem:[#allocation18 + $0xb] sm:$0x1] %vm2773_vm12, %v3883_v9 }
0x2c91   :  { %v4120_v30 = vpop.permute.xlu0 %4119 }
0x2c92   :  { %4125 = vst.msk [vmem:[#allocation18 + $0x5] sm:$0x1] %vm2733_vm11, %v4120_v30 }
0x2c93   :  { %v4122_v12 = vpop.permute.xlu1 %4121 }
0x2c94   :  { %4126 = vst.msk [vmem:[#allocation18 + $0xd] sm:$0x1] %vm2733_vm11, %v4122_v12 }
0x2c95   :  { %v4159_v28 = vpop.permute.xlu0 %4158 }
0x2c96   :  { %4164 = vst.msk [vmem:[#allocation18 + $0x2] sm:$0x1] %vm2773_vm12, %v4159_v28 }
0x2c97   :  { %v4161_v31 = vpop.permute.xlu1 %4160 }
0x2c98   :  { %4165 = vst.msk [vmem:[#allocation18 + $0xa] sm:$0x1] %vm2773_vm12, %v4161_v31 }
0x2c99   :  { %v4398_v36 = vpop.permute.xlu0 %4397 }
0x2c9a   :  { %4403 = vst.msk [vmem:[#allocation18 + $0x6] sm:$0x1] %vm2733_vm11, %v4398_v36 }
0x2c9b   :  { %v4400_v37 = vpop.permute.xlu1 %4399 }
0x2c9c   :  { %4404 = vst.msk [vmem:[#allocation18 + $0xe] sm:$0x1] %vm2733_vm11, %v4400_v37 }
0x2c9d   :  { %v4437_v38 = vpop.permute.xlu0 %4436 }
0x2c9e   :  { %4442 = vst.msk [vmem:[#allocation18 + $0x1] sm:$0x1] %vm2773_vm12, %v4437_v38 }
0x2c9f   :  { %v4439_v57 = vpop.permute.xlu1 %4438 }
0x2ca0   :  { %4443 = vst.msk [vmem:[#allocation18 + $0x9] sm:$0x1] %vm2773_vm12, %v4439_v57 }
0x2cde   :  { %v4723_v39 = vpop.permute.xlu0 %4722 }
0x2cdf   :  { %4726 = vst.msk [vmem:[#allocation19 + $0x4] sm:$0x3] %vm646_vm9, %v4723_v39 }
0x2ce0   :  { %v4734_v41 = vpop.permute.xlu1 %4733 }
0x2ce1   :  { %4737 = vst.msk [vmem:[#allocation19 + $0x6] sm:$0x3] %vm646_vm9, %v4734_v41 }
0x2ce2   :  { %5735 = shalt.err (!%p5732_p11)
}
0x2ce3   :  { %s5814_s10 = smov 32   ;;  %s5815_s30 = smov 2  }
0x2ce4   :  { %4767 = dma.vmem_to_hbm [thread:$0]  %s4762_s29, 128, %s6768_s17, [#allocation20], %s5814_s10, %s5814_s10, %s5815_s30   ;;  %v4676_v43 = vpop.permute.xlu0 %4675 }
0x2ce5   :  { %4681 = vst.msk [vmem:[#allocation18 + $0x7] sm:$0x1] %vm2733_vm11, %v4676_v43  ;;  %s5816_s7 = smov [#allocation18]   ;;  %s5817_s19 = smov [#allocation21]  }
0x2ce6   :  { %v4678_v44 = vpop.permute.xlu1 %4677  ;;  %s4749_s4 = sshll.u32 %s5816_s7, 4  ;;  %s4773_s11 = sshll.u32 %s5817_s19, 4  ;;  %s4750_s4 = int_to_ptr.vmem [resolvable:$true] %s4749_s4  ;;  %s4774_s11 = int_to_ptr.vmem [resolvable:$true] %s4773_s11 }
0x2ce7   :  { %4682 = vst.msk [vmem:[#allocation18 + $0xf] sm:$0x1] %vm2733_vm11, %v4678_v44  ;;  %s5744_s1 = scalar_lea.vmem %s4750_s4, 256  ;;  %p5749_p13 = scmp.lt.s32.totalorder %s4750_s4, %s4750_s4 }
0x2ce8   :  { %v4715_v45 = vpop.permute.xlu0 %4714  ;;  %p5745_p12 = scmp.ne.s32.totalorder %s4750_s4, %s5744_s1  ;;  %p5750_p0 = scmp.lt.s32.totalorder %s5744_s1, %s5744_s1 }
0x2ce9   :  { %4720 = vst.msk [vmem:[#allocation18] sm:$0x1] %vm2773_vm12, %v4715_v45 }
0x2cea   :  { %v4717_v59 = vpop.permute.xlu1 %4716  ;;  %p5751_p1 = por %p5750_p0, %p5749_p13 }
0x2ceb   :  { %4721 = vst.msk [vmem:[#allocation18 + $0x8] sm:$0x1] %vm2773_vm12, %v4717_v59 }
0x2cec   :  { %v4729_v46 = vpop.permute.xlu0 %4728  ;;  %p5752_p2 = pnand %p5751_p1, %p5745_p12 }
0x2cee   :  { %5755 = shalt.err (!%p5752_p2)
}
0x2cef   :  { %4755 = dma.vmem_to_hbm [thread:$0]  %s4750_s4, 256, %s6767_s16, [#allocation8], %s5798_s21, %s5798_s21, %s5799_s22   ;;  %4732 = vst.msk [vmem:[#allocation21 + $0x4] sm:$0x3] %vm646_vm9, %v4729_v46  ;;  %v4740_v27 = vpop.permute.xlu1 %4739 }
0x2cf0   :  { %4743 = vst.msk [vmem:[#allocation21 + $0x6] sm:$0x3] %vm646_vm9, %v4740_v27  ;;  %s5764_s2 = scalar_lea.vmem %s4774_s11, 128  ;;  %p5769_p4 = scmp.lt.s32.totalorder %s4774_s11, %s4774_s11 }
0x2cf1   :  { %p5765_p3 = scmp.ne.s32.totalorder %s4774_s11, %s5764_s2  ;;  %p5770_p5 = scmp.lt.s32.totalorder %s5764_s2, %s5764_s2 }
0x2cf3   :  { %p5771_p6 = por %p5770_p5, %p5769_p4 }
0x2cf5   :  { %p5772_p7 = pnand %p5771_p6, %p5765_p3 }
0x2cf7   :  { %5775 = shalt.err (!%p5772_p7)
}
0x2cf8   :  { %4779 = dma.vmem_to_hbm [thread:$0]  %s4774_s11, 128, %s6769_s18, [#allocation20], %s5814_s10, %s5814_s10, %s5815_s30  }
0x2cf9   :  { %5792 = dma.done.wait [#allocation8], 256  }
0x2cfa   :  { %5793 = vsyncadd [#allocation8], 4294967040 }
0x2cfb   :  { %5794 = dma.done.wait [#allocation20], 256  }
0x2cfc   :  { %5795 = vsyncadd [#allocation20], 4294967040 }
0x2cfd   :  { %4789 = vsyncpa [#allocation7], 1 }
0x2cfe   :  { %4790 = vsyncpa [#allocation10], 1 }
0x2cff   :  { %4791 = vsyncpa [#allocation13], 1 }
0x2d00   :  { %4792 = vsyncpa [#allocation16], 1 }
0x2d01   :  { %4793 = vsyncpa [#allocation8], 1 }
0x2d02   :  { %4794 = vsyncpa [#allocation20], 1 }

</bundles_post_ra>
